<compile_context>
chip_gen: v5e
topology: v5e:2x2
jax: 0.10.0
libtpu: 0.0.40
codegen_flags: <defaults>
</compile_context>

<pallas_src>
import functools

import jax
import jax.numpy as jnp
from jax import lax
from jax.experimental import pallas as pl
from jax.experimental.pallas import tpu as pltpu


# ----------------------------------------------------------------------------
# Kernel
# ----------------------------------------------------------------------------
def _glsa_conv_branch_kernel(
    x_ref,             # (C, L) f32   input / residual slab, L = B_TILE*H*W
    w1_ref, b1_ref,    # conv1: 1x1 (BN folded) + SiLU ; w (Ch,Cin) bf16, b (Ch,1) f32
    w2_ref, b2_ref,    # conv2: depthwise 3x3 ; w (9,Ch,L) mask-fused, b (Ch,1) f32
    w3_ref, b3_ref,    # conv3: 1x1
    w4_ref, b4_ref,    # conv4: depthwise 3x3
    w5_ref, b5_ref,    # conv5: 1x1
    w6_ref, b6_ref,    # conv6: depthwise 3x3
    w7_ref,            # conv7: 1x1, no BN, no bias, + SiLU ; (Cout, Ch) bf16
    o_ref,             # (C, L) f32
    *, W, act_dtype,
):
    lanes = x_ref.shape[-1]

    def sigmoid_f32(v, exact=False):
        d = 1.0 + jnp.exp(-v)
        # approx reciprocal runs on the otherwise-idle EUP; exact only for the
        # final epilogue sigmoid (review accuracy note).
        return 1.0 / d if exact else pl.reciprocal(d, approx=True)

    def silu_f32(v):
        return v * sigmoid_f32(v)

    def conv1x1(v, w_ref_, b_ref_):
        # v: (Cin, L) -> (Cout, L).  bf16 MXU operands, f32 accumulation.
        y = jnp.dot(w_ref_[...], v.astype(jnp.bfloat16),
                    preferred_element_type=jnp.float32)
        return silu_f32(y + b_ref_[...]).astype(act_dtype)

    def dwconv3x3(v, w_ref_, b_ref_):
        # v: (C, L) act_dtype.  Spatial lives on the lane axis: each 3x3 tap is
        # one static lane roll (XLU) + one FMA with the mask-fused tap weight.
        # Accumulator starts from the centre tap (no zero fill).
        acc = v * w_ref_[4]
        taps = [(di, dj) for di in (-1, 0, 1) for dj in (-1, 0, 1)]
        for t, (di, dj) in enumerate(taps):
            if di == 0 and dj == 0:
                continue
            off = di * W + dj
            src = pltpu.roll(v, shift=(-off) % lanes, axis=1)
            acc = acc + src * w_ref_[t]
        return silu_f32(acc.astype(jnp.float32) + b_ref_[...]).astype(act_dtype)

    x = x_ref[...]
    h = conv1x1(x, w1_ref, b1_ref)
    h = h + dwconv3x3(h, w2_ref, b2_ref)
    h = conv1x1(h, w3_ref, b3_ref)
    h = h + dwconv3x3(h, w4_ref, b4_ref)
    h = conv1x1(h, w5_ref, b5_ref)
    h = h + dwconv3x3(h, w6_ref, b6_ref)

    # conv7: plain 1x1 (no BN, no bias) + SiLU, then sigmoid_spatial.
    y7 = jnp.dot(w7_ref[...], h.astype(jnp.bfloat16),
                 preferred_element_type=jnp.float32)
    m = sigmoid_f32(silu_f32(y7), exact=True)

    # res2 + res1 * mask == x * (1 + mask); reload the residual right before
    # the store so it is not kept live across the whole body.
    o_ref[...] = x_ref[...] * (1.0 + m)


# ----------------------------------------------------------------------------
# Wrapper helpers
# ----------------------------------------------------------------------------
def _select_act_dtype():
    """bf16 vector math only where the VPU/EUP have bf16 paths (v6e/v7x)."""
    try:
        kind = jax.devices()[0].device_kind.lower()
    except Exception:
        return jnp.float32
    if "v6" in kind or "v7" in kind:
        return jnp.bfloat16
    return jnp.float32


def _choose_batch_tile(n, hw, *, max_lanes=4096, min_chunks=2):
    """Images per grid step.  Keep >=2 grid chunks when the batch allows (v7x
    megacore) and bound the lane width so the mask-fused dw weights stay small
    in VMEM (important on v7x's 64 MiB).  Chunks always hold whole images, so
    the roll-based depthwise conv needs no halo handling."""
    b = max(1, min(n // min_chunks if n >= min_chunks else n,
                   max(1, max_lanes // hw)))
    while n % b:
        b -= 1
    return b


def _prepare_kernel_params(p, H, W, b_tile, act_dtype):
    """Transpose/cast 1x1 weights to bf16, fuse per-tap boundary masks into the
    depthwise tap weights, and reshape biases to broadcastable columns."""
    hw = H * W
    kp = {}
    for name in ("1", "3", "5", "7"):                  # 1x1 weights -> (Cout, Cin) bf16
        kp["w" + name] = jnp.transpose(p["w" + name]).astype(jnp.bfloat16)
    for name in ("1", "3", "5"):                       # folded-BN biases -> (Ch, 1)
        kp["b" + name] = p["b" + name].reshape(-1, 1).astype(jnp.float32)

    # Per-tap validity masks over the flattened (h, w) lane axis (SAME padding).
    hh = jnp.arange(hw) // W
    ww = jnp.arange(hw) % W
    masks = []
    for di in (-1, 0, 1):
        for dj in (-1, 0, 1):
            ok = ((hh + di >= 0) & (hh + di < H) &
                  (ww + dj >= 0) & (ww + dj < W))
            masks.append(ok.astype(jnp.float32))
    mask = jnp.stack(masks).reshape(9, 1, hw)          # (9, 1, HW)

    for name in ("2", "4", "6"):                       # dw taps, mask-fused
        w9 = p["w" + name].reshape(9, -1, 1).astype(jnp.float32)   # (9, C, 1)
        fused = w9 * mask                                          # (9, C, HW)
        fused = jnp.tile(fused, (1, 1, b_tile))                    # (9, C, B_TILE*HW)
        kp["w" + name] = fused.astype(act_dtype)
        kp["b" + name] = p["b" + name].reshape(-1, 1).astype(jnp.float32)
    return kp


def glsa_conv_branch(x_nchw, params):
    """x_nchw: (N, C, H, W) float32 (PyTorch-native layout)."""
    N, C, H, W = x_nchw.shape
    c_out = params["w7"].shape[1]
    assert c_out == C, "residual requires out_features == in_features"
    hw = H * W
    # For production shapes where H*W is not a multiple of 128, pad the
    # flattened spatial axis (and extend the masks) to stay lane-dense.
    assert hw % 128 == 0, "pad H*W to a multiple of 128 for lane-dense blocks"

    act_dtype = _select_act_dtype()
    b_tile = _choose_batch_tile(N, hw)
    lanes = b_tile * hw
    n_chunks = N // b_tile

    kp = _prepare_kernel_params(params, H, W, b_tile, act_dtype)
    consts = [
        kp["w1"], kp["b1"], kp["w2"], kp["b2"],
        kp["w3"], kp["b3"], kp["w4"], kp["b4"],
        kp["w5"], kp["b5"], kp["w6"], kp["b6"],
        kp["w7"],
    ]

    # Channels on sublanes, (batch-chunk x spatial) on lanes.
    x2d = jnp.transpose(x_nchw, (1, 0, 2, 3)).reshape(C, N * hw)

    def const_spec(arr):
        # Constant block index -> not re-fetched across grid steps.  (At
        # production HW sizes, also consider pipeline_mode=pl.Buffered(1) and
        # vmem_limit_bytes for v7x's 64 MiB VMEM.)
        nd = arr.ndim
        return pl.BlockSpec(arr.shape, lambda i, _nd=nd: (0,) * _nd)

    in_specs = [pl.BlockSpec((C, lanes), lambda i: (0, i))]
    in_specs += [const_spec(a) for a in consts]
    out_spec = pl.BlockSpec((C, lanes), lambda i: (0, i))

    kernel = functools.partial(_glsa_conv_branch_kernel, W=W, act_dtype=act_dtype)

    out2d = pl.pallas_call(
        kernel,
        out_shape=jax.ShapeDtypeStruct((C, N * hw), jnp.float32),
        grid_spec=pltpu.PrefetchScalarGridSpec(
            num_scalar_prefetch=0,
            grid=(n_chunks,),
            in_specs=in_specs,
            out_specs=out_spec,
        ),
        # Batch chunks are independent -> "parallel" lets v7x shard across its
        # two TensorCores; harmless on single-TC v5e/v6e.
        compiler_params=pltpu.CompilerParams(
            dimension_semantics=("parallel",)),
    )(x2d, *consts)

    return jnp.transpose(out2d.reshape(C, N, H, W), (1, 0, 2, 3))


# ----------------------------------------------------------------------------
# Deterministic parameter construction (fold BatchNorm into conv weight+bias)
# ----------------------------------------------------------------------------
def _fold_bn(w, gamma, beta, mean, var, eps=1e-5):
    # w has the output channel on its LAST axis.
    s = gamma / jnp.sqrt(var + eps)
    return (w * s).astype(jnp.float32), (beta - mean * s).astype(jnp.float32)


def make_params(key, c_in, c_hidden, c_out=None):
    c_out = c_out or c_in
    ks = jax.random.split(key, 32)
    ki = iter(range(32))

    def bn(cout):
        gamma = jax.random.uniform(ks[next(ki)], (cout,), minval=0.8, maxval=1.2)
        beta = 0.05 * jax.random.normal(ks[next(ki)], (cout,))
        mean = 0.05 * jax.random.normal(ks[next(ki)], (cout,))
        var = jax.random.uniform(ks[next(ki)], (cout,), minval=0.5, maxval=1.5)
        return gamma, beta, mean, var

    p = {}
    # conv1 / conv3 / conv5: 1x1, stored (Cin, Cout)
    for name, cin in (("1", c_in), ("3", c_hidden), ("5", c_hidden)):
        w = 0.1 * jax.random.normal(ks[next(ki)], (cin, c_hidden))
        p["w" + name], p["b" + name] = _fold_bn(w, *bn(c_hidden))
    # conv2 / conv4 / conv6: depthwise 3x3, stored (9, C) tap-major
    for name in ("2", "4", "6"):
        w = 0.1 * jax.random.normal(ks[next(ki)], (9, c_hidden))
        p["w" + name], p["b" + name] = _fold_bn(w, *bn(c_hidden))
    # conv7: plain 1x1, no BN, no bias
    p["w7"] = (0.1 * jax.random.normal(ks[next(ki)], (c_hidden, c_out))
               ).astype(jnp.float32)
    return p


# ----------------------------------------------------------------------------
# Pure-JAX reference (NCHW, f32) for verification
# ----------------------------------------------------------------------------
def reference_forward(x, p):
    def silu(v):
        return v * jax.nn.sigmoid(v)

    def conv1x1(v, w, b):
        y = jnp.einsum("nchw,cd->ndhw", v, w) + b[None, :, None, None]
        return silu(y)

    def dwconv(v, w9, b):
        c = v.shape[1]
        w = jnp.transpose(w9, (1, 0)).reshape(c, 1, 3, 3)   # OIHW, depthwise
        y = lax.conv_general_dilated(
            v, w, (1, 1), "SAME",
            dimension_numbers=("NCHW", "OIHW", "NCHW"),
            feature_group_count=c)
        return silu(y + b[None, :, None, None])

    res = x
    h = conv1x1(x, p["w1"], p["b1"])
    h = h + dwconv(h, p["w2"], p["b2"])
    h = conv1x1(h, p["w3"], p["b3"])
    h = h + dwconv(h, p["w4"], p["b4"])
    h = conv1x1(h, p["w5"], p["b5"])
    h = h + dwconv(h, p["w6"], p["b6"])
    h = silu(jnp.einsum("nchw,cd->ndhw", h, p["w7"]))
    mask = jax.nn.sigmoid(h)
    return res + res * mask


if __name__ == "__main__":
    N, C, H, W = 2, 32, 16, 16   # in_features = hidden = out = 32
    key = jax.random.PRNGKey(0)
    kx, kparam = jax.random.split(key)

    x = jax.random.normal(kx, (N, C, H, W), dtype=jnp.float32)   # NCHW like PyTorch
    params = make_params(kparam, C, C)

    out = jax.block_until_ready(glsa_conv_branch(x, params))
    ref = jax.block_until_ready(reference_forward(x, params))

    assert out.shape == (N, C, H, W)
    # bf16 MXU (and, on v6e/v7x, bf16 dwconv chain) + approx EUP reciprocals
    # -> looser tolerance than pure f32; real layout/indexing bugs would show
    # up as O(1) errors.
    max_err = float(jnp.max(jnp.abs(out - ref)))
    assert jnp.allclose(out, ref, atol=5e-2, rtol=5e-2), max_err
    print("KERNEL_OK")
</pallas_src>

<mosaic_0001>
module attributes {stable_mosaic.version = 11 : i64} {
  func.func @_glsa_conv_branch_kernel(%arg0: i32, %arg1: memref<32x256xf32, #tpu.memory_space<vmem>>, %arg2: memref<32x32xbf16, #tpu.memory_space<vmem>>, %arg3: memref<32x1xf32, #tpu.memory_space<vmem>>, %arg4: memref<9x32x256xf32, #tpu.memory_space<vmem>>, %arg5: memref<32x1xf32, #tpu.memory_space<vmem>>, %arg6: memref<32x32xbf16, #tpu.memory_space<vmem>>, %arg7: memref<32x1xf32, #tpu.memory_space<vmem>>, %arg8: memref<9x32x256xf32, #tpu.memory_space<vmem>>, %arg9: memref<32x1xf32, #tpu.memory_space<vmem>>, %arg10: memref<32x32xbf16, #tpu.memory_space<vmem>>, %arg11: memref<32x1xf32, #tpu.memory_space<vmem>>, %arg12: memref<9x32x256xf32, #tpu.memory_space<vmem>>, %arg13: memref<32x1xf32, #tpu.memory_space<vmem>>, %arg14: memref<32x32xbf16, #tpu.memory_space<vmem>>, %arg15: memref<32x256xf32, #tpu.memory_space<vmem>>) attributes {dimension_semantics = [#tpu.dimension_semantics<parallel>], iteration_bounds = array<i64: 2>, scalar_prefetch = 0 : i64, scratch_operands = 0 : i64, tpu.core_type = #tpu.core_type<tc>, window_params = [{transform_indices = @transform_0, window_bounds = array<i64: 32, 256>}, {pipeline_mode = #tpu.pipeline_mode<synchronous>, transform_indices = @transform_1, window_bounds = array<i64: 32, 32>}, {pipeline_mode = #tpu.pipeline_mode<synchronous>, transform_indices = @transform_2, window_bounds = array<i64: 32, 1>}, {pipeline_mode = #tpu.pipeline_mode<synchronous>, transform_indices = @transform_3, window_bounds = array<i64: 9, 32, 256>}, {pipeline_mode = #tpu.pipeline_mode<synchronous>, transform_indices = @transform_4, window_bounds = array<i64: 32, 1>}, {pipeline_mode = #tpu.pipeline_mode<synchronous>, transform_indices = @transform_5, window_bounds = array<i64: 32, 32>}, {pipeline_mode = #tpu.pipeline_mode<synchronous>, transform_indices = @transform_6, window_bounds = array<i64: 32, 1>}, {pipeline_mode = #tpu.pipeline_mode<synchronous>, transform_indices = @transform_7, window_bounds = array<i64: 9, 32, 256>}, {pipeline_mode = #tpu.pipeline_mode<synchronous>, transform_indices = @transform_8, window_bounds = array<i64: 32, 1>}, {pipeline_mode = #tpu.pipeline_mode<synchronous>, transform_indices = @transform_9, window_bounds = array<i64: 32, 32>}, {pipeline_mode = #tpu.pipeline_mode<synchronous>, transform_indices = @transform_10, window_bounds = array<i64: 32, 1>}, {pipeline_mode = #tpu.pipeline_mode<synchronous>, transform_indices = @transform_11, window_bounds = array<i64: 9, 32, 256>}, {pipeline_mode = #tpu.pipeline_mode<synchronous>, transform_indices = @transform_12, window_bounds = array<i64: 32, 1>}, {pipeline_mode = #tpu.pipeline_mode<synchronous>, transform_indices = @transform_13, window_bounds = array<i64: 32, 32>}, {transform_indices = @transform_14, window_bounds = array<i64: 32, 256>}]} {
    %c0 = arith.constant 0 : index
    %c0_0 = arith.constant 0 : index
    %0 = vector.load %arg1[%c0, %c0_0] : memref<32x256xf32, #tpu.memory_space<vmem>>, vector<32x256xf32>
    %c0_1 = arith.constant 0 : index
    %c0_2 = arith.constant 0 : index
    %1 = vector.load %arg2[%c0_1, %c0_2] : memref<32x32xbf16, #tpu.memory_space<vmem>>, vector<32x32xbf16>
    %2 = arith.truncf %0 : vector<32x256xf32> to vector<32x256xbf16>
    %cst = arith.constant dense<0.000000e+00> : vector<32x256xf32>
    %3 = tpu.matmul %1, %2, %cst {dimension_numbers = #tpu.dot_dimension_numbers<[1], [0], [0], [1], [0, 0, 1, 1], [], []>} : vector<32x32xbf16>, vector<32x256xbf16>, vector<32x256xf32> -> vector<32x256xf32>
    %c0_3 = arith.constant 0 : index
    %c0_4 = arith.constant 0 : index
    %4 = vector.load %arg3[%c0_3, %c0_4] : memref<32x1xf32, #tpu.memory_space<vmem>>, vector<32x1xf32>
    %5 = vector.broadcast %4 : vector<32x1xf32> to vector<32x256xf32>
    %6 = arith.addf %3, %5 : vector<32x256xf32>
    %cst_5 = arith.constant 0.000000e+00 : f32
    %7 = vector.broadcast %cst_5 : f32 to vector<32x256xf32>
    %8 = arith.subf %7, %6 : vector<32x256xf32>
    %9 = math.exp %8 : vector<32x256xf32>
    %cst_6 = arith.constant 1.000000e+00 : f32
    %10 = vector.broadcast %cst_6 : f32 to vector<32x256xf32>
    %11 = arith.addf %10, %9 : vector<32x256xf32>
    %12 = tpu.reciprocal %11 {approx = true} : vector<32x256xf32> -> vector<32x256xf32>
    %13 = arith.mulf %6, %12 : vector<32x256xf32>
    %c4 = arith.constant 4 : index
    %c0_7 = arith.constant 0 : index
    %c0_8 = arith.constant 0 : index
    %14 = vector.load %arg4[%c4, %c0_7, %c0_8] : memref<9x32x256xf32, #tpu.memory_space<vmem>>, vector<1x32x256xf32>
    %15 = vector.shape_cast %14 : vector<1x32x256xf32> to vector<32x256xf32>
    %16 = arith.mulf %13, %15 : vector<32x256xf32>
    %c17_i32 = arith.constant 17 : i32
    %17 = tpu.dynamic_rotate %13 by %c17_i32 dim 1 : vector<32x256xf32>, i32 -> vector<32x256xf32>
    %c0_9 = arith.constant 0 : index
    %c0_10 = arith.constant 0 : index
    %c0_11 = arith.constant 0 : index
    %18 = vector.load %arg4[%c0_9, %c0_10, %c0_11] : memref<9x32x256xf32, #tpu.memory_space<vmem>>, vector<1x32x256xf32>
    %19 = vector.shape_cast %18 : vector<1x32x256xf32> to vector<32x256xf32>
    %20 = arith.mulf %17, %19 : vector<32x256xf32>
    %21 = arith.addf %16, %20 : vector<32x256xf32>
    %c16_i32 = arith.constant 16 : i32
    %22 = tpu.dynamic_rotate %13 by %c16_i32 dim 1 : vector<32x256xf32>, i32 -> vector<32x256xf32>
    %c1 = arith.constant 1 : index
    %c0_12 = arith.constant 0 : index
    %c0_13 = arith.constant 0 : index
    %23 = vector.load %arg4[%c1, %c0_12, %c0_13] : memref<9x32x256xf32, #tpu.memory_space<vmem>>, vector<1x32x256xf32>
    %24 = vector.shape_cast %23 : vector<1x32x256xf32> to vector<32x256xf32>
    %25 = arith.mulf %22, %24 : vector<32x256xf32>
    %26 = arith.addf %21, %25 : vector<32x256xf32>
    %c15_i32 = arith.constant 15 : i32
    %27 = tpu.dynamic_rotate %13 by %c15_i32 dim 1 : vector<32x256xf32>, i32 -> vector<32x256xf32>
    %c2 = arith.constant 2 : index
    %c0_14 = arith.constant 0 : index
    %c0_15 = arith.constant 0 : index
    %28 = vector.load %arg4[%c2, %c0_14, %c0_15] : memref<9x32x256xf32, #tpu.memory_space<vmem>>, vector<1x32x256xf32>
    %29 = vector.shape_cast %28 : vector<1x32x256xf32> to vector<32x256xf32>
    %30 = arith.mulf %27, %29 : vector<32x256xf32>
    %31 = arith.addf %26, %30 : vector<32x256xf32>
    %c1_i32 = arith.constant 1 : i32
    %32 = tpu.dynamic_rotate %13 by %c1_i32 dim 1 : vector<32x256xf32>, i32 -> vector<32x256xf32>
    %c3 = arith.constant 3 : index
    %c0_16 = arith.constant 0 : index
    %c0_17 = arith.constant 0 : index
    %33 = vector.load %arg4[%c3, %c0_16, %c0_17] : memref<9x32x256xf32, #tpu.memory_space<vmem>>, vector<1x32x256xf32>
    %34 = vector.shape_cast %33 : vector<1x32x256xf32> to vector<32x256xf32>
    %35 = arith.mulf %32, %34 : vector<32x256xf32>
    %36 = arith.addf %31, %35 : vector<32x256xf32>
    %c255_i32 = arith.constant 255 : i32
    %37 = tpu.dynamic_rotate %13 by %c255_i32 dim 1 : vector<32x256xf32>, i32 -> vector<32x256xf32>
    %c5 = arith.constant 5 : index
    %c0_18 = arith.constant 0 : index
    %c0_19 = arith.constant 0 : index
    %38 = vector.load %arg4[%c5, %c0_18, %c0_19] : memref<9x32x256xf32, #tpu.memory_space<vmem>>, vector<1x32x256xf32>
    %39 = vector.shape_cast %38 : vector<1x32x256xf32> to vector<32x256xf32>
    %40 = arith.mulf %37, %39 : vector<32x256xf32>
    %41 = arith.addf %36, %40 : vector<32x256xf32>
    %c241_i32 = arith.constant 241 : i32
    %42 = tpu.dynamic_rotate %13 by %c241_i32 dim 1 : vector<32x256xf32>, i32 -> vector<32x256xf32>
    %c6 = arith.constant 6 : index
    %c0_20 = arith.constant 0 : index
    %c0_21 = arith.constant 0 : index
    %43 = vector.load %arg4[%c6, %c0_20, %c0_21] : memref<9x32x256xf32, #tpu.memory_space<vmem>>, vector<1x32x256xf32>
    %44 = vector.shape_cast %43 : vector<1x32x256xf32> to vector<32x256xf32>
    %45 = arith.mulf %42, %44 : vector<32x256xf32>
    %46 = arith.addf %41, %45 : vector<32x256xf32>
    %c240_i32 = arith.constant 240 : i32
    %47 = tpu.dynamic_rotate %13 by %c240_i32 dim 1 : vector<32x256xf32>, i32 -> vector<32x256xf32>
    %c7 = arith.constant 7 : index
    %c0_22 = arith.constant 0 : index
    %c0_23 = arith.constant 0 : index
    %48 = vector.load %arg4[%c7, %c0_22, %c0_23] : memref<9x32x256xf32, #tpu.memory_space<vmem>>, vector<1x32x256xf32>
    %49 = vector.shape_cast %48 : vector<1x32x256xf32> to vector<32x256xf32>
    %50 = arith.mulf %47, %49 : vector<32x256xf32>
    %51 = arith.addf %46, %50 : vector<32x256xf32>
    %c239_i32 = arith.constant 239 : i32
    %52 = tpu.dynamic_rotate %13 by %c239_i32 dim 1 : vector<32x256xf32>, i32 -> vector<32x256xf32>
    %c8 = arith.constant 8 : index
    %c0_24 = arith.constant 0 : index
    %c0_25 = arith.constant 0 : index
    %53 = vector.load %arg4[%c8, %c0_24, %c0_25] : memref<9x32x256xf32, #tpu.memory_space<vmem>>, vector<1x32x256xf32>
    %54 = vector.shape_cast %53 : vector<1x32x256xf32> to vector<32x256xf32>
    %55 = arith.mulf %52, %54 : vector<32x256xf32>
    %56 = arith.addf %51, %55 : vector<32x256xf32>
    %c0_26 = arith.constant 0 : index
    %c0_27 = arith.constant 0 : index
    %57 = vector.load %arg5[%c0_26, %c0_27] : memref<32x1xf32, #tpu.memory_space<vmem>>, vector<32x1xf32>
    %58 = vector.broadcast %57 : vector<32x1xf32> to vector<32x256xf32>
    %59 = arith.addf %56, %58 : vector<32x256xf32>
    %cst_28 = arith.constant 0.000000e+00 : f32
    %60 = vector.broadcast %cst_28 : f32 to vector<32x256xf32>
    %61 = arith.subf %60, %59 : vector<32x256xf32>
    %62 = math.exp %61 : vector<32x256xf32>
    %cst_29 = arith.constant 1.000000e+00 : f32
    %63 = vector.broadcast %cst_29 : f32 to vector<32x256xf32>
    %64 = arith.addf %63, %62 : vector<32x256xf32>
    %65 = tpu.reciprocal %64 {approx = true} : vector<32x256xf32> -> vector<32x256xf32>
    %66 = arith.mulf %59, %65 : vector<32x256xf32>
    %67 = arith.addf %13, %66 : vector<32x256xf32>
    %c0_30 = arith.constant 0 : index
    %c0_31 = arith.constant 0 : index
    %68 = vector.load %arg6[%c0_30, %c0_31] : memref<32x32xbf16, #tpu.memory_space<vmem>>, vector<32x32xbf16>
    %69 = arith.truncf %67 : vector<32x256xf32> to vector<32x256xbf16>
    %cst_32 = arith.constant dense<0.000000e+00> : vector<32x256xf32>
    %70 = tpu.matmul %68, %69, %cst_32 {dimension_numbers = #tpu.dot_dimension_numbers<[1], [0], [0], [1], [0, 0, 1, 1], [], []>} : vector<32x32xbf16>, vector<32x256xbf16>, vector<32x256xf32> -> vector<32x256xf32>
    %c0_33 = arith.constant 0 : index
    %c0_34 = arith.constant 0 : index
    %71 = vector.load %arg7[%c0_33, %c0_34] : memref<32x1xf32, #tpu.memory_space<vmem>>, vector<32x1xf32>
    %72 = vector.broadcast %71 : vector<32x1xf32> to vector<32x256xf32>
    %73 = arith.addf %70, %72 : vector<32x256xf32>
    %cst_35 = arith.constant 0.000000e+00 : f32
    %74 = vector.broadcast %cst_35 : f32 to vector<32x256xf32>
    %75 = arith.subf %74, %73 : vector<32x256xf32>
    %76 = math.exp %75 : vector<32x256xf32>
    %cst_36 = arith.constant 1.000000e+00 : f32
    %77 = vector.broadcast %cst_36 : f32 to vector<32x256xf32>
    %78 = arith.addf %77, %76 : vector<32x256xf32>
    %79 = tpu.reciprocal %78 {approx = true} : vector<32x256xf32> -> vector<32x256xf32>
    %80 = arith.mulf %73, %79 : vector<32x256xf32>
    %c4_37 = arith.constant 4 : index
    %c0_38 = arith.constant 0 : index
    %c0_39 = arith.constant 0 : index
    %81 = vector.load %arg8[%c4_37, %c0_38, %c0_39] : memref<9x32x256xf32, #tpu.memory_space<vmem>>, vector<1x32x256xf32>
    %82 = vector.shape_cast %81 : vector<1x32x256xf32> to vector<32x256xf32>
    %83 = arith.mulf %80, %82 : vector<32x256xf32>
    %c17_i32_40 = arith.constant 17 : i32
    %84 = tpu.dynamic_rotate %80 by %c17_i32_40 dim 1 : vector<32x256xf32>, i32 -> vector<32x256xf32>
    %c0_41 = arith.constant 0 : index
    %c0_42 = arith.constant 0 : index
    %c0_43 = arith.constant 0 : index
    %85 = vector.load %arg8[%c0_41, %c0_42, %c0_43] : memref<9x32x256xf32, #tpu.memory_space<vmem>>, vector<1x32x256xf32>
    %86 = vector.shape_cast %85 : vector<1x32x256xf32> to vector<32x256xf32>
    %87 = arith.mulf %84, %86 : vector<32x256xf32>
    %88 = arith.addf %83, %87 : vector<32x256xf32>
    %c16_i32_44 = arith.constant 16 : i32
    %89 = tpu.dynamic_rotate %80 by %c16_i32_44 dim 1 : vector<32x256xf32>, i32 -> vector<32x256xf32>
    %c1_45 = arith.constant 1 : index
    %c0_46 = arith.constant 0 : index
    %c0_47 = arith.constant 0 : index
    %90 = vector.load %arg8[%c1_45, %c0_46, %c0_47] : memref<9x32x256xf32, #tpu.memory_space<vmem>>, vector<1x32x256xf32>
    %91 = vector.shape_cast %90 : vector<1x32x256xf32> to vector<32x256xf32>
    %92 = arith.mulf %89, %91 : vector<32x256xf32>
    %93 = arith.addf %88, %92 : vector<32x256xf32>
    %c15_i32_48 = arith.constant 15 : i32
    %94 = tpu.dynamic_rotate %80 by %c15_i32_48 dim 1 : vector<32x256xf32>, i32 -> vector<32x256xf32>
    %c2_49 = arith.constant 2 : index
    %c0_50 = arith.constant 0 : index
    %c0_51 = arith.constant 0 : index
    %95 = vector.load %arg8[%c2_49, %c0_50, %c0_51] : memref<9x32x256xf32, #tpu.memory_space<vmem>>, vector<1x32x256xf32>
    %96 = vector.shape_cast %95 : vector<1x32x256xf32> to vector<32x256xf32>
    %97 = arith.mulf %94, %96 : vector<32x256xf32>
    %98 = arith.addf %93, %97 : vector<32x256xf32>
    %c1_i32_52 = arith.constant 1 : i32
    %99 = tpu.dynamic_rotate %80 by %c1_i32_52 dim 1 : vector<32x256xf32>, i32 -> vector<32x256xf32>
    %c3_53 = arith.constant 3 : index
    %c0_54 = arith.constant 0 : index
    %c0_55 = arith.constant 0 : index
    %100 = vector.load %arg8[%c3_53, %c0_54, %c0_55] : memref<9x32x256xf32, #tpu.memory_space<vmem>>, vector<1x32x256xf32>
    %101 = vector.shape_cast %100 : vector<1x32x256xf32> to vector<32x256xf32>
    %102 = arith.mulf %99, %101 : vector<32x256xf32>
    %103 = arith.addf %98, %102 : vector<32x256xf32>
    %c255_i32_56 = arith.constant 255 : i32
    %104 = tpu.dynamic_rotate %80 by %c255_i32_56 dim 1 : vector<32x256xf32>, i32 -> vector<32x256xf32>
    %c5_57 = arith.constant 5 : index
    %c0_58 = arith.constant 0 : index
    %c0_59 = arith.constant 0 : index
    %105 = vector.load %arg8[%c5_57, %c0_58, %c0_59] : memref<9x32x256xf32, #tpu.memory_space<vmem>>, vector<1x32x256xf32>
    %106 = vector.shape_cast %105 : vector<1x32x256xf32> to vector<32x256xf32>
    %107 = arith.mulf %104, %106 : vector<32x256xf32>
    %108 = arith.addf %103, %107 : vector<32x256xf32>
    %c241_i32_60 = arith.constant 241 : i32
    %109 = tpu.dynamic_rotate %80 by %c241_i32_60 dim 1 : vector<32x256xf32>, i32 -> vector<32x256xf32>
    %c6_61 = arith.constant 6 : index
    %c0_62 = arith.constant 0 : index
    %c0_63 = arith.constant 0 : index
    %110 = vector.load %arg8[%c6_61, %c0_62, %c0_63] : memref<9x32x256xf32, #tpu.memory_space<vmem>>, vector<1x32x256xf32>
    %111 = vector.shape_cast %110 : vector<1x32x256xf32> to vector<32x256xf32>
    %112 = arith.mulf %109, %111 : vector<32x256xf32>
    %113 = arith.addf %108, %112 : vector<32x256xf32>
    %c240_i32_64 = arith.constant 240 : i32
    %114 = tpu.dynamic_rotate %80 by %c240_i32_64 dim 1 : vector<32x256xf32>, i32 -> vector<32x256xf32>
    %c7_65 = arith.constant 7 : index
    %c0_66 = arith.constant 0 : index
    %c0_67 = arith.constant 0 : index
    %115 = vector.load %arg8[%c7_65, %c0_66, %c0_67] : memref<9x32x256xf32, #tpu.memory_space<vmem>>, vector<1x32x256xf32>
    %116 = vector.shape_cast %115 : vector<1x32x256xf32> to vector<32x256xf32>
    %117 = arith.mulf %114, %116 : vector<32x256xf32>
    %118 = arith.addf %113, %117 : vector<32x256xf32>
    %c239_i32_68 = arith.constant 239 : i32
    %119 = tpu.dynamic_rotate %80 by %c239_i32_68 dim 1 : vector<32x256xf32>, i32 -> vector<32x256xf32>
    %c8_69 = arith.constant 8 : index
    %c0_70 = arith.constant 0 : index
    %c0_71 = arith.constant 0 : index
    %120 = vector.load %arg8[%c8_69, %c0_70, %c0_71] : memref<9x32x256xf32, #tpu.memory_space<vmem>>, vector<1x32x256xf32>
    %121 = vector.shape_cast %120 : vector<1x32x256xf32> to vector<32x256xf32>
    %122 = arith.mulf %119, %121 : vector<32x256xf32>
    %123 = arith.addf %118, %122 : vector<32x256xf32>
    %c0_72 = arith.constant 0 : index
    %c0_73 = arith.constant 0 : index
    %124 = vector.load %arg9[%c0_72, %c0_73] : memref<32x1xf32, #tpu.memory_space<vmem>>, vector<32x1xf32>
    %125 = vector.broadcast %124 : vector<32x1xf32> to vector<32x256xf32>
    %126 = arith.addf %123, %125 : vector<32x256xf32>
    %cst_74 = arith.constant 0.000000e+00 : f32
    %127 = vector.broadcast %cst_74 : f32 to vector<32x256xf32>
    %128 = arith.subf %127, %126 : vector<32x256xf32>
    %129 = math.exp %128 : vector<32x256xf32>
    %cst_75 = arith.constant 1.000000e+00 : f32
    %130 = vector.broadcast %cst_75 : f32 to vector<32x256xf32>
    %131 = arith.addf %130, %129 : vector<32x256xf32>
    %132 = tpu.reciprocal %131 {approx = true} : vector<32x256xf32> -> vector<32x256xf32>
    %133 = arith.mulf %126, %132 : vector<32x256xf32>
    %134 = arith.addf %80, %133 : vector<32x256xf32>
    %c0_76 = arith.constant 0 : index
    %c0_77 = arith.constant 0 : index
    %135 = vector.load %arg10[%c0_76, %c0_77] : memref<32x32xbf16, #tpu.memory_space<vmem>>, vector<32x32xbf16>
    %136 = arith.truncf %134 : vector<32x256xf32> to vector<32x256xbf16>
    %cst_78 = arith.constant dense<0.000000e+00> : vector<32x256xf32>
    %137 = tpu.matmul %135, %136, %cst_78 {dimension_numbers = #tpu.dot_dimension_numbers<[1], [0], [0], [1], [0, 0, 1, 1], [], []>} : vector<32x32xbf16>, vector<32x256xbf16>, vector<32x256xf32> -> vector<32x256xf32>
    %c0_79 = arith.constant 0 : index
    %c0_80 = arith.constant 0 : index
    %138 = vector.load %arg11[%c0_79, %c0_80] : memref<32x1xf32, #tpu.memory_space<vmem>>, vector<32x1xf32>
    %139 = vector.broadcast %138 : vector<32x1xf32> to vector<32x256xf32>
    %140 = arith.addf %137, %139 : vector<32x256xf32>
    %cst_81 = arith.constant 0.000000e+00 : f32
    %141 = vector.broadcast %cst_81 : f32 to vector<32x256xf32>
    %142 = arith.subf %141, %140 : vector<32x256xf32>
    %143 = math.exp %142 : vector<32x256xf32>
    %cst_82 = arith.constant 1.000000e+00 : f32
    %144 = vector.broadcast %cst_82 : f32 to vector<32x256xf32>
    %145 = arith.addf %144, %143 : vector<32x256xf32>
    %146 = tpu.reciprocal %145 {approx = true} : vector<32x256xf32> -> vector<32x256xf32>
    %147 = arith.mulf %140, %146 : vector<32x256xf32>
    %c4_83 = arith.constant 4 : index
    %c0_84 = arith.constant 0 : index
    %c0_85 = arith.constant 0 : index
    %148 = vector.load %arg12[%c4_83, %c0_84, %c0_85] : memref<9x32x256xf32, #tpu.memory_space<vmem>>, vector<1x32x256xf32>
    %149 = vector.shape_cast %148 : vector<1x32x256xf32> to vector<32x256xf32>
    %150 = arith.mulf %147, %149 : vector<32x256xf32>
    %c17_i32_86 = arith.constant 17 : i32
    %151 = tpu.dynamic_rotate %147 by %c17_i32_86 dim 1 : vector<32x256xf32>, i32 -> vector<32x256xf32>
    %c0_87 = arith.constant 0 : index
    %c0_88 = arith.constant 0 : index
    %c0_89 = arith.constant 0 : index
    %152 = vector.load %arg12[%c0_87, %c0_88, %c0_89] : memref<9x32x256xf32, #tpu.memory_space<vmem>>, vector<1x32x256xf32>
    %153 = vector.shape_cast %152 : vector<1x32x256xf32> to vector<32x256xf32>
    %154 = arith.mulf %151, %153 : vector<32x256xf32>
    %155 = arith.addf %150, %154 : vector<32x256xf32>
    %c16_i32_90 = arith.constant 16 : i32
    %156 = tpu.dynamic_rotate %147 by %c16_i32_90 dim 1 : vector<32x256xf32>, i32 -> vector<32x256xf32>
    %c1_91 = arith.constant 1 : index
    %c0_92 = arith.constant 0 : index
    %c0_93 = arith.constant 0 : index
    %157 = vector.load %arg12[%c1_91, %c0_92, %c0_93] : memref<9x32x256xf32, #tpu.memory_space<vmem>>, vector<1x32x256xf32>
    %158 = vector.shape_cast %157 : vector<1x32x256xf32> to vector<32x256xf32>
    %159 = arith.mulf %156, %158 : vector<32x256xf32>
    %160 = arith.addf %155, %159 : vector<32x256xf32>
    %c15_i32_94 = arith.constant 15 : i32
    %161 = tpu.dynamic_rotate %147 by %c15_i32_94 dim 1 : vector<32x256xf32>, i32 -> vector<32x256xf32>
    %c2_95 = arith.constant 2 : index
    %c0_96 = arith.constant 0 : index
    %c0_97 = arith.constant 0 : index
    %162 = vector.load %arg12[%c2_95, %c0_96, %c0_97] : memref<9x32x256xf32, #tpu.memory_space<vmem>>, vector<1x32x256xf32>
    %163 = vector.shape_cast %162 : vector<1x32x256xf32> to vector<32x256xf32>
    %164 = arith.mulf %161, %163 : vector<32x256xf32>
    %165 = arith.addf %160, %164 : vector<32x256xf32>
    %c1_i32_98 = arith.constant 1 : i32
    %166 = tpu.dynamic_rotate %147 by %c1_i32_98 dim 1 : vector<32x256xf32>, i32 -> vector<32x256xf32>
    %c3_99 = arith.constant 3 : index
    %c0_100 = arith.constant 0 : index
    %c0_101 = arith.constant 0 : index
    %167 = vector.load %arg12[%c3_99, %c0_100, %c0_101] : memref<9x32x256xf32, #tpu.memory_space<vmem>>, vector<1x32x256xf32>
    %168 = vector.shape_cast %167 : vector<1x32x256xf32> to vector<32x256xf32>
    %169 = arith.mulf %166, %168 : vector<32x256xf32>
    %170 = arith.addf %165, %169 : vector<32x256xf32>
    %c255_i32_102 = arith.constant 255 : i32
    %171 = tpu.dynamic_rotate %147 by %c255_i32_102 dim 1 : vector<32x256xf32>, i32 -> vector<32x256xf32>
    %c5_103 = arith.constant 5 : index
    %c0_104 = arith.constant 0 : index
    %c0_105 = arith.constant 0 : index
    %172 = vector.load %arg12[%c5_103, %c0_104, %c0_105] : memref<9x32x256xf32, #tpu.memory_space<vmem>>, vector<1x32x256xf32>
    %173 = vector.shape_cast %172 : vector<1x32x256xf32> to vector<32x256xf32>
    %174 = arith.mulf %171, %173 : vector<32x256xf32>
    %175 = arith.addf %170, %174 : vector<32x256xf32>
    %c241_i32_106 = arith.constant 241 : i32
    %176 = tpu.dynamic_rotate %147 by %c241_i32_106 dim 1 : vector<32x256xf32>, i32 -> vector<32x256xf32>
    %c6_107 = arith.constant 6 : index
    %c0_108 = arith.constant 0 : index
    %c0_109 = arith.constant 0 : index
    %177 = vector.load %arg12[%c6_107, %c0_108, %c0_109] : memref<9x32x256xf32, #tpu.memory_space<vmem>>, vector<1x32x256xf32>
    %178 = vector.shape_cast %177 : vector<1x32x256xf32> to vector<32x256xf32>
    %179 = arith.mulf %176, %178 : vector<32x256xf32>
    %180 = arith.addf %175, %179 : vector<32x256xf32>
    %c240_i32_110 = arith.constant 240 : i32
    %181 = tpu.dynamic_rotate %147 by %c240_i32_110 dim 1 : vector<32x256xf32>, i32 -> vector<32x256xf32>
    %c7_111 = arith.constant 7 : index
    %c0_112 = arith.constant 0 : index
    %c0_113 = arith.constant 0 : index
    %182 = vector.load %arg12[%c7_111, %c0_112, %c0_113] : memref<9x32x256xf32, #tpu.memory_space<vmem>>, vector<1x32x256xf32>
    %183 = vector.shape_cast %182 : vector<1x32x256xf32> to vector<32x256xf32>
    %184 = arith.mulf %181, %183 : vector<32x256xf32>
    %185 = arith.addf %180, %184 : vector<32x256xf32>
    %c239_i32_114 = arith.constant 239 : i32
    %186 = tpu.dynamic_rotate %147 by %c239_i32_114 dim 1 : vector<32x256xf32>, i32 -> vector<32x256xf32>
    %c8_115 = arith.constant 8 : index
    %c0_116 = arith.constant 0 : index
    %c0_117 = arith.constant 0 : index
    %187 = vector.load %arg12[%c8_115, %c0_116, %c0_117] : memref<9x32x256xf32, #tpu.memory_space<vmem>>, vector<1x32x256xf32>
    %188 = vector.shape_cast %187 : vector<1x32x256xf32> to vector<32x256xf32>
    %189 = arith.mulf %186, %188 : vector<32x256xf32>
    %190 = arith.addf %185, %189 : vector<32x256xf32>
    %c0_118 = arith.constant 0 : index
    %c0_119 = arith.constant 0 : index
    %191 = vector.load %arg13[%c0_118, %c0_119] : memref<32x1xf32, #tpu.memory_space<vmem>>, vector<32x1xf32>
    %192 = vector.broadcast %191 : vector<32x1xf32> to vector<32x256xf32>
    %193 = arith.addf %190, %192 : vector<32x256xf32>
    %cst_120 = arith.constant 0.000000e+00 : f32
    %194 = vector.broadcast %cst_120 : f32 to vector<32x256xf32>
    %195 = arith.subf %194, %193 : vector<32x256xf32>
    %196 = math.exp %195 : vector<32x256xf32>
    %cst_121 = arith.constant 1.000000e+00 : f32
    %197 = vector.broadcast %cst_121 : f32 to vector<32x256xf32>
    %198 = arith.addf %197, %196 : vector<32x256xf32>
    %199 = tpu.reciprocal %198 {approx = true} : vector<32x256xf32> -> vector<32x256xf32>
    %200 = arith.mulf %193, %199 : vector<32x256xf32>
    %201 = arith.addf %147, %200 : vector<32x256xf32>
    %c0_122 = arith.constant 0 : index
    %c0_123 = arith.constant 0 : index
    %202 = vector.load %arg14[%c0_122, %c0_123] : memref<32x32xbf16, #tpu.memory_space<vmem>>, vector<32x32xbf16>
    %203 = arith.truncf %201 : vector<32x256xf32> to vector<32x256xbf16>
    %cst_124 = arith.constant dense<0.000000e+00> : vector<32x256xf32>
    %204 = tpu.matmul %202, %203, %cst_124 {dimension_numbers = #tpu.dot_dimension_numbers<[1], [0], [0], [1], [0, 0, 1, 1], [], []>} : vector<32x32xbf16>, vector<32x256xbf16>, vector<32x256xf32> -> vector<32x256xf32>
    %cst_125 = arith.constant 0.000000e+00 : f32
    %205 = vector.broadcast %cst_125 : f32 to vector<32x256xf32>
    %206 = arith.subf %205, %204 : vector<32x256xf32>
    %207 = math.exp %206 : vector<32x256xf32>
    %cst_126 = arith.constant 1.000000e+00 : f32
    %208 = vector.broadcast %cst_126 : f32 to vector<32x256xf32>
    %209 = arith.addf %208, %207 : vector<32x256xf32>
    %210 = tpu.reciprocal %209 {approx = true} : vector<32x256xf32> -> vector<32x256xf32>
    %211 = arith.mulf %204, %210 : vector<32x256xf32>
    %cst_127 = arith.constant 0.000000e+00 : f32
    %212 = vector.broadcast %cst_127 : f32 to vector<32x256xf32>
    %213 = arith.subf %212, %211 : vector<32x256xf32>
    %214 = math.exp %213 : vector<32x256xf32>
    %cst_128 = arith.constant 1.000000e+00 : f32
    %215 = vector.broadcast %cst_128 : f32 to vector<32x256xf32>
    %216 = arith.addf %215, %214 : vector<32x256xf32>
    %cst_129 = arith.constant 1.000000e+00 : f32
    %217 = vector.broadcast %cst_129 : f32 to vector<32x256xf32>
    %218 = arith.divf %217, %216 : vector<32x256xf32>
    %c0_130 = arith.constant 0 : index
    %c0_131 = arith.constant 0 : index
    %219 = vector.load %arg1[%c0_130, %c0_131] : memref<32x256xf32, #tpu.memory_space<vmem>>, vector<32x256xf32>
    %cst_132 = arith.constant 1.000000e+00 : f32
    %220 = vector.broadcast %cst_132 : f32 to vector<32x256xf32>
    %221 = arith.addf %220, %218 : vector<32x256xf32>
    %222 = arith.mulf %219, %221 : vector<32x256xf32>
    %c0_133 = arith.constant 0 : index
    %c0_134 = arith.constant 0 : index
    %223 = vector.load %arg15[%c0_133, %c0_134] : memref<32x256xf32, #tpu.memory_space<vmem>>, vector<32x256xf32>
    tpu.vector_store %arg15[%c0_133, %c0_134], %222 {strides = array<i32>} : memref<32x256xf32, #tpu.memory_space<vmem>>, vector<32x256xf32>,
    return
  }
  func.func @transform_0(%arg0: i32) -> (i32, i32) {
    %c0_i32 = arith.constant 0 : i32
    %c0_i32_0 = arith.constant 0 : i32
    return %c0_i32, %arg0 : i32, i32
  }
  func.func @transform_1(%arg0: i32) -> (i32, i32) {
    %c0_i32 = arith.constant 0 : i32
    %c0_i32_0 = arith.constant 0 : i32
    %c0_i32_1 = arith.constant 0 : i32
    return %c0_i32, %c0_i32_0 : i32, i32
  }
  func.func @transform_2(%arg0: i32) -> (i32, i32) {
    %c0_i32 = arith.constant 0 : i32
    %c0_i32_0 = arith.constant 0 : i32
    %c0_i32_1 = arith.constant 0 : i32
    return %c0_i32, %c0_i32_0 : i32, i32
  }
  func.func @transform_3(%arg0: i32) -> (i32, i32, i32) {
    %c0_i32 = arith.constant 0 : i32
    %c0_i32_0 = arith.constant 0 : i32
    %c0_i32_1 = arith.constant 0 : i32
    %c0_i32_2 = arith.constant 0 : i32
    return %c0_i32, %c0_i32_0, %c0_i32_1 : i32, i32, i32
  }
  func.func @transform_4(%arg0: i32) -> (i32, i32) {
    %c0_i32 = arith.constant 0 : i32
    %c0_i32_0 = arith.constant 0 : i32
    %c0_i32_1 = arith.constant 0 : i32
    return %c0_i32, %c0_i32_0 : i32, i32
  }
  func.func @transform_5(%arg0: i32) -> (i32, i32) {
    %c0_i32 = arith.constant 0 : i32
    %c0_i32_0 = arith.constant 0 : i32
    %c0_i32_1 = arith.constant 0 : i32
    return %c0_i32, %c0_i32_0 : i32, i32
  }
  func.func @transform_6(%arg0: i32) -> (i32, i32) {
    %c0_i32 = arith.constant 0 : i32
    %c0_i32_0 = arith.constant 0 : i32
    %c0_i32_1 = arith.constant 0 : i32
    return %c0_i32, %c0_i32_0 : i32, i32
  }
  func.func @transform_7(%arg0: i32) -> (i32, i32, i32) {
    %c0_i32 = arith.constant 0 : i32
    %c0_i32_0 = arith.constant 0 : i32
    %c0_i32_1 = arith.constant 0 : i32
    %c0_i32_2 = arith.constant 0 : i32
    return %c0_i32, %c0_i32_0, %c0_i32_1 : i32, i32, i32
  }
  func.func @transform_8(%arg0: i32) -> (i32, i32) {
    %c0_i32 = arith.constant 0 : i32
    %c0_i32_0 = arith.constant 0 : i32
    %c0_i32_1 = arith.constant 0 : i32
    return %c0_i32, %c0_i32_0 : i32, i32
  }
  func.func @transform_9(%arg0: i32) -> (i32, i32) {
    %c0_i32 = arith.constant 0 : i32
    %c0_i32_0 = arith.constant 0 : i32
    %c0_i32_1 = arith.constant 0 : i32
    return %c0_i32, %c0_i32_0 : i32, i32
  }
  func.func @transform_10(%arg0: i32) -> (i32, i32) {
    %c0_i32 = arith.constant 0 : i32
    %c0_i32_0 = arith.constant 0 : i32
    %c0_i32_1 = arith.constant 0 : i32
    return %c0_i32, %c0_i32_0 : i32, i32
  }
  func.func @transform_11(%arg0: i32) -> (i32, i32, i32) {
    %c0_i32 = arith.constant 0 : i32
    %c0_i32_0 = arith.constant 0 : i32
    %c0_i32_1 = arith.constant 0 : i32
    %c0_i32_2 = arith.constant 0 : i32
    return %c0_i32, %c0_i32_0, %c0_i32_1 : i32, i32, i32
  }
  func.func @transform_12(%arg0: i32) -> (i32, i32) {
    %c0_i32 = arith.constant 0 : i32
    %c0_i32_0 = arith.constant 0 : i32
    %c0_i32_1 = arith.constant 0 : i32
    return %c0_i32, %c0_i32_0 : i32, i32
  }
  func.func @transform_13(%arg0: i32) -> (i32, i32) {
    %c0_i32 = arith.constant 0 : i32
    %c0_i32_0 = arith.constant 0 : i32
    %c0_i32_1 = arith.constant 0 : i32
    return %c0_i32, %c0_i32_0 : i32, i32
  }
  func.func @transform_14(%arg0: i32) -> (i32, i32) {
    %c0_i32 = arith.constant 0 : i32
    %c0_i32_0 = arith.constant 0 : i32
    return %c0_i32, %arg0 : i32, i32
  }
}

</mosaic_0001>

<bundles_post_ra>
// kernel: tpu_custom_call.1
= control target key start
LH: loop header
LB: loop body
LE: loop exit
PB: predicated region body
PF: predicated region fallthrough
CT: control target
= control target key end

     0   :  { %s5226_s0 = inlined_call_operand.hbm [shape: f32[32,512], index: 0, kind: input, shape index: {}]   ;;  %s5227_s1 = inlined_call_operand.vmem [shape: bf16[32,32], index: 1, kind: input, shape index: {}]   ;;  %s5228_s2 = inlined_call_operand.vmem [shape: f32[32,1], index: 2, kind: input, shape index: {}]   ;;  %s5229_s3 = inlined_call_operand.hbm [shape: f32[9,32,256], index: 3, kind: input, shape index: {}]   ;;  %s5230_s4 = inlined_call_operand.vmem [shape: f32[32,1], index: 4, kind: input, shape index: {}]   ;;  %s5231_s5 = inlined_call_operand.vmem [shape: bf16[32,32], index: 5, kind: input, shape index: {}]   ;;  %s5232_s6 = inlined_call_operand.vmem [shape: f32[32,1], index: 6, kind: input, shape index: {}]   ;;  %s5233_s7 = inlined_call_operand.hbm [shape: f32[9,32,256], index: 7, kind: input, shape index: {}]   ;;  %s5234_s8 = inlined_call_operand.vmem [shape: f32[32,1], index: 8, kind: input, shape index: {}]   ;;  %s5235_s9 = inlined_call_operand.vmem [shape: bf16[32,32], index: 9, kind: input, shape index: {}]   ;;  %s5236_s10 = inlined_call_operand.vmem [shape: f32[32,1], index: 10, kind: input, shape index: {}]   ;;  %s5237_s11 = inlined_call_operand.hbm [shape: f32[9,32,256], index: 11, kind: input, shape index: {}]   ;;  %s5238_s12 = inlined_call_operand.vmem [shape: f32[32,1], index: 12, kind: input, shape index: {}]   ;;  %s5239_s13 = inlined_call_operand.vmem [shape: bf16[32,32], index: 13, kind: input, shape index: {}]   ;;  %s5240_s14 = inlined_call_operand.hbm [shape: f32[32,512], index: 14, kind: output, shape index: {}]  }
   0x1   :  { %5267 = sst [smem:[#allocation36_spill]] %s5229_s3 }
   0x2   :  { %5268 = sst [smem:[#allocation37_spill]] %s5233_s7 }
   0x3   :  { %5269 = sst [smem:[#allocation38_spill]] %s5237_s11 }
   0x4   :  { %19 = vsyncpa [#allocation3], 0 }
   0x5   :  { %21 = vsyncpa [#allocation3 + $0x1], 0 }
   0x6   :  { %22 = vsyncpa [#allocation6], 0 }
   0x7   :  { %23 = vsyncpa [#allocation9], 0 }
   0x8   :  { %24 = vsyncpa [#allocation4], 0 }
   0x9   :  { %26 = vsyncpa [#allocation4 + $0x1], 0  ;;  %s3578_s29 = smov 0   ;;  %s3580_s30 = smov 0  }
   0xa   :  { %s3582_s15 = smov 0   ;;  %s3584_s16 = smov 0  }
   0xb LB: > { %5270 = sst [smem:[#allocation15_spill]] %s3472_s29  ;;  %s3599_s17 = sadd.s32 4294967295, %s3484_s16   ;;  %s3484_s16 = sphi %s3584_s16, %s5325_s16   ;;  %s3480_s15 = sphi %s3582_s15, %s5327_s15   ;;  %s3476_s30 = sphi %s3580_s30, %s5329_s30   ;;  %s3472_s29 = sphi %s3578_s29, %s5328_s29  }
   0xc   : > { %5271 = sst [smem:[#allocation16_spill]] %s3480_s15  ;;  %s2854_s18 = sadd.s32 4294967294, %s3484_s16  }
   0xd   : > { %5272 = sst [smem:[#allocation17_spill]] %s3484_s16  ;;  %p52_p0 = scmp.ne.s32.totalorder %s3476_s30, %s3472_s29 }
   0xe   : > { %p53_p1 = scmp.eq.s32.totalorder %s3599_s17, 0  ;;  %p349_p2 = scmp.eq.s32.totalorder %s3599_s17, 1 }
   0xf   : > { %p355_p3 = scmp.eq.s32.totalorder %s2854_s18, 1  ;;  %p2855_p5 = scmp.ge.s32.totalorder %s3484_s16, 1 }
  0x10   : > { %p3608_p4 = por %p53_p1, %p52_p0  ;;  %p362_p7 = scmp.lt.s32.totalorder %s3484_s16, 3 }
  0x11   : > { %p3613_p6 = por %p355_p3, %p52_p0  ;;  %s5276_s3 = sld [smem:[#allocation36_spill]] }
  0x12   : > { %p3621_p8 = pnand %p2855_p5, %p362_p7  ;;  %s3486_s25 = smov [#allocation5]  }
  0x13   : > { %s5274_s20 = scalar_select %p3613_p6, 1, 0 }
  0x14   : > { %p2948_p9 = pneg %p3621_p8  ;;  %s381_s26 = sshll.u32 %s3486_s25, 4  ;;  %s382_s26 = int_to_ptr.vmem [resolvable:$true] %s381_s26 }
  0x15   : > { %5275 = sst [smem:[#allocation18_spill]] %s5274_s20  ;;  %s5243_s22 = smov 256  }
  0x16   : > { %p3629_p10 = pnand %p2948_p9, %p53_p1  ;;  %s5279_s7 = sld [smem:[#allocation37_spill]] }
  0x17   : > { %s379_s23 = sshll.u32 %s5276_s3, 4  ;;  %s5244_s25 = smov 16   ;;  %s380_s23 = int_to_ptr.hbm [resolvable:$true] %s379_s23 }
  0x18   : > { %2951 = dma.hbm_to_vmem [thread:$0]  (!%p3629_p10), %s380_s23, 9216, %s382_s26, [#allocation6], %s5243_s22, %s5243_s22, %s5244_s25  }
  0x19   : > { %s3489_s3 = smov [#allocation7]   ;;  %s5280_s11 = sld [smem:[#allocation38_spill]] }
  0x1a   : > { %s404_s20 = sshll.u32 %s3489_s3, 4  ;;  %s3490_s23 = smov [#allocation8]   ;;  %s405_s20 = int_to_ptr.vmem [resolvable:$true] %s404_s20 }
  0x1b   : > { %s427_s26 = sshll.u32 %s3490_s23, 4  ;;  %s39_s29 = sadd.s32 1, %s3480_s15  ;;  %s428_s26 = int_to_ptr.vmem [resolvable:$true] %s427_s26 }
  0x1c   : > { %s402_s21 = sshll.u32 %s5279_s7, 4  ;;  %s3651_s7 = sadd.s32 1, %s3484_s16   ;;  %s403_s21 = int_to_ptr.hbm [resolvable:$true] %s402_s21 }
  0x1d   : > { %2954 = dma.hbm_to_vmem [thread:$0]  (!%p3629_p10), %s403_s21, 9216, %s405_s20, [#allocation6], %s5243_s22, %s5243_s22, %s5244_s25  }
  0x1e   : > { %5281 = sst [smem:[#allocation19_spill]] %s3651_s7  ;;  %s36_s3 = ssub.s32 %s3484_s16, %s3651_s7 }
  0x1f   : > { %s425_s18 = sshll.u32 %s5280_s11, 4  ;;  %p37_p12 = scmp.eq.s32.totalorder %s36_s3, 0  ;;  %s426_s18 = int_to_ptr.hbm [resolvable:$true] %s425_s18 }
  0x20   : > { %2957 = dma.hbm_to_vmem [thread:$0]  (!%p3629_p10), %s426_s18, 9216, %s428_s26, [#allocation9], %s5243_s22, %s5243_s22, %s5244_s25  }
  0x21   : > { %p46_p13 = scmp.ne.s32.totalorder %s3480_s15, %s3476_s30  ;;  %p47_p0 = scmp.eq.s32.totalorder %s3484_s16, 0 }
  0x22   : > { %p2969_p3 = scmp.lt.s32.totalorder %s3484_s16, 2  ;;  %s447_s27 = sand.u32 1, %s3480_s15  }
  0x23   : > { %s3666_s20 = scalar_select %p37_p12, %s3480_s15, %s39_s29  }
  0x24   : > { %p48_p5 = por %p47_p0, %p46_p13  ;;  %p3670_p7 = por %p349_p2, %p46_p13 }
  0x25   : > { %5282 = sst [smem:[#allocation20_spill]] %s3666_s20  ;;  %s2922_s28 = sshll.u32 %s3484_s16, 4 }
  0x26   : > { %s2860_s23 = sshll.u32 %s447_s27, 6  ;;  %s456_s26 = scalar_lea.hbm %s5226_s0, %s2922_s28 }
  0x27   : > { %s457_s3 = sshll.u32 %s456_s26, 4  ;;  %s451_s22 = scalar_lea.vmem [#allocation2], %s2860_s23  ;;  %s458_s3 = int_to_ptr.hbm [resolvable:$true] %s457_s3 }
  0x28   : > { %s459_s25 = sshll.u32 %s451_s22, 4  ;;  %p3681_p9 = pnand %p2969_p3, %p48_p5  ;;  %s460_s25 = int_to_ptr.vmem [resolvable:$true] %s459_s25 }
  0x29   : > { %s448_s20 = scalar_lea.sflag [#allocation3], %s447_s27  ;;  %s3380_s7 = sshra.s32 %s458_s3, 4  ;;  %s3381_s7 = int_to_ptr.hbm [resolvable:$true] %s3380_s7 }
  0x2a   : > { %s3382_s15 = scalar_lea.hbm %s3381_s7, 64  ;;  %p3384_p10 = pneg %p3681_p9 }
  0x2b   : > { %p3383_p2 = scmp.ne.s32.totalorder %s3381_s7, %s3382_s15  ;;  %s3387_s22 = scalar_lea.hbm %s5226_s0, 128 }
  0x2c   : > { %p3388_p0 = scmp.lt.s32.totalorder %s3381_s7, %s5226_s0  ;;  %p3389_p3 = scmp.lt.s32.totalorder %s3387_s22, %s3382_s15 }
  0x2d   : > { %p3385_p12 = pnand %p3384_p10, %p3383_p2 }
  0x2e   : > { %p3390_p5 = por %p3389_p3, %p3388_p0 }
  0x2f   : > { %p3386_p13 = pneg %p3385_p12 }
  0x31   : > { %p3391_p11 = pnand %p3390_p5, %p3386_p13 }
  0x33   : > { %3394 = shalt.err (!%p3391_p11)
}
  0x34   : > { %s3491_s27 = smov 512   ;;  %s5285_s26 = smov 16  }
  0x35   : > { %s5286_s16 = smov 256   ;;  %471 = sbr.rel (%p3621_p8) target bundleno = 1724 (0x6bc), region = 76 }
  0x36   : > { %2961 = dma.hbm_to_vmem [thread:$0]  (!%p3681_p9), %s458_s3, 1024, %s460_s25, %s448_s20, %s3491_s27, %s5286_s16, %s5285_s26  }
  0x3a   : > { %s3700_s11 = sand.u32 1, %s3476_s30  }
  0x3b   : > { %s5249_s7 = sshll.u32 %s3700_s11, 6  ;;  %s474_s15 = scalar_lea.sflag [#allocation3], %s3700_s11 }
  0x3c   : > { %s3706_s28 = scalar_lea.vmem [#allocation2], %s5249_s7 }
  0x3d   : > { %3455 = dma.done.wait (%p3608_p4), %s474_s15, 1024  }
  0x3e   : > { %3457 = vsyncadd (%p3608_p4), %s474_s15, 4294966272 }
  0x3f   : > { %3459 = dma.done.wait (%p53_p1), [#allocation6], 18432  }
  0x40   : > { %3461 = vsyncadd (%p53_p1), [#allocation6], 4294948864 }
  0x41   : > { %3463 = dma.done.wait (%p53_p1), [#allocation9], 9216  }
  0x42   : > { %3465 = vsyncadd (%p53_p1), [#allocation9], 4294958080  ;;  %v3492_v0 = vmov 0   ;;  %v545_v1 = vld [vmem:[%s3706_s28 + $0x20] sm:$0xff]  ;;  %v547_v2 = vld [vmem:[%s3706_s28 + $0x30] sm:$0xff]  ;;  %vm591_vm0 = vcmask 261120  }
  0x43   : > { %3024 = vset.pattern.permute.xlu1 %v3492_v0  ;;  %3023 = vset.pattern.permute.xlu0 %v3492_v0  ;;  %v546_v3 = vld [vmem:[%s3706_s28 + $0x28] sm:$0xff]  ;;  %v555_v4 = vpack.c.bf16 %v547_v2, %v545_v1  ;;  %v548_v5 = vld [vmem:[%s3706_s28 + $0x38] sm:$0xff]  ;;  %v541_v6 = vld [vmem:[%s3706_s28] sm:$0xff]  ;;  %s3493_s15 = smov 17   ;;  %s3494_s16 = smov 16  }
  0x44   : > { %3025 = vset.pattern.permute.xlu2 %v3492_v0  ;;  %v543_v7 = vld [vmem:[%s3706_s28 + $0x10] sm:$0xff]  ;;  %v556_v8 = vpack.c.bf16 %v548_v5, %v546_v3  ;;  %v542_v9 = vld [vmem:[%s3706_s28 + $0x8] sm:$0xff]  ;;  %v544_v10 = vld [vmem:[%s3706_s28 + $0x18] sm:$0xff]  ;;  %s3495_s19 = smov 15   ;;  %s3496_s24 = smov 1  }
  0x45   : > { %604 = vmatpush.bf16.msra.mxu0 %v555_v4  ;;  %v553_v11 = vpack.c.bf16 %v543_v7, %v541_v6  ;;  %v557_v12 = vld [vmem:[%s5228_s2] sm:$0xff]  ;;  %v554_v13 = vpack.c.bf16 %v544_v10, %v542_v9  ;;  %v559_v14 = vld [vmem:[%s5228_s2 + $0x10] sm:$0xff]  ;;  %v558_v16 = vld [vmem:[%s5228_s2 + $0x8] sm:$0xff]  ;;  %s3497_s25 = smov 127   ;;  %s3498_s20 = smov 113  }
  0x46   : > { %623 = vmatpush.bf16.msra.mxu1 %v556_v8  ;;  %563 = vperm.xlu1 %3024, %v557_v12   ;;  %v2923_v15 = vld [vmem:[%s5227_s1] sm:$0xff]  ;;  %v560_v17 = vld [vmem:[%s5228_s2 + $0x18] sm:$0xff]  ;;  %v2924_v18 = vld [vmem:[%s5227_s1 + $0x8] sm:$0xff]  ;;  %s3499_s3 = smov 112   ;;  %s5250_s29 = smov 111  }
  0x47   : > { %573 = vperm.xlu0 %3023, %v559_v14   ;;  %s5317_s22 = smov 111   ;;  %s5320_s18 = sshll.u32 %s3700_s11, 6 }
  0x48   : > { %s3430_s23 = scalar_lea.hbm %s5240_s14, 128 }
  0x49   : > { %605 = vmatpush.bf16.msra.mxu0 %v553_v11 }
  0x4a   : > { %624 = vmatpush.bf16.msra.mxu1 %v554_v13 }
  0x4c   : > { %2877 = vmatmul.msk.bf16.vlgmr.msra.gmra.mxu0 %vm591_vm0, %v2923_v15 }
  0x4d   : > { %2879 = vmatmul.msk.bf16.vlgmr.msra.gmra.mxu1 %vm591_vm0, %v2923_v15 }
  0x4e   : > { %568 = vperm.xlu1 %3024, %v558_v16  }
  0x4f   : > { %578 = vperm.xlu0 %3023, %v560_v17  }
  0x5c   : > { %2878 = vmatmul.msk.bf16.gmra.mxu0 %vm591_vm0, %v2924_v18 }
  0x5d   : > { %2880 = vmatmul.msk.bf16.gmra.mxu1 %vm591_vm0, %v2924_v18 }
  0xb8   : > { %v564_v19 = vpop.permute.xlu1 %563 }
  0xb9   : > { %v574_v53 = vpop.permute.xlu0 %573 }
  0xc0   : > { %v569_v38 = vpop.permute.xlu1 %568 }
  0xc1   : > { %v579_v6 = vpop.permute.xlu0 %578 }
  0xc9   : > { %v607_v20 = vpop.f32.mrf.mxu0 }
  0xca   : > { %v608_v21 = vadd.f32 %v607_v20, %v564_v19  ;;  %v626_v22 = vpop.f32.mrf.mxu1 }
  0xcb   : > { %v627_v23 = vadd.f32 %v626_v22, %v564_v19 }
  0xcc   : > { %v636_v24 = vsub.f32 0.0, %v608_v21 }
  0xcd   : > { %v637_v25 = vsub.f32 0.0, %v627_v23 }
  0xce   : > { %v644_v26 = vmul.f32 1.442695, %v636_v24 }
  0xcf   : > { %v646_v27 = vmul.f32 1.442695, %v637_v25 }
  0xd0   : > { %3026 = vpow2.f32 %v644_v26 }
  0xd1   : > { %3028 = vpow2.f32 %v646_v27  ;;  %v609_v36 = vpop.f32.mrf.mxu0 }
  0xd2   : > { %v628_v37 = vpop.f32.mrf.mxu1  ;;  %v610_v39 = vadd.f32 %v609_v36, %v569_v38 }
  0xd3   : > { %v629_v40 = vadd.f32 %v628_v37, %v569_v38 }
  0xd4   : > { %v638_v41 = vsub.f32 0.0, %v610_v39 }
  0xd5   : > { %v639_v42 = vsub.f32 0.0, %v629_v40 }
  0xd6   : > { %v3027_v28 = vpop.eup %3026  ;;  %v648_v43 = vmul.f32 1.442695, %v638_v41 }
  0xd7   : > { %v3029_v29 = vpop.eup %3028  ;;  %v660_v30 = vadd.f32 1.0, %v3027_v28  ;;  %v650_v44 = vmul.f32 1.442695, %v639_v42 }
  0xd8   : > { %v661_v31 = vadd.f32 1.0, %v3029_v29 }
  0xd9   : > { %3030 = vrcp.f32 %v660_v30  ;;  %v612_v54 = vpop.f32.mrf.mxu0 }
  0xda   : > { %3032 = vrcp.f32 %v661_v31  ;;  %v613_v55 = vadd.f32 %v612_v54, %v574_v53  ;;  %v631_v56 = vpop.f32.mrf.mxu1 }
  0xdb   : > { %3034 = vpow2.f32 %v648_v43  ;;  %v632_v57 = vadd.f32 %v631_v56, %v574_v53  ;;  %v1200_v56 = vld [vmem:[%s5232_s6 + $0x10] sm:$0xff] }
  0xdc   : > { %3036 = vpow2.f32 %v650_v44  ;;  %v640_v58 = vsub.f32 0.0, %v613_v55 }
  0xdd   : > { %v641_v59 = vsub.f32 0.0, %v632_v57 }
  0xde   : > { %v652_v60 = vmul.f32 1.442695, %v640_v58  ;;  %v1104_v58 = vld [vmem:[%s5230_s4 + $0x10] sm:$0xff] }
  0xdf   : > { %v3031_v32 = vpop.eup %3030  ;;  %v654_v61 = vmul.f32 1.442695, %v641_v59 }
  0xe0   : > { %v3033_v33 = vpop.eup %3032  ;;  %v3750_v34 = vmul.f32 %v3031_v32, %v608_v21 }
  0xe1   : > { %v3752_v35 = vmul.f32 %v3033_v33, %v627_v23  ;;  %v3035_v45 = vpop.eup %3034  ;;  %v614_v9 = vpop.f32.mrf.mxu0 }
  0xe2   : > { %5287 = vst [vmem:[#allocation21_spill] sm:$0xff] %v3750_v34  ;;  %701 = vrot.lane.b32.xlu0 %v3750_v34, %s3493_s15  ;;  %v3037_v46 = vpop.eup %3036  ;;  %v662_v47 = vadd.f32 1.0, %v3035_v45  ;;  %v633_v7 = vpop.f32.mrf.mxu1  ;;  %v615_v12 = vadd.f32 %v614_v9, %v579_v6 }
  0xe3   : > { %5288 = vst [vmem:[#allocation22_spill] sm:$0xff] %v3752_v35  ;;  %760 = vrot.lane.b32.xlu1 %v3752_v35, %s3494_s16  ;;  %709 = vrot.lane.b32.xlu2 %v3752_v35, %s3493_s15  ;;  %v663_v48 = vadd.f32 1.0, %v3037_v46  ;;  %v634_v8 = vadd.f32 %v633_v7, %v579_v6 }
  0xe4   : > { %3038 = vrcp.f32 %v662_v47  ;;  %v642_v14 = vsub.f32 0.0, %v615_v12 }
  0xe5   : > { %3040 = vrcp.f32 %v663_v48  ;;  %v643_v10 = vsub.f32 0.0, %v634_v8 }
  0xe6   : > { %3042 = vpow2.f32 %v652_v60  ;;  %v656_v16 = vmul.f32 1.442695, %v642_v14 }
  0xe7   : > { %3044 = vpow2.f32 %v654_v61  ;;  %v658_v13 = vmul.f32 1.442695, %v643_v10 }
  0xea   : > { %810 = vrot.lane.b32.xlu0 %v3752_v35, %s3495_s19  ;;  %v3039_v49 = vpop.eup %3038 }
  0xeb   : > { %802 = vrot.lane.b32.xlu1 %v3750_v34, %s3495_s19  ;;  %752 = vrot.lane.b32.xlu2 %v3750_v34, %s3494_s16  ;;  %v3041_v50 = vpop.eup %3040  ;;  %v3784_v51 = vmul.f32 %v3039_v49, %v610_v39  ;;  %v1105_v49 = vld [vmem:[%s5230_s4 + $0x18] sm:$0xff] }
  0xec   : > { %v3786_v52 = vmul.f32 %v3041_v50, %v629_v40  ;;  %v3043_v62 = vpop.eup %3042  ;;  %v1102_v50 = vld [vmem:[%s5230_s4] sm:$0xff] }
  0xed   : > { %5289 = vst [vmem:[#allocation23_spill] sm:$0xff] %v3784_v51  ;;  %v3045_v63 = vpop.eup %3044  ;;  %v664_v0 = vadd.f32 1.0, %v3043_v62  ;;  %v1199_v62 = vld [vmem:[%s5232_s6 + $0x8] sm:$0xff] }
  0xee   : > { %5290 = vst [vmem:[#allocation24_spill] sm:$0xff] %v3786_v52  ;;  %v665_v1 = vadd.f32 1.0, %v3045_v63  ;;  %v1103_v63 = vld [vmem:[%s5230_s4 + $0x8] sm:$0xff] }
  0xef   : > { %3046 = vrcp.f32 %v664_v0 }
  0xf0   : > { %3048 = vrcp.f32 %v665_v1 }
  0xf1   : > { %3050 = vpow2.f32 %v658_v13  ;;  %v717_v13 = vlaneseq }
  0xf2   : > { %852 = vrot.lane.b32.xlu0 %v3750_v34, %s3496_s24  ;;  %3052 = vpow2.f32 %v656_v16 }
  0xf3   : > { %910 = vrot.lane.b32.xlu1 %v3752_v35, %s3497_s25  ;;  %860 = vrot.lane.b32.xlu2 %v3752_v35, %s3496_s24 }
  0xf5   : > { %v3047_v2 = vpop.eup %3046 }
  0xf6   : > { %v3049_v3 = vpop.eup %3048  ;;  %v3818_v4 = vmul.f32 %v3047_v2, %v613_v55 }
  0xf7   : > { %v3820_v5 = vmul.f32 %v3049_v3, %v632_v57  ;;  %v3051_v17 = vpop.eup %3050  ;;  %v1201_v57 = vld [vmem:[%s5232_s6 + $0x18] sm:$0xff]  ;;  %v1198_v3 = vld [vmem:[%s5232_s6] sm:$0xff] }
  0xf8   : > { %v667_v18 = vadd.f32 1.0, %v3051_v17  ;;  %v3053_v20 = vpop.eup %3052 }
  0xf9   : > { %v666_v21 = vadd.f32 1.0, %v3053_v20 }
  0xfa   : > { %960 = vrot.lane.b32.xlu0 %v3752_v35, %s3498_s20  ;;  %3054 = vrcp.f32 %v667_v18  ;;  %v4002_v18 = vand.u32 127, %v717_v13 }
  0xfb   : > { %952 = vrot.lane.b32.xlu1 %v3750_v34, %s3498_s20  ;;  %902 = vrot.lane.b32.xlu2 %v3750_v34, %s3497_s25  ;;  %3056 = vrcp.f32 %v666_v21 }
  0xfc   : > { %vm719_vm1 = vcmp.lt.s32.totalorder %v4002_v18, 17  ;;  %vm768_vm2 = vcmp.lt.s32.totalorder %v4002_v18, 16  ;;  %vm818_vm3 = vcmp.lt.s32.totalorder %v4002_v18, 15  ;;  %vm868_vm4 = vcmp.lt.s32.totalorder %v4002_v18, 1 }
  0xfd   : > { %vm918_vm5 = vcmp.lt.s32.totalorder %v4002_v18, 127  ;;  %vm968_vm6 = vcmp.lt.s32.totalorder %v4002_v18, 113  ;;  %vm1018_vm7 = vcmp.lt.s32.totalorder %v4002_v18, 112  ;;  %vm1068_vm8 = vcmp.lt.s32.totalorder %v4002_v18, 111 }
 0x100   : > { %v3055_v25 = vpop.eup %3054 }
 0x101   : > { %v3864_v26 = vmul.f32 %v3055_v25, %v634_v8  ;;  %v3057_v28 = vpop.eup %3056 }
 0x102   : > { %1002 = vrot.lane.b32.xlu0 %v3750_v34, %s3499_s3  ;;  %v3878_v31 = vmul.f32 %v3057_v28, %v615_v12  ;;  %v728_v28 = vld [vmem:[#allocation5] sm:$0xff] }
 0x103   : > { %1052 = vrot.lane.b32.xlu1 %v3750_v34, %s5250_s29  ;;  %1010 = vrot.lane.b32.xlu2 %v3752_v35, %s3499_s3 }
 0x10a   : > { %1060 = vrot.lane.b32.xlu0 %v3752_v35, %s5250_s29 }
 0x10b   : > { %703 = vrot.lane.b32.xlu1 %v3784_v51, %s3493_s15  ;;  %762 = vrot.lane.b32.xlu2 %v3786_v52, %s3494_s16 }
 0x112   : > { %711 = vrot.lane.b32.xlu0 %v3786_v52, %s3493_s15 }
 0x113   : > { %812 = vrot.lane.b32.xlu1 %v3786_v52, %s3495_s19  ;;  %804 = vrot.lane.b32.xlu2 %v3784_v51, %s3495_s19 }
 0x11a   : > { %754 = vrot.lane.b32.xlu0 %v3784_v51, %s3494_s16 }
 0x11b   : > { %854 = vrot.lane.b32.xlu1 %v3784_v51, %s3496_s24  ;;  %912 = vrot.lane.b32.xlu2 %v3786_v52, %s3497_s25 }
 0x122   : > { %862 = vrot.lane.b32.xlu0 %v3786_v52, %s3496_s24 }
 0x123   : > { %962 = vrot.lane.b32.xlu1 %v3786_v52, %s3498_s20  ;;  %954 = vrot.lane.b32.xlu2 %v3784_v51, %s3498_s20 }
 0x12a   : > { %904 = vrot.lane.b32.xlu0 %v3784_v51, %s3497_s25 }
 0x12b   : > { %1004 = vrot.lane.b32.xlu1 %v3784_v51, %s3499_s3  ;;  %1054 = vrot.lane.b32.xlu2 %v3784_v51, %s5250_s29 }
 0x132   : > { %1012 = vrot.lane.b32.xlu0 %v3786_v52, %s3499_s3 }
 0x133   : > { %764 = vrot.lane.b32.xlu1 %v3820_v5, %s3494_s16  ;;  %705 = vrot.lane.b32.xlu2 %v3818_v4, %s3493_s15 }
 0x13a   : > { %713 = vrot.lane.b32.xlu0 %v3820_v5, %s3493_s15 }
 0x13b   : > { %806 = vrot.lane.b32.xlu1 %v3818_v4, %s3495_s19  ;;  %756 = vrot.lane.b32.xlu2 %v3818_v4, %s3494_s16 }
 0x13d   : > { %v3834_v11 = vpop.permute.xlu2 %709 }
 0x142   : > { %814 = vrot.lane.b32.xlu0 %v3820_v5, %s3495_s19 }
 0x143   : > { %914 = vrot.lane.b32.xlu1 %v3820_v5, %s3497_s25  ;;  %864 = vrot.lane.b32.xlu2 %v3820_v5, %s3496_s24 }
 0x145   : > { %v3842_v15 = vpop.permute.xlu2 %752 }
 0x14a   : > { %856 = vrot.lane.b32.xlu0 %v3818_v4, %s3496_s24 }
 0x14b   : > { %956 = vrot.lane.b32.xlu1 %v3818_v4, %s3498_s20  ;;  %906 = vrot.lane.b32.xlu2 %v3818_v4, %s3497_s25 }
 0x14d   : > { %v3850_v19 = vpop.permute.xlu2 %860 }
 0x152   : > { %964 = vrot.lane.b32.xlu0 %v3820_v5, %s3498_s20 }
 0x153   : > { %1064 = vrot.lane.b32.xlu1 %v3820_v5, %s5250_s29  ;;  %1014 = vrot.lane.b32.xlu2 %v3820_v5, %s3499_s3 }
 0x154   : > { %v3858_v22 = vpop.permute.xlu0 %701 }
 0x155   : > { %v3860_v23 = vpop.permute.xlu1 %760  ;;  %v3862_v24 = vpop.permute.xlu2 %902 }
 0x15a   : > { %1006 = vrot.lane.b32.xlu0 %v3818_v4, %s3499_s3 }
 0x15b   : > { %715 = vrot.lane.b32.xlu1 %v3864_v26, %s3493_s15  ;;  %1056 = vrot.lane.b32.xlu2 %v3818_v4, %s5250_s29 }
 0x15c   : > { %v3872_v27 = vpop.permute.xlu0 %810 }
 0x15d   : > { %v3874_v29 = vpop.permute.xlu1 %802  ;;  %v3876_v30 = vpop.permute.xlu2 %1010 }
 0x162   : > { %758 = vrot.lane.b32.xlu0 %v3878_v31, %s3494_s16 }
 0x163   : > { %816 = vrot.lane.b32.xlu1 %v3864_v26, %s3495_s19  ;;  %707 = vrot.lane.b32.xlu2 %v3878_v31, %s3493_s15 }
 0x164   : > { %v3886_v32 = vpop.permute.xlu0 %852 }
 0x165   : > { %v3888_v33 = vpop.permute.xlu1 %910  ;;  %v3890_v36 = vpop.permute.xlu2 %762 }
 0x16a   : > { %866 = vrot.lane.b32.xlu0 %v3864_v26, %s3496_s24 }
 0x16b   : > { %858 = vrot.lane.b32.xlu1 %v3878_v31, %s3496_s24  ;;  %766 = vrot.lane.b32.xlu2 %v3864_v26, %s3494_s16 }
 0x16c   : > { %v3898_v37 = vpop.permute.xlu0 %960 }
 0x16d   : > { %v3900_v38 = vpop.permute.xlu1 %952  ;;  %v3902_v39 = vpop.permute.xlu2 %804 }
 0x172   : > { %908 = vrot.lane.b32.xlu0 %v3878_v31, %s3497_s25 }
 0x173   : > { %966 = vrot.lane.b32.xlu1 %v3864_v26, %s3498_s20  ;;  %808 = vrot.lane.b32.xlu2 %v3878_v31, %s3495_s19 }
 0x174   : > { %v3910_v40 = vpop.permute.xlu0 %1002 }
 0x175   : > { %v3912_v41 = vpop.permute.xlu1 %1052  ;;  %v3914_v42 = vpop.permute.xlu2 %912 }
 0x176   : > { %5291 = vst [vmem:[#allocation25_spill] sm:$0xff] %v3914_v42 }
 0x17a   : > { %1016 = vrot.lane.b32.xlu0 %v3864_v26, %s3499_s3 }
 0x17b   : > { %1008 = vrot.lane.b32.xlu1 %v3878_v31, %s3499_s3  ;;  %916 = vrot.lane.b32.xlu2 %v3864_v26, %s3497_s25 }
 0x17c   : > { %v3922_v43 = vpop.permute.xlu0 %1060 }
 0x17d   : > { %v3924_v44 = vpop.permute.xlu1 %703  ;;  %v3926_v45 = vpop.permute.xlu2 %954 }
 0x182   : > { %1058 = vrot.lane.b32.xlu0 %v3878_v31, %s5250_s29 }
 0x183   : > { %1062 = vrot.lane.b32.xlu1 %v3786_v52, %s5250_s29  ;;  %958 = vrot.lane.b32.xlu2 %v3878_v31, %s3498_s20 }
 0x184   : > { %v3934_v46 = vpop.permute.xlu0 %711 }
 0x185   : > { %v3936_v47 = vpop.permute.xlu1 %812  ;;  %v3938_v48 = vpop.permute.xlu2 %1054 }
 0x186   : > { %5292 = vst [vmem:[#allocation26_spill] sm:$0xff] %v3938_v48  ;;  %v778_v48 = vld [vmem:[#allocation5 + $0x40] sm:$0xff] }
 0x18a   : > { %1123 = vperm.xlu0 %3023, %v1105_v49   ;;  %v724_v49 = vsel %vm719_vm1, %v3834_v11, %v3858_v22 }
 0x18b   : > { %1108 = vperm.xlu1 %3024, %v1102_v50   ;;  %1066 = vrot.lane.b32.xlu2 %v3864_v26, %s5250_s29  ;;  %v685_v50 = vld [vmem:[#allocation5 + $0x100] sm:$0xff] }
 0x18c   : > { %v3948_v53 = vpop.permute.xlu0 %754 }
 0x18d   : > { %v3950_v54 = vpop.permute.xlu1 %854  ;;  %v3952_v55 = vpop.permute.xlu2 %705 }
 0x192   : > { %1214 = vperm.xlu0 %3023, %v1200_v56   ;;  %v729_v56 = vld [vmem:[#allocation5 + $0x8] sm:$0xff] }
 0x193   : > { %1219 = vperm.xlu1 %3024, %v1201_v57   ;;  %1118 = vperm.xlu2 %3025, %v1104_v58   ;;  %v720_v57 = vsel %vm719_vm1, %v3858_v22, %v3834_v11  ;;  %v736_v58 = vmul.f32 %v728_v28, %v724_v49  ;;  %v828_v11 = vld [vmem:[#allocation5 + $0x80] sm:$0xff]  ;;  %v823_v22 = vsel %vm818_vm3, %v3872_v27, %v3874_v29 }
 0x194   : > { %v3963_v59 = vpop.permute.xlu0 %862 }
 0x195   : > { %v3965_v60 = vpop.permute.xlu1 %962  ;;  %v3967_v61 = vpop.permute.xlu2 %756 }
 0x19a   : > { %1209 = vperm.xlu0 %3023, %v1199_v62   ;;  %v686_v62 = vld [vmem:[#allocation5 + $0x108] sm:$0xff] }
 0x19b   : > { %1113 = vperm.xlu2 %3025, %v1103_v63   ;;  %v693_v63 = vmul.f32 %v685_v50, %v3750_v34  ;;  %v694_v50 = vmul.f32 %v686_v62, %v3752_v35  ;;  %v769_v34 = vsel %vm768_vm2, %v3842_v15, %v3860_v23  ;;  %v879_v35 = vld [vmem:[#allocation5 + $0xc8] sm:$0xff] }
 0x19c   : > { %v3975_v0 = vpop.permute.xlu0 %904 }
 0x19d   : > { %5293 = vst [vmem:[#allocation27_spill] sm:$0xff] %v3975_v0  ;;  %v3977_v1 = vpop.permute.xlu1 %1004  ;;  %v3979_v2 = vpop.permute.xlu2 %864  ;;  %v688_v0 = vld [vmem:[#allocation5 + $0x118] sm:$0xff] }
 0x19e   : > { %5294 = vst [vmem:[#allocation28_spill] sm:$0xff] %v3977_v1  ;;  %v773_v1 = vsel %vm768_vm2, %v3860_v23, %v3842_v15  ;;  %v869_v15 = vsel %vm868_vm4, %v3886_v32, %v3850_v19 }
 0x19f   : > { %v786_v62 = vmul.f32 %v778_v48, %v773_v1  ;;  %v887_v1 = vmul.f32 %v879_v35, %v869_v15  ;;  %v725_v15 = vsel %vm719_vm1, %v3934_v46, %v3924_v44 }
 0x1a3   : > { %1204 = vperm.xlu2 %3025, %v1198_v3   ;;  %v737_v3 = vmul.f32 %v729_v56, %v720_v57  ;;  %v744_v56 = vadd.f32 %v736_v58, %v693_v63  ;;  %v779_v57 = vld [vmem:[#allocation5 + $0x48] sm:$0xff]  ;;  %v836_v63 = vmul.f32 %v828_v11, %v823_v22  ;;  %v691_v22 = vld [vmem:[#allocation5 + $0x130] sm:$0xff] }
 0x1a4   : > { %v3984_v6 = vpop.permute.xlu0 %1012  ;;  %v787_v23 = vmul.f32 %v779_v57, %v769_v34  ;;  %v690_v11 = vld [vmem:[#allocation5 + $0x128] sm:$0xff]  ;;  %v919_v34 = vsel %vm918_vm5, %v3862_v24, %v3888_v33 }
 0x1a5   : > { %5295 = vst [vmem:[#allocation29_spill] sm:$0xff] %v3984_v6  ;;  %v3986_v7 = vpop.permute.xlu1 %764  ;;  %v3988_v8 = vpop.permute.xlu2 %906  ;;  %v829_v6 = vld [vmem:[#allocation5 + $0x88] sm:$0xff]  ;;  %v745_v58 = vadd.f32 %v737_v3, %v694_v50  ;;  %v689_v3 = vld [vmem:[#allocation5 + $0x120] sm:$0xff] }
 0x1a6   : > { %v979_v57 = vld [vmem:[#allocation5 + $0x188] sm:$0xff] }
 0x1a7   : > { %v795_v42 = vadd.f32 %v787_v23, %v745_v58  ;;  %v4083_v58 = vmul.f32 %v691_v22, %v3878_v31  ;;  %v774_v22 = vsel %vm768_vm2, %v3890_v36, %v3948_v53 }
 0x1ac   : > { %v3990_v9 = vpop.permute.xlu0 %713 }
 0x1ad   : > { %v3992_v10 = vpop.permute.xlu1 %806  ;;  %v3994_v12 = vpop.permute.xlu2 %1014 }
 0x1ae   : > { %5296 = vst [vmem:[#allocation30_spill] sm:$0xff] %v3994_v12  ;;  %v878_v12 = vld [vmem:[#allocation5 + $0xc0] sm:$0xff] }
 0x1b4   : > { %v3996_v14 = vpop.permute.xlu0 %814 }
 0x1b5   : > { %v3998_v16 = vpop.permute.xlu1 %914  ;;  %v4000_v17 = vpop.permute.xlu2 %1056 }
 0x1b6   : > { %5297 = vst [vmem:[#allocation31_spill] sm:$0xff] %v4000_v17  ;;  %v819_v17 = vsel %vm818_vm3, %v3874_v29, %v3872_v27 }
 0x1b7   : > { %v837_v27 = vmul.f32 %v829_v6, %v819_v17  ;;  %v929_v17 = vld [vmem:[#allocation5 + $0x148] sm:$0xff] }
 0x1b9   : > { %v845_v35 = vadd.f32 %v837_v27, %v795_v42  ;;  %v697_v42 = vmul.f32 %v689_v3, %v3818_v4 }
 0x1bc   : > { %v4005_v20 = vpop.permute.xlu0 %856 }
 0x1bd   : > { %v4007_v21 = vpop.permute.xlu1 %956  ;;  %v4009_v25 = vpop.permute.xlu2 %707 }
 0x1be   : > { %5298 = vst [vmem:[#allocation32_spill] sm:$0xff] %v4007_v21  ;;  %v928_v21 = vld [vmem:[#allocation5 + $0x140] sm:$0xff] }
 0x1bf   : > { %5299 = vst [vmem:[#allocation33_spill] sm:$0xff] %v4009_v25  ;;  %v687_v25 = vld [vmem:[#allocation5 + $0x110] sm:$0xff] }
 0x1c4   : > { %v4023_v13 = vpop.permute.xlu0 %964 }
 0x1c5   : > { %v4033_v28 = vpop.permute.xlu1 %1064  ;;  %v4035_v49 = vpop.permute.xlu2 %766 }
 0x1c6   : > { %5300 = vst [vmem:[#allocation34_spill] sm:$0xff] %v4033_v28  ;;  %v873_v28 = vsel %vm868_vm4, %v3850_v19, %v3886_v32  ;;  %v695_v19 = vmul.f32 %v687_v25, %v3784_v51  ;;  %v696_v32 = vmul.f32 %v688_v0, %v3786_v52  ;;  %v969_v25 = vsel %vm968_vm6, %v3900_v38, %v3898_v37 }
 0x1c7   : > { %5301 = vst [vmem:[#allocation35_spill] sm:$0xff] %v4035_v49  ;;  %v794_v49 = vadd.f32 %v786_v62, %v744_v56  ;;  %v886_v29 = vmul.f32 %v878_v12, %v873_v28  ;;  %v923_v28 = vsel %vm918_vm5, %v3888_v33, %v3862_v24  ;;  %v978_v56 = vld [vmem:[#allocation5 + $0x180] sm:$0xff]  ;;  %v973_v0 = vsel %vm968_vm6, %v3898_v37, %v3900_v38  ;;  %v731_v37 = vld [vmem:[#allocation5 + $0x18] sm:$0xff] }
 0x1c8   : > { %v698_v62 = vmul.f32 %v690_v11, %v3820_v5  ;;  %v936_v24 = vmul.f32 %v928_v21, %v919_v34  ;;  %v895_v33 = vadd.f32 %v887_v1, %v845_v35  ;;  %v937_v23 = vmul.f32 %v929_v17, %v923_v28  ;;  %v780_v11 = vld [vmem:[#allocation5 + $0x50] sm:$0xff]  ;;  %v733_v34 = vld [vmem:[#allocation5 + $0x28] sm:$0xff] }
 0x1c9   : > { %v844_v48 = vadd.f32 %v836_v63, %v794_v49  ;;  %v730_v63 = vld [vmem:[#allocation5 + $0x10] sm:$0xff]  ;;  %v986_v27 = vmul.f32 %v978_v56, %v969_v25  ;;  %v721_v38 = vsel %vm719_vm1, %v3924_v44, %v3934_v46  ;;  %v726_v21 = vsel %vm719_vm1, %v3990_v9, %v3952_v55  ;;  %v1028_v46 = vld [vmem:[#allocation5 + $0x1c0] sm:$0xff]  ;;  %v1029_v35 = vld [vmem:[#allocation5 + $0x1c8] sm:$0xff] }
 0x1ca   : > { %v987_v3 = vmul.f32 %v979_v57, %v973_v0  ;;  %v722_v44 = vsel %vm719_vm1, %v3952_v55, %v3990_v9  ;;  %v1019_v17 = vsel %vm1018_vm7, %v3910_v40, %v3876_v30  ;;  %v1023_v28 = vsel %vm1018_vm7, %v3876_v30, %v3910_v40  ;;  %v781_v56 = vld [vmem:[#allocation5 + $0x58] sm:$0xff] }
 0x1cb   : > { %v894_v49 = vadd.f32 %v886_v29, %v844_v48  ;;  %v732_v29 = vld [vmem:[#allocation5 + $0x20] sm:$0xff]  ;;  %v692_v48 = vld [vmem:[#allocation5 + $0x138] sm:$0xff]  ;;  %v770_v25 = vsel %vm768_vm2, %v3948_v53, %v3890_v36  ;;  %v945_v55 = vadd.f32 %v937_v23, %v895_v33  ;;  %v739_v9 = vmul.f32 %v731_v37, %v721_v38 }
 0x1cc   : > { %v4056_v50 = vpop.permute.xlu0 %1006  ;;  %v740_v57 = vmul.f32 %v732_v29, %v726_v21  ;;  %v4119_v0 = vmul.f32 %v692_v48, %v3864_v26  ;;  %v788_v30 = vmul.f32 %v780_v11, %v774_v22  ;;  %v741_v40 = vmul.f32 %v733_v34, %v722_v44  ;;  %v782_v37 = vld [vmem:[#allocation5 + $0x60] sm:$0xff]  ;;  %v830_v48 = vld [vmem:[#allocation5 + $0x90] sm:$0xff]  ;;  %v833_v22 = vld [vmem:[#allocation5 + $0xa8] sm:$0xff] }
 0x1cd   : > { %v4064_v6 = vpop.permute.xlu1 %715  ;;  %v4066_v12 = vpop.permute.xlu2 %808  ;;  %v944_v1 = vadd.f32 %v936_v24, %v894_v49  ;;  %v738_v49 = vmul.f32 %v730_v63, %v725_v15  ;;  %v4130_v51 = vadd.f32 %v987_v3, %v945_v55  ;;  %v4132_v36 = vmul.f32 %v1028_v46, %v1019_v17  ;;  %v832_v29 = vld [vmem:[#allocation5 + $0xa0] sm:$0xff]  ;;  %v783_v3 = vld [vmem:[#allocation5 + $0x68] sm:$0xff]  ;;  %v831_v44 = vld [vmem:[#allocation5 + $0x98] sm:$0xff] }
 0x1ce   : > { %v4134_v53 = vmul.f32 %v1029_v35, %v1023_v28  ;;  %v789_v33 = vmul.f32 %v781_v56, %v770_v25  ;;  %v824_v23 = vsel %vm818_vm3, %v3936_v47, %v3902_v39  ;;  %v775_v38 = vsel %vm768_vm2, %v3986_v7, %v3967_v61  ;;  %v882_v17 = vld [vmem:[#allocation5 + $0xe0] sm:$0xff]  ;;  %v880_v25 = vld [vmem:[#allocation5 + $0xd0] sm:$0xff] }
 0x1cf   : > { %v4123_v52 = vadd.f32 %v986_v27, %v944_v1  ;;  %v746_v27 = vadd.f32 %v738_v49, %v695_v19  ;;  %v825_v21 = vsel %vm818_vm3, %v3996_v14, %v3992_v10  ;;  %v747_v1 = vadd.f32 %v739_v9, %v696_v32  ;;  %v883_v49 = vld [vmem:[#allocation5 + $0xe8] sm:$0xff] }
 0x1d0   : > { %v771_v19 = vsel %vm768_vm2, %v3967_v61, %v3986_v7  ;;  %v748_v11 = vadd.f32 %v740_v57, %v697_v42  ;;  %v821_v34 = vsel %vm818_vm3, %v3992_v10, %v3996_v14  ;;  %v820_v46 = vsel %vm818_vm3, %v3902_v39, %v3936_v47 }
 0x1d1   : > { %v796_v32 = vadd.f32 %v788_v30, %v746_v27  ;;  %v749_v35 = vadd.f32 %v741_v40, %v698_v62  ;;  %v875_v61 = vsel %vm868_vm4, %v3979_v2, %v4005_v20  ;;  %v797_v7 = vadd.f32 %v789_v33, %v747_v1  ;;  %v932_v1 = vld [vmem:[#allocation5 + $0x160] sm:$0xff] }
 0x1d2   : > { %v790_v42 = vmul.f32 %v782_v37, %v775_v38  ;;  %v840_v28 = vmul.f32 %v832_v29, %v825_v21  ;;  %v871_v10 = vsel %vm868_vm4, %v4005_v20, %v3979_v2  ;;  %v4172_v39 = vsel %vm1068_vm8, %v3912_v41, %v3922_v43  ;;  %v881_v20 = vld [vmem:[#allocation5 + $0xd8] sm:$0xff]  ;;  %v980_v38 = vld [vmem:[#allocation5 + $0x190] sm:$0xff] }
 0x1d3   : > { %v838_v47 = vmul.f32 %v830_v48, %v824_v23  ;;  %v791_v14 = vmul.f32 %v783_v3, %v771_v19  ;;  %v841_v62 = vmul.f32 %v833_v22, %v821_v34  ;;  %v839_v56 = vmul.f32 %v831_v44, %v820_v46  ;;  %v933_v3 = vld [vmem:[#allocation5 + $0x168] sm:$0xff]  ;;  %v5302_v46 = vld [vmem:[#allocation32_spill] sm:$0xff] }
 0x1d4   : > { %v4121_v24 = vpop.permute.xlu0 %758  ;;  %v874_v55 = vsel %vm868_vm4, %v3963_v59, %v3950_v54  ;;  %v798_v9 = vadd.f32 %v790_v42, %v748_v11  ;;  %v890_v57 = vmul.f32 %v882_v17, %v875_v61  ;;  %v870_v40 = vsel %vm868_vm4, %v3950_v54, %v3963_v59  ;;  %v930_v61 = vld [vmem:[#allocation5 + $0x150] sm:$0xff] }
 0x1d5   : > { %v4126_v63 = vpop.permute.xlu1 %816  ;;  %v4128_v15 = vpop.permute.xlu2 %916  ;;  %v846_v2 = vadd.f32 %v838_v47, %v796_v32  ;;  %v799_v33 = vadd.f32 %v791_v14, %v749_v35  ;;  %v891_v23 = vmul.f32 %v883_v49, %v871_v10  ;;  %v970_v29 = vsel %vm968_vm6, %v3926_v45, %v3965_v60  ;;  %v5305_v49 = vld [vmem:[#allocation33_spill] sm:$0xff] }
 0x1d6   : > { %v4196_v21 = vsel %vm968_vm6, %v3965_v60, %v3926_v45  ;;  %v847_v48 = vadd.f32 %v839_v56, %v797_v7  ;;  %v848_v54 = vadd.f32 %v840_v28, %v798_v9  ;;  %v888_v59 = vmul.f32 %v880_v25, %v874_v55  ;;  %v982_v45 = vld [vmem:[#allocation5 + $0x1a0] sm:$0xff]  ;;  %v983_v60 = vld [vmem:[#allocation5 + $0x1a8] sm:$0xff]  ;;  %v734_v28 = vld [vmem:[#allocation5 + $0x30] sm:$0xff] }
 0x1d7   : > { %v921_v19 = vsel %vm918_vm5, %v3988_v8, %v3998_v16  ;;  %v925_v11 = vsel %vm918_vm5, %v3998_v16, %v3988_v8  ;;  %v849_v22 = vadd.f32 %v841_v62, %v799_v33  ;;  %v889_v34 = vmul.f32 %v881_v20, %v870_v40  ;;  %v5303_v7 = vld [vmem:[#allocation25_spill] sm:$0xff]  ;;  %v5304_v8 = vld [vmem:[#allocation27_spill] sm:$0xff]  ;;  %v1033_v56 = vld [vmem:[#allocation5 + $0x1e8] sm:$0xff] }
 0x1d8   : > { %v898_v44 = vadd.f32 %v890_v57, %v848_v54  ;;  %v971_v32 = vsel %vm968_vm6, %v5302_v46, %v4023_v13  ;;  %v975_v35 = vsel %vm968_vm6, %v4023_v13, %v5302_v46  ;;  %v4214_v17 = vmul.f32 %v980_v38, %v970_v29  ;;  %v1032_v62 = vld [vmem:[#allocation5 + $0x1e0] sm:$0xff]  ;;  %v5306_v13 = vld [vmem:[#allocation30_spill] sm:$0xff]  ;;  %v735_v20 = vld [vmem:[#allocation5 + $0x38] sm:$0xff] }
 0x1d9   : > { %v920_v16 = vsel %vm918_vm5, %v5304_v8, %v5303_v7  ;;  %v899_v42 = vadd.f32 %v891_v23, %v849_v22  ;;  %v727_v10 = vsel %vm719_vm1, %v4064_v6, %v5305_v49  ;;  %v940_v47 = vmul.f32 %v932_v1, %v921_v19  ;;  %v784_v33 = vld [vmem:[#allocation5 + $0x70] sm:$0xff]  ;;  %v931_v29 = vld [vmem:[#allocation5 + $0x158] sm:$0xff] }
 0x1da   : > { %v941_v14 = vmul.f32 %v933_v3, %v925_v11  ;;  %v1021_v25 = vsel %vm1018_vm7, %v4056_v50, %v5306_v13  ;;  %v1025_v55 = vsel %vm1018_vm7, %v5306_v13, %v4056_v50  ;;  %v990_v9 = vmul.f32 %v982_v45, %v971_v32  ;;  %v5307_v23 = vld [vmem:[#allocation35_spill] sm:$0xff] }
 0x1db   : > { %v991_v57 = vmul.f32 %v983_v60, %v975_v35  ;;  %v723_v40 = vsel %vm719_vm1, %v5305_v49, %v4064_v6  ;;  %v776_v38 = vsel %vm768_vm2, %v5307_v23, %v4121_v24  ;;  %v924_v50 = vsel %vm918_vm5, %v5303_v7, %v5304_v8  ;;  %v785_v6 = vld [vmem:[#allocation5 + $0x78] sm:$0xff]  ;;  %v1082_v8 = vld [vmem:[#allocation5 + $0x220] sm:$0xff] }
 0x1dc   : > { %v4178_v30 = vpop.permute.xlu0 %866  ;;  %v938_v54 = vmul.f32 %v930_v61, %v920_v16  ;;  %v948_v1 = vadd.f32 %v940_v47, %v898_v44  ;;  %v742_v3 = vmul.f32 %v734_v28, %v727_v10  ;;  %v949_v11 = vadd.f32 %v941_v14, %v899_v42  ;;  %v5308_v16 = vld [vmem:[#allocation34_spill] sm:$0xff]  ;;  %v5309_v42 = vld [vmem:[#allocation31_spill] sm:$0xff] }
 0x1dd   : > { %v4184_v27 = vpop.permute.xlu1 %858  ;;  %v4186_v37 = vpop.permute.xlu2 %958  ;;  %v1040_v22 = vmul.f32 %v1032_v62, %v1021_v25  ;;  %v1041_v45 = vmul.f32 %v1033_v56, %v1025_v55  ;;  %v772_v60 = vsel %vm768_vm2, %v4121_v24, %v5307_v23  ;;  %v896_v35 = vadd.f32 %v888_v59, %v846_v2  ;;  %v1083_v62 = vld [vmem:[#allocation5 + $0x228] sm:$0xff]  ;;  %v834_v56 = vld [vmem:[#allocation5 + $0xb0] sm:$0xff] }
 0x1de   : > { %v897_v49 = vadd.f32 %v889_v34, %v847_v48  ;;  %v743_v7 = vmul.f32 %v735_v20, %v723_v40  ;;  %v792_v61 = vmul.f32 %v784_v33, %v776_v38  ;;  %v939_v44 = vmul.f32 %v931_v29, %v924_v50  ;;  %v884_v25 = vld [vmem:[#allocation5 + $0xf0] sm:$0xff]  ;;  %v835_v38 = vld [vmem:[#allocation5 + $0xb8] sm:$0xff] }
 0x1df   : > { %v1071_v28 = vsel %vm1068_vm8, %v5309_v42, %v5308_v16  ;;  %v998_v10 = vadd.f32 %v990_v9, %v948_v1  ;;  %v999_v47 = vadd.f32 %v991_v57, %v949_v11  ;;  %v946_v14 = vadd.f32 %v938_v54, %v896_v35  ;;  %v5310_v9 = vld [vmem:[#allocation29_spill] sm:$0xff]  ;;  %v5311_v57 = vld [vmem:[#allocation28_spill] sm:$0xff]  ;;  %v934_v1 = vld [vmem:[#allocation5 + $0x170] sm:$0xff] }
 0x1e0   : > { %v1075_v24 = vsel %vm1068_vm8, %v5308_v16, %v5309_v42  ;;  %v750_v2 = vadd.f32 %v742_v3, %v4083_v58  ;;  %v793_v48 = vmul.f32 %v785_v6, %v772_v60  ;;  %v826_v13 = vsel %vm818_vm3, %v4126_v63, %v4066_v12  ;;  %v885_v50 = vld [vmem:[#allocation5 + $0xf8] sm:$0xff]  ;;  %v1030_v11 = vld [vmem:[#allocation5 + $0x1d0] sm:$0xff] }
 0x1e1   : > { %v1048_v59 = vadd.f32 %v1040_v22, %v998_v10  ;;  %v1049_v34 = vadd.f32 %v1041_v45, %v999_v47  ;;  %v876_v55 = vsel %vm868_vm4, %v4178_v30, %v4184_v27  ;;  %v1020_v58 = vsel %vm1018_vm7, %v5311_v57, %v5310_v9  ;;  %v1031_v22 = vld [vmem:[#allocation5 + $0x1d8] sm:$0xff] }
 0x1e2   : > { %v1090_v20 = vmul.f32 %v1082_v8, %v1071_v28  ;;  %v751_v40 = vadd.f32 %v743_v7, %v4119_v0  ;;  %v800_v33 = vadd.f32 %v792_v61, %v750_v2  ;;  %v1091_v23 = vmul.f32 %v1083_v62, %v1075_v24  ;;  %v981_v0 = vld [vmem:[#allocation5 + $0x198] sm:$0xff] }
 0x1e3   : > { %v822_v29 = vsel %vm818_vm3, %v4066_v12, %v4126_v63  ;;  %v872_v54 = vsel %vm868_vm4, %v4184_v27, %v4178_v30  ;;  %v1024_v45 = vsel %vm1018_vm7, %v5310_v9, %v5311_v57  ;;  %v842_v12 = vmul.f32 %v834_v56, %v826_v13  ;;  %v935_v7 = vld [vmem:[#allocation5 + $0x178] sm:$0xff] }
 0x1e4   : > { %v909_v19 = vpop.permute.xlu0 %908  ;;  %v801_v63 = vadd.f32 %v793_v48, %v751_v40  ;;  %v892_v6 = vmul.f32 %v884_v25, %v876_v55  ;;  %v947_v35 = vadd.f32 %v939_v44, %v897_v49  ;;  %v1098_v8 = vadd.f32 %v1090_v20, %v1048_v59  ;;  %v1078_v49 = vld [vmem:[#allocation5 + $0x200] sm:$0xff]  ;;  %v985_v9 = vld [vmem:[#allocation5 + $0x1b8] sm:$0xff]  ;;  %v1034_v20 = vld [vmem:[#allocation5 + $0x1f0] sm:$0xff] }
 0x1e5   : > { %v4248_v46 = vpop.permute.xlu1 %966  ;;  %v4250_v32 = vpop.permute.xlu2 %1066  ;;  %v922_v3 = vsel %vm918_vm5, %v909_v19, %v4128_v15  ;;  %v926_v30 = vsel %vm918_vm5, %v4128_v15, %v909_v19  ;;  %v1099_v16 = vadd.f32 %v1091_v23, %v1049_v34  ;;  %v843_v42 = vmul.f32 %v835_v38, %v822_v29  ;;  %v984_v19 = vld [vmem:[#allocation5 + $0x1b0] sm:$0xff] }
 0x1e6   : > { %v850_v28 = vadd.f32 %v842_v12, %v800_v33  ;;  %v893_v10 = vmul.f32 %v885_v50, %v872_v54  ;;  %v942_v47 = vmul.f32 %v934_v1, %v922_v3  ;;  %v989_v62 = vmul.f32 %v981_v0, %v4196_v21  ;;  %v1035_v33 = vld [vmem:[#allocation5 + $0x1f8] sm:$0xff]  ;;  %v1080_v50 = vld [vmem:[#allocation5 + $0x210] sm:$0xff]  ;;  %v1079_v3 = vld [vmem:[#allocation5 + $0x208] sm:$0xff] }
 0x1e7   : > { %v1038_v24 = vmul.f32 %v1030_v11, %v1020_v58  ;;  %v1039_v2 = vmul.f32 %v1031_v22, %v1024_v45  ;;  %v851_v44 = vadd.f32 %v843_v42, %v801_v63  ;;  %v943_v13 = vmul.f32 %v935_v7, %v926_v30  ;;  %v1084_v54 = vld [vmem:[#allocation5 + $0x230] sm:$0xff]  ;;  %v1085_v22 = vld [vmem:[#allocation5 + $0x238] sm:$0xff] }
 0x1e8   : > { %v900_v56 = vadd.f32 %v892_v6, %v850_v28  ;;  %v1073_v15 = vsel %vm1068_vm8, %v3922_v43, %v3912_v41  ;;  %v972_v21 = vsel %vm968_vm6, %v4186_v37, %v4248_v46  ;;  %v996_v59 = vadd.f32 %v4214_v17, %v946_v14  ;;  %v5312_v6 = vld [vmem:[#allocation26_spill] sm:$0xff] }
 0x1e9   : > { %v997_v34 = vadd.f32 %v989_v62, %v947_v35  ;;  %v901_v55 = vadd.f32 %v893_v10, %v851_v44  ;;  %v976_v57 = vsel %vm968_vm6, %v4248_v46, %v4186_v37  ;;  %v1086_v43 = vmul.f32 %v1078_v49, %v4172_v39  ;;  %v1081_v37 = vld [vmem:[#allocation5 + $0x218] sm:$0xff] }
 0x1ea   : > { %v950_v58 = vadd.f32 %v942_v47, %v900_v56  ;;  %v1046_v14 = vadd.f32 %v1038_v24, %v996_v59  ;;  %v992_v23 = vmul.f32 %v984_v19, %v972_v21  ;;  %v993_v0 = vmul.f32 %v985_v9, %v976_v57 }
 0x1eb   : > { %v951_v38 = vadd.f32 %v943_v13, %v901_v55  ;;  %v1047_v46 = vadd.f32 %v1039_v2, %v997_v34  ;;  %v1044_v2 = vadd.f32 %v4132_v36, %v4123_v52  ;;  %v1045_v49 = vadd.f32 %v4134_v53, %v4130_v51 }
 0x1ec   : > { %v1017_v60 = vpop.permute.xlu0 %1016  ;;  %v1000_v7 = vadd.f32 %v992_v23, %v950_v58 }
 0x1ed   : > { %v1009_v27 = vpop.permute.xlu1 %1008  ;;  %v1119_v61 = vpop.permute.xlu2 %1118  ;;  %v1001_v10 = vadd.f32 %v993_v0, %v951_v38  ;;  %v1094_v19 = vadd.f32 %v1086_v43, %v1044_v2 }
 0x1ee   : > { %v4293_v48 = vadd.f32 %v1119_v61, %v1098_v8  ;;  %v4295_v25 = vadd.f32 %v1119_v61, %v1099_v16  ;;  %v1022_v41 = vsel %vm1018_vm7, %v1009_v27, %v1017_v60  ;;  %v1026_v17 = vsel %vm1018_vm7, %v1017_v60, %v1009_v27 }
 0x1ef   : > { %v1042_v11 = vmul.f32 %v1034_v20, %v1022_v41  ;;  %v1043_v63 = vmul.f32 %v1035_v33, %v1026_v17  ;;  %v1087_v16 = vmul.f32 %v1079_v3, %v1073_v15 }
 0x1f0   : > { %v1138_v40 = vsub.f32 0.0, %v4293_v48  ;;  %v1139_v29 = vsub.f32 0.0, %v4295_v25 }
 0x1f1   : > { %v1050_v62 = vadd.f32 %v1042_v11, %v1000_v7  ;;  %v1051_v44 = vadd.f32 %v1043_v63, %v1001_v10  ;;  %v1095_v21 = vadd.f32 %v1087_v16, %v1045_v49 }
 0x1f2   : > { %v1150_v30 = vmul.f32 1.442695, %v1138_v40  ;;  %v1152_v42 = vmul.f32 1.442695, %v1139_v29 }
 0x1f4   : > { %v1059_v1 = vpop.permute.xlu0 %1058  ;;  %3058 = vpow2.f32 %v1150_v30 }
 0x1f5   : > { %v1063_v39 = vpop.permute.xlu1 %1062  ;;  %v1072_v45 = vsel %vm1068_vm8, %v1059_v1, %v4250_v32  ;;  %v1076_v12 = vsel %vm1068_vm8, %v4250_v32, %v1059_v1  ;;  %v1114_v24 = vpop.permute.xlu2 %1113  ;;  %3060 = vpow2.f32 %v1152_v42 }
 0x1f6   : > { %v1070_v60 = vsel %vm1068_vm8, %v5312_v6, %v1063_v39  ;;  %v1074_v35 = vsel %vm1068_vm8, %v1063_v39, %v5312_v6  ;;  %v1092_v8 = vmul.f32 %v1084_v54, %v1072_v45  ;;  %v1093_v28 = vmul.f32 %v1085_v22, %v1076_v12 }
 0x1f7   : > { %v1088_v27 = vmul.f32 %v1080_v50, %v1070_v60  ;;  %v1089_v61 = vmul.f32 %v1081_v37, %v1074_v35 }
 0x1f8   : > { %v1100_v15 = vadd.f32 %v1092_v8, %v1050_v62  ;;  %v1101_v59 = vadd.f32 %v1093_v28, %v1051_v44 }
 0x1f9   : > { %v1096_v47 = vadd.f32 %v1088_v27, %v1046_v14  ;;  %v1097_v32 = vadd.f32 %v1089_v61, %v1047_v46 }
 0x1fa   : > { %v3059_v14 = vpop.eup %3058 }
 0x1fb   : > { %v4333_v56 = vadd.f32 %v1114_v24, %v1096_v47  ;;  %v4335_v13 = vadd.f32 %v1114_v24, %v1097_v32  ;;  %v3061_v23 = vpop.eup %3060  ;;  %v1162_v37 = vadd.f32 1.0, %v3059_v14 }
 0x1fc   : > { %v1124_v34 = vpop.permute.xlu0 %1123  ;;  %v1163_v46 = vadd.f32 1.0, %v3061_v23 }
 0x1fd   : > { %v1136_v55 = vsub.f32 0.0, %v4333_v56  ;;  %v1137_v9 = vsub.f32 0.0, %v4335_v13  ;;  %v1109_v52 = vpop.permute.xlu1 %1108  ;;  %v1132_v36 = vadd.f32 %v1124_v34, %v1100_v15  ;;  %v1133_v53 = vadd.f32 %v1124_v34, %v1101_v59 }
 0x1fe   : > { %v1126_v57 = vadd.f32 %v1109_v52, %v1094_v19  ;;  %v1127_v51 = vadd.f32 %v1109_v52, %v1095_v21  ;;  %v5313_v19 = vld [vmem:[#allocation21_spill] sm:$0xff] }
 0x1ff   : > { %v1146_v58 = vmul.f32 1.442695, %v1136_v55  ;;  %v1148_v20 = vmul.f32 1.442695, %v1137_v9  ;;  %v1140_v41 = vsub.f32 0.0, %v1132_v36  ;;  %v1141_v17 = vsub.f32 0.0, %v1133_v53 }
 0x200   : > { %v1134_v40 = vsub.f32 0.0, %v1126_v57  ;;  %v1135_v33 = vsub.f32 0.0, %v1127_v51 }
 0x201   : > { %3062 = vpow2.f32 %v1146_v58  ;;  %v1154_v43 = vmul.f32 1.442695, %v1140_v41  ;;  %v1156_v50 = vmul.f32 1.442695, %v1141_v17 }
 0x202   : > { %3064 = vpow2.f32 %v1148_v20  ;;  %v1142_v38 = vmul.f32 1.442695, %v1134_v40  ;;  %v1144_v29 = vmul.f32 1.442695, %v1135_v33 }
 0x203   : > { %3066 = vpow2.f32 %v1154_v43 }
 0x204   : > { %3068 = vpow2.f32 %v1142_v38 }
 0x205   : > { %3070 = vpow2.f32 %v1144_v29  ;;  %v1215_v29 = vpop.permute.xlu0 %1214 }
 0x206   : > { %3072 = vpow2.f32 %v1156_v50 }
 0x207   : > { %v3063_v54 = vpop.eup %3062  ;;  %3074 = vrcp.f32 %v1162_v37 }
 0x208   : > { %v3065_v1 = vpop.eup %3064  ;;  %v1160_v3 = vadd.f32 1.0, %v3063_v54  ;;  %3076 = vrcp.f32 %v1163_v46 }
 0x209   : > { %v3067_v0 = vpop.eup %3066  ;;  %v1161_v11 = vadd.f32 1.0, %v3065_v1 }
 0x20a   : > { %v3069_v39 = vpop.eup %3068  ;;  %3078 = vrcp.f32 %v1160_v3  ;;  %v1164_v22 = vadd.f32 1.0, %v3067_v0 }
 0x20b   : > { %v3071_v45 = vpop.eup %3070  ;;  %3080 = vrcp.f32 %v1161_v11  ;;  %v1158_v12 = vadd.f32 1.0, %v3069_v39 }
 0x20c   : > { %v3073_v63 = vpop.eup %3072  ;;  %v1159_v6 = vadd.f32 1.0, %v3071_v45  ;;  %3082 = vrcp.f32 %v1164_v22 }
 0x20d   : > { %3084 = vrcp.f32 %v1158_v12  ;;  %v1165_v60 = vadd.f32 1.0, %v3073_v63  ;;  %v3075_v35 = vpop.eup %3074  ;;  %v1210_v0 = vpop.permute.xlu0 %1209 }
 0x20e   : > { %3086 = vrcp.f32 %v1159_v6  ;;  %v3077_v7 = vpop.eup %3076  ;;  %v1178_v61 = vmul.f32 %v3075_v35, %v4293_v48 }
 0x20f   : > { %3088 = vrcp.f32 %v1165_v60  ;;  %v1179_v47 = vmul.f32 %v3077_v7, %v4295_v25  ;;  %v5314_v25 = vld [vmem:[#allocation23_spill] sm:$0xff] }
 0x210   : > { %v3079_v30 = vpop.eup %3078  ;;  %v1186_v24 = vadd.f32 %v1178_v61, %v3818_v4 }
 0x211   : > { %v3081_v27 = vpop.eup %3080  ;;  %v1176_v62 = vmul.f32 %v3079_v30, %v4333_v56  ;;  %v1187_v59 = vadd.f32 %v1179_v47, %v3820_v5  ;;  %v5315_v56 = vld [vmem:[#allocation22_spill] sm:$0xff] }
 0x212   : > { %v3083_v8 = vpop.eup %3082  ;;  %v1177_v48 = vmul.f32 %v3081_v27, %v4335_v13  ;;  %v2926_v5 = vld [vmem:[%s5231_s5 + $0x8] sm:$0xff] }
 0x213   : > { %v3085_v16 = vpop.eup %3084  ;;  %v1180_v42 = vmul.f32 %v3083_v8, %v1132_v36  ;;  %v1184_v55 = vadd.f32 %v1176_v62, %v5314_v25 }
 0x214   : > { %v3087_v28 = vpop.eup %3086  ;;  %v1174_v10 = vmul.f32 %v3085_v16, %v1126_v57  ;;  %v2925_v57 = vld [vmem:[%s5231_s5] sm:$0xff] }
 0x215   : > { %v3089_v32 = vpop.eup %3088  ;;  %v1188_v2 = vadd.f32 %v1180_v42, %v3878_v31  ;;  %v1175_v49 = vmul.f32 %v3087_v28, %v1127_v51  ;;  %v5316_v31 = vld [vmem:[#allocation24_spill] sm:$0xff] }
 0x216   : > { %v1181_v44 = vmul.f32 %v3089_v32, %v1133_v53  ;;  %v1182_v21 = vadd.f32 %v1174_v10, %v5313_v19  ;;  %v1185_v36 = vadd.f32 %v1177_v48, %v5316_v31 }
 0x217   : > { %v1196_v15 = vpack.c.bf16 %v1188_v2, %v1186_v24  ;;  %v1183_v52 = vadd.f32 %v1175_v49, %v5315_v56 }
 0x218   : > { %v1189_v34 = vadd.f32 %v1181_v44, %v3864_v26  ;;  %v1194_v4 = vpack.c.bf16 %v1184_v55, %v1182_v21  ;;  %v1205_v26 = vpop.permute.xlu2 %1204 }
 0x219   : > { %1244 = vmatpush.bf16.msra.mxu2 %v1196_v15  ;;  %v1195_v13 = vpack.c.bf16 %v1185_v36, %v1183_v52 }
 0x21a   : > { %v1197_v9 = vpack.c.bf16 %v1189_v34, %v1187_v59  ;;  %v1220_v34 = vpop.permute.xlu1 %1219 }
 0x21c   : > { %1263 = vmatpush.bf16.msra.mxu3 %v1197_v9 }
 0x21d   : > { %1245 = vmatpush.bf16.msra.mxu2 %v1194_v4 }
 0x220   : > { %1264 = vmatpush.bf16.msra.mxu3 %v1195_v13  ;;  %2889 = vmatmul.msk.bf16.vlgmr.msra.gmra.mxu2 %vm591_vm0, %v2925_v57 }
 0x223   : > { %2891 = vmatmul.msk.bf16.vlgmr.msra.gmra.mxu3 %vm591_vm0, %v2925_v57 }
 0x230   : > { %2890 = vmatmul.msk.bf16.gmra.mxu2 %vm591_vm0, %v2926_v5 }
 0x233   : > { %2892 = vmatmul.msk.bf16.gmra.mxu3 %vm591_vm0, %v2926_v5 }
 0x2a3   : > { %v1247_v51 = vpop.f32.mrf.mxu2 }
 0x2a4   : > { %v1248_v53 = vadd.f32 %v1247_v51, %v1205_v26 }
 0x2a6   : > { %v1276_v58 = vsub.f32 0.0, %v1248_v53  ;;  %v1266_v20 = vpop.f32.mrf.mxu3 }
 0x2a7   : > { %v1267_v41 = vadd.f32 %v1266_v20, %v1205_v26  ;;  %v1326_v20 = vld [vmem:[#allocation7 + $0x108] sm:$0xff] }
 0x2a8   : > { %v1284_v40 = vmul.f32 1.442695, %v1276_v58 }
 0x2a9   : > { %v1277_v33 = vsub.f32 0.0, %v1267_v41 }
 0x2aa   : > { %3090 = vpow2.f32 %v1284_v40  ;;  %v1366_v40 = vld [vmem:[#allocation7 + $0x8] sm:$0xff] }
 0x2ab   : > { %v1286_v17 = vmul.f32 1.442695, %v1277_v33  ;;  %v1249_v1 = vpop.f32.mrf.mxu2 }
 0x2ac   : > { %v1250_v11 = vadd.f32 %v1249_v1, %v1210_v0 }
 0x2ad   : > { %3092 = vpow2.f32 %v1286_v17 }
 0x2ae   : > { %v1268_v3 = vpop.f32.mrf.mxu3  ;;  %v1278_v22 = vsub.f32 0.0, %v1250_v11 }
 0x2af   : > { %v1269_v39 = vadd.f32 %v1268_v3, %v1210_v0 }
 0x2b0   : > { %v3091_v14 = vpop.eup %3090  ;;  %v1288_v12 = vmul.f32 1.442695, %v1278_v22 }
 0x2b1   : > { %v1300_v43 = vadd.f32 1.0, %v3091_v14  ;;  %v1279_v45 = vsub.f32 0.0, %v1269_v39 }
 0x2b3   : > { %v3093_v23 = vpop.eup %3092  ;;  %3094 = vrcp.f32 %v1300_v43  ;;  %v1290_v63 = vmul.f32 1.442695, %v1279_v45  ;;  %v1252_v16 = vpop.f32.mrf.mxu2 }
 0x2b4   : > { %v1301_v38 = vadd.f32 1.0, %v3093_v23  ;;  %v1253_v42 = vadd.f32 %v1252_v16, %v1215_v29  ;;  %v1464_v16 = vld [vmem:[#allocation7 + $0x88] sm:$0xff] }
 0x2b6   : > { %3096 = vrcp.f32 %v1301_v38  ;;  %v1271_v28 = vpop.f32.mrf.mxu3  ;;  %v1280_v10 = vsub.f32 0.0, %v1253_v42  ;;  %v1414_v38 = vld [vmem:[#allocation7 + $0x40] sm:$0xff] }
 0x2b7   : > { %3098 = vpow2.f32 %v1288_v12  ;;  %v1272_v47 = vadd.f32 %v1271_v28, %v1215_v29  ;;  %v1415_v29 = vld [vmem:[#allocation7 + $0x48] sm:$0xff] }
 0x2b8   : > { %3100 = vpow2.f32 %v1290_v63  ;;  %v1292_v32 = vmul.f32 1.442695, %v1280_v10 }
 0x2b9   : > { %v3095_v50 = vpop.eup %3094  ;;  %v1281_v62 = vsub.f32 0.0, %v1272_v47 }
 0x2ba   : > { %v4361_v37 = vmul.f32 %v3095_v50, %v1248_v53  ;;  %v1325_v53 = vld [vmem:[#allocation7 + $0x100] sm:$0xff] }
 0x2bb   : > { %v1294_v24 = vmul.f32 1.442695, %v1281_v62  ;;  %v1254_v59 = vpop.f32.mrf.mxu2 }
 0x2bc   : > { %v3097_v46 = vpop.eup %3096  ;;  %1341 = vrot.lane.b32.xlu0 %v4361_v37, %s3493_s15  ;;  %v1255_v55 = vadd.f32 %v1254_v59, %v1220_v34  ;;  %v1333_v17 = vmul.f32 %v1325_v53, %v4361_v37 }
 0x2bd   : > { %v4365_v54 = vmul.f32 %v3097_v46, %v1267_v41  ;;  %v3099_v6 = vpop.eup %3098  ;;  %v1365_v41 = vld [vmem:[#allocation7] sm:$0xff] }
 0x2be   : > { %v3101_v60 = vpop.eup %3100  ;;  %v1302_v35 = vadd.f32 1.0, %v3099_v6  ;;  %v1282_v9 = vsub.f32 0.0, %v1255_v55  ;;  %v1273_v56 = vpop.f32.mrf.mxu3 }
 0x2bf   : > { %1397 = vrot.lane.b32.xlu1 %v4365_v54, %s3494_s16  ;;  %1349 = vrot.lane.b32.xlu2 %v4365_v54, %s3493_s15  ;;  %v1303_v7 = vadd.f32 1.0, %v3101_v60  ;;  %v1274_v31 = vadd.f32 %v1273_v56, %v1220_v34  ;;  %v1334_v50 = vmul.f32 %v1326_v20, %v4365_v54 }
 0x2c0   : > { %3102 = vrcp.f32 %v1302_v35  ;;  %v1296_v4 = vmul.f32 1.442695, %v1282_v9  ;;  %v1562_v9 = vld [vmem:[#allocation7 + $0x148] sm:$0xff] }
 0x2c1   : > { %3104 = vrcp.f32 %v1303_v7  ;;  %v1283_v36 = vsub.f32 0.0, %v1274_v31 }
 0x2c2   : > { %3106 = vpow2.f32 %v1292_v32 }
 0x2c3   : > { %3108 = vpow2.f32 %v1294_v24  ;;  %v1298_v13 = vmul.f32 1.442695, %v1283_v36 }
 0x2c4   : > { %1446 = vrot.lane.b32.xlu0 %v4365_v54, %s3495_s19 }
 0x2c6   : > { %v3103_v30 = vpop.eup %3102 }
 0x2c7   : > { %1438 = vrot.lane.b32.xlu1 %v4361_v37, %s3495_s19  ;;  %1389 = vrot.lane.b32.xlu2 %v4361_v37, %s3494_s16  ;;  %v3105_v27 = vpop.eup %3104  ;;  %v4397_v61 = vmul.f32 %v3103_v30, %v1250_v11 }
 0x2c8   : > { %v4399_v8 = vmul.f32 %v3105_v27, %v1269_v39  ;;  %v3107_v2 = vpop.eup %3106  ;;  %v1463_v27 = vld [vmem:[#allocation7 + $0x80] sm:$0xff] }
 0x2c9   : > { %v1304_v49 = vadd.f32 1.0, %v3107_v2  ;;  %v3109_v44 = vpop.eup %3108 }
 0x2ca   : > { %v1305_v15 = vadd.f32 1.0, %v3109_v44 }
 0x2cb   : > { %3110 = vrcp.f32 %v1304_v49 }
 0x2cc   : > { %1487 = vrot.lane.b32.xlu0 %v4361_v37, %s3496_s24  ;;  %3112 = vrcp.f32 %v1305_v15  ;;  %v1512_v15 = vld [vmem:[#allocation7 + $0xc0] sm:$0xff] }
 0x2cd   : > { %3114 = vpow2.f32 %v1296_v4 }
 0x2ce   : > { %3116 = vpow2.f32 %v1298_v13 }
 0x2cf   : > { %1544 = vrot.lane.b32.xlu1 %v4365_v54, %s3497_s25  ;;  %1495 = vrot.lane.b32.xlu2 %v4365_v54, %s3496_s24 }
 0x2d1   : > { %v3111_v19 = vpop.eup %3110 }
 0x2d2   : > { %v4431_v21 = vmul.f32 %v3111_v19, %v1253_v42  ;;  %v3113_v48 = vpop.eup %3112  ;;  %v1513_v19 = vld [vmem:[#allocation7 + $0xc8] sm:$0xff] }
 0x2d3   : > { %v4437_v25 = vmul.f32 %v3113_v48, %v1272_v47  ;;  %v3115_v5 = vpop.eup %3114 }
 0x2d4   : > { %1593 = vrot.lane.b32.xlu0 %v4365_v54, %s3498_s20  ;;  %v1306_v26 = vadd.f32 1.0, %v3115_v5  ;;  %v3117_v58 = vpop.eup %3116 }
 0x2d5   : > { %v1307_v23 = vadd.f32 1.0, %v3117_v58 }
 0x2d6   : > { %3118 = vrcp.f32 %v1306_v26 }
 0x2d7   : > { %1585 = vrot.lane.b32.xlu1 %v4361_v37, %s3498_s20  ;;  %1536 = vrot.lane.b32.xlu2 %v4361_v37, %s3497_s25  ;;  %3120 = vrcp.f32 %v1307_v23 }
 0x2dc   : > { %1634 = vrot.lane.b32.xlu0 %v4361_v37, %s3499_s3  ;;  %v3119_v11 = vpop.eup %3118 }
 0x2dd   : > { %v4475_v60 = vmul.f32 %v3119_v11, %v1255_v55  ;;  %v3121_v10 = vpop.eup %3120  ;;  %v1561_v55 = vld [vmem:[#allocation7 + $0x140] sm:$0xff] }
 0x2de   : > { %v4487_v2 = vmul.f32 %v3121_v10, %v1274_v31 }
 0x2df   : > { %1683 = vrot.lane.b32.xlu1 %v4361_v37, %s5317_s22  ;;  %1642 = vrot.lane.b32.xlu2 %v4365_v54, %s3499_s3 }
 0x2e4   : > { %1691 = vrot.lane.b32.xlu0 %v4365_v54, %s5317_s22 }
 0x2e7   : > { %1343 = vrot.lane.b32.xlu1 %v4397_v61, %s3493_s15  ;;  %1399 = vrot.lane.b32.xlu2 %v4399_v8, %s3494_s16 }
 0x2ec   : > { %1351 = vrot.lane.b32.xlu0 %v4399_v8, %s3493_s15 }
 0x2ef   : > { %1448 = vrot.lane.b32.xlu1 %v4399_v8, %s3495_s19  ;;  %1440 = vrot.lane.b32.xlu2 %v4397_v61, %s3495_s19 }
 0x2f4   : > { %1391 = vrot.lane.b32.xlu0 %v4397_v61, %s3494_s16 }
 0x2f7   : > { %1489 = vrot.lane.b32.xlu1 %v4397_v61, %s3496_s24  ;;  %1546 = vrot.lane.b32.xlu2 %v4399_v8, %s3497_s25 }
 0x2fc   : > { %1497 = vrot.lane.b32.xlu0 %v4399_v8, %s3496_s24 }
 0x2ff   : > { %1595 = vrot.lane.b32.xlu1 %v4399_v8, %s3498_s20  ;;  %1587 = vrot.lane.b32.xlu2 %v4397_v61, %s3498_s20 }
 0x304   : > { %1538 = vrot.lane.b32.xlu0 %v4397_v61, %s3497_s25 }
 0x307   : > { %1636 = vrot.lane.b32.xlu1 %v4397_v61, %s3499_s3  ;;  %1685 = vrot.lane.b32.xlu2 %v4397_v61, %s5317_s22 }
 0x30c   : > { %1644 = vrot.lane.b32.xlu0 %v4399_v8, %s3499_s3 }
 0x30f   : > { %1345 = vrot.lane.b32.xlu1 %v4431_v21, %s3493_s15  ;;  %1393 = vrot.lane.b32.xlu2 %v4431_v21, %s3494_s16 }
 0x314   : > { %1353 = vrot.lane.b32.xlu0 %v4437_v25, %s3493_s15 }
 0x317   : > { %1401 = vrot.lane.b32.xlu1 %v4437_v25, %s3494_s16  ;;  %1499 = vrot.lane.b32.xlu2 %v4437_v25, %s3496_s24 }
 0x319   : > { %v1350_v52 = vpop.permute.xlu2 %1349 }
 0x31c   : > { %1450 = vrot.lane.b32.xlu0 %v4437_v25, %s3495_s19 }
 0x31f   : > { %1442 = vrot.lane.b32.xlu1 %v4431_v21, %s3495_s19  ;;  %1540 = vrot.lane.b32.xlu2 %v4431_v21, %s3497_s25 }
 0x321   : > { %v1390_v57 = vpop.permute.xlu2 %1389 }
 0x324   : > { %1491 = vrot.lane.b32.xlu0 %v4431_v21, %s3496_s24 }
 0x327   : > { %1548 = vrot.lane.b32.xlu1 %v4437_v25, %s3497_s25  ;;  %1646 = vrot.lane.b32.xlu2 %v4437_v25, %s3499_s3 }
 0x329   : > { %v1496_v51 = vpop.permute.xlu2 %1495 }
 0x32c   : > { %1597 = vrot.lane.b32.xlu0 %v4437_v25, %s3498_s20 }
 0x32e   : > { %v1342_v33 = vpop.permute.xlu0 %1341 }
 0x32f   : > { %1589 = vrot.lane.b32.xlu1 %v4431_v21, %s3498_s20  ;;  %1687 = vrot.lane.b32.xlu2 %v4431_v21, %s5317_s22  ;;  %v1357_v14 = vsel %vm719_vm1, %v1342_v33, %v1350_v52  ;;  %v1361_v43 = vsel %vm719_vm1, %v1350_v52, %v1342_v33 }
 0x330   : > { %v1373_v46 = vmul.f32 %v1365_v41, %v1361_v43  ;;  %v1374_v1 = vmul.f32 %v1366_v40, %v1357_v14  ;;  %v1610_v41 = vld [vmem:[#allocation7 + $0x180] sm:$0xff]  ;;  %v1611_v40 = vld [vmem:[#allocation7 + $0x188] sm:$0xff] }
 0x331   : > { %v1398_v3 = vpop.permute.xlu1 %1397  ;;  %v1537_v0 = vpop.permute.xlu2 %1536 }
 0x332   : > { %v1405_v39 = vsel %vm768_vm2, %v1390_v57, %v1398_v3  ;;  %v1409_v22 = vsel %vm768_vm2, %v1398_v3, %v1390_v57  ;;  %v1381_v45 = vadd.f32 %v1373_v46, %v1333_v17  ;;  %v1382_v12 = vadd.f32 %v1374_v1, %v1334_v50  ;;  %v1659_v46 = vld [vmem:[#allocation7 + $0x1c0] sm:$0xff]  ;;  %v1660_v1 = vld [vmem:[#allocation7 + $0x1c8] sm:$0xff] }
 0x333   : > { %v1422_v63 = vmul.f32 %v1414_v38, %v1409_v22  ;;  %v1423_v6 = vmul.f32 %v1415_v29, %v1405_v39 }
 0x334   : > { %1638 = vrot.lane.b32.xlu0 %v4431_v21, %s3499_s3 }
 0x335   : > { %v1431_v35 = vadd.f32 %v1423_v6, %v1382_v12  ;;  %v1430_v7 = vadd.f32 %v1422_v63, %v1381_v45 }
 0x336   : > { %v1447_v30 = vpop.permute.xlu0 %1446 }
 0x337   : > { %1695 = vrot.lane.b32.xlu1 %v4437_v25, %s5317_s22  ;;  %1347 = vrot.lane.b32.xlu2 %v4475_v60, %s3493_s15 }
 0x339   : > { %v1439_v42 = vpop.permute.xlu1 %1438  ;;  %v1643_v28 = vpop.permute.xlu2 %1642 }
 0x33a   : > { %v1454_v47 = vsel %vm818_vm3, %v1439_v42, %v1447_v30  ;;  %v1458_v32 = vsel %vm818_vm3, %v1447_v30, %v1439_v42 }
 0x33b   : > { %v1471_v62 = vmul.f32 %v1463_v27, %v1458_v32  ;;  %v1472_v24 = vmul.f32 %v1464_v16, %v1454_v47 }
 0x33c   : > { %1395 = vrot.lane.b32.xlu0 %v4475_v60, %s3494_s16 }
 0x33d   : > { %v1479_v49 = vadd.f32 %v1471_v62, %v1430_v7  ;;  %v1480_v44 = vadd.f32 %v1472_v24, %v1431_v35  ;;  %v1708_v35 = vld [vmem:[#allocation7 + $0x200] sm:$0xff]  ;;  %v1709_v7 = vld [vmem:[#allocation7 + $0x208] sm:$0xff] }
 0x33e   : > { %v1488_v48 = vpop.permute.xlu0 %1487 }
 0x33f   : > { %1355 = vrot.lane.b32.xlu1 %v4487_v2, %s3493_s15  ;;  %1403 = vrot.lane.b32.xlu2 %v4487_v2, %s3494_s16  ;;  %v1503_v59 = vsel %vm868_vm4, %v1488_v48, %v1496_v51  ;;  %v1507_v34 = vsel %vm868_vm4, %v1496_v51, %v1488_v48  ;;  %v1367_v48 = vld [vmem:[#allocation7 + $0x10] sm:$0xff] }
 0x340   : > { %v1520_v56 = vmul.f32 %v1512_v15, %v1507_v34  ;;  %v1521_v52 = vmul.f32 %v1513_v19, %v1503_v59  ;;  %v1368_v59 = vld [vmem:[#allocation7 + $0x18] sm:$0xff] }
 0x341   : > { %v1545_v4 = vpop.permute.xlu1 %1544  ;;  %v4497_v31 = vpop.permute.xlu2 %1399  ;;  %v1735_v34 = vld [vmem:[%s5234_s8 + $0x18] sm:$0xff] }
 0x342   : > { %v1552_v36 = vsel %vm918_vm5, %v1537_v0, %v1545_v4  ;;  %v1556_v57 = vsel %vm918_vm5, %v1545_v4, %v1537_v0  ;;  %v1528_v13 = vadd.f32 %v1520_v56, %v1479_v49  ;;  %v1529_v5 = vadd.f32 %v1521_v52, %v1480_v44  ;;  %v1327_v56 = vld [vmem:[#allocation7 + $0x110] sm:$0xff]  ;;  %v1328_v52 = vld [vmem:[#allocation7 + $0x118] sm:$0xff] }
 0x343   : > { %v1569_v26 = vmul.f32 %v1561_v55, %v1552_v36  ;;  %v1570_v53 = vmul.f32 %v1562_v9, %v1556_v57  ;;  %v1734_v57 = vld [vmem:[%s5234_s8 + $0x10] sm:$0xff] }
 0x344   : > { %1501 = vrot.lane.b32.xlu0 %v4487_v2, %s3496_s24 }
 0x345   : > { %v1578_v51 = vadd.f32 %v1570_v53, %v1529_v5  ;;  %v1577_v58 = vadd.f32 %v1569_v26, %v1528_v13  ;;  %v1416_v13 = vld [vmem:[#allocation7 + $0x50] sm:$0xff]  ;;  %v1417_v5 = vld [vmem:[#allocation7 + $0x58] sm:$0xff]  ;;  %v1335_v26 = vmul.f32 %v1327_v56, %v4397_v61  ;;  %v1336_v53 = vmul.f32 %v1328_v52, %v4399_v8 }
 0x346   : > { %v1594_v20 = vpop.permute.xlu0 %1593 }
 0x347   : > { %1452 = vrot.lane.b32.xlu1 %v4487_v2, %s3495_s19  ;;  %1444 = vrot.lane.b32.xlu2 %v4475_v60, %s3495_s19 }
 0x349   : > { %v1586_v33 = vpop.permute.xlu1 %1585  ;;  %v1441_v17 = vpop.permute.xlu2 %1440 }
 0x34a   : > { %v1601_v14 = vsel %vm968_vm6, %v1586_v33, %v1594_v20  ;;  %v1605_v43 = vsel %vm968_vm6, %v1594_v20, %v1586_v33  ;;  %v1466_v20 = vld [vmem:[#allocation7 + $0x98] sm:$0xff] }
 0x34b   : > { %v1618_v23 = vmul.f32 %v1610_v41, %v1601_v14  ;;  %v1619_v38 = vmul.f32 %v1611_v40, %v1605_v43 }
 0x34c   : > { %1542 = vrot.lane.b32.xlu0 %v4475_v60, %s3497_s25 }
 0x34d   : > { %v1626_v29 = vadd.f32 %v1618_v23, %v1577_v58  ;;  %v1627_v50 = vadd.f32 %v1619_v38, %v1578_v51  ;;  %v1465_v58 = vld [vmem:[#allocation7 + $0x90] sm:$0xff] }
 0x34e   : > { %v1635_v3 = vpop.permute.xlu0 %1634 }
 0x34f   : > { %1493 = vrot.lane.b32.xlu1 %v4475_v60, %s3496_s24  ;;  %1550 = vrot.lane.b32.xlu2 %v4487_v2, %s3497_s25  ;;  %v1650_v0 = vsel %vm1018_vm7, %v1635_v3, %v1643_v28  ;;  %v1654_v11 = vsel %vm1018_vm7, %v1643_v28, %v1635_v3 }
 0x350   : > { %v1667_v39 = vmul.f32 %v1659_v46, %v1650_v0  ;;  %v1668_v22 = vmul.f32 %v1660_v1, %v1654_v11  ;;  %v1732_v0 = vld [vmem:[%s5234_s8] sm:$0xff] }
 0x351   : > { %v1684_v45 = vpop.permute.xlu1 %1683  ;;  %v4523_v12 = vpop.permute.xlu2 %1546 }
 0x352   : > { %v1675_v63 = vadd.f32 %v1667_v39, %v1626_v29  ;;  %v1676_v6 = vadd.f32 %v1668_v22, %v1627_v50  ;;  %v1830_v29 = vld [vmem:[%s5236_s10 + $0x10] sm:$0xff] }
 0x353   : > { %v1514_v22 = vld [vmem:[#allocation7 + $0xd0] sm:$0xff] }
 0x354   : > { %1648 = vrot.lane.b32.xlu0 %v4487_v2, %s3499_s3 }
 0x356   : > { %v1692_v30 = vpop.permute.xlu0 %1691 }
 0x357   : > { %1599 = vrot.lane.b32.xlu1 %v4487_v2, %s3498_s20  ;;  %1591 = vrot.lane.b32.xlu2 %v4475_v60, %s3498_s20  ;;  %v1699_v27 = vsel %vm1068_vm8, %v1684_v45, %v1692_v30  ;;  %v1703_v16 = vsel %vm1068_vm8, %v1692_v30, %v1684_v45  ;;  %v1515_v45 = vld [vmem:[#allocation7 + $0xd8] sm:$0xff] }
 0x358   : > { %v1716_v42 = vmul.f32 %v1708_v35, %v1699_v27  ;;  %v1717_v28 = vmul.f32 %v1709_v7, %v1703_v16 }
 0x359   : > { %v1344_v10 = vpop.permute.xlu1 %1343  ;;  %v4535_v47 = vpop.permute.xlu2 %1587 }
 0x35a   : > { %v4537_v32 = vadd.f32 %v1716_v42, %v1675_v63  ;;  %v4539_v62 = vadd.f32 %v1717_v28, %v1676_v6  ;;  %v1829_v42 = vld [vmem:[%s5236_s10 + $0x8] sm:$0xff] }
 0x35c   : > { %1689 = vrot.lane.b32.xlu0 %v4475_v60, %s5317_s22 }
 0x35e   : > { %v1352_v24 = vpop.permute.xlu0 %1351 }
 0x35f   : > { %1640 = vrot.lane.b32.xlu1 %v4475_v60, %s3499_s3  ;;  %1697 = vrot.lane.b32.xlu2 %v4487_v2, %s5317_s22  ;;  %v1358_v49 = vsel %vm719_vm1, %v1344_v10, %v1352_v24  ;;  %v1362_v44 = vsel %vm719_vm1, %v1352_v24, %v1344_v10 }
 0x360   : > { %v1375_v4 = vmul.f32 %v1367_v48, %v1362_v44  ;;  %v1376_v36 = vmul.f32 %v1368_v59, %v1358_v49  ;;  %v1831_v44 = vld [vmem:[%s5236_s10 + $0x18] sm:$0xff]  ;;  %v1563_v48 = vld [vmem:[#allocation7 + $0x150] sm:$0xff] }
 0x361   : > { %v1449_v15 = vpop.permute.xlu1 %1448  ;;  %v4551_v19 = vpop.permute.xlu2 %1685  ;;  %v1564_v59 = vld [vmem:[#allocation7 + $0x158] sm:$0xff] }
 0x362   : > { %v1455_v55 = vsel %vm818_vm3, %v1441_v17, %v1449_v15  ;;  %v1459_v9 = vsel %vm818_vm3, %v1449_v15, %v1441_v17  ;;  %v1383_v33 = vadd.f32 %v1375_v4, %v1335_v26  ;;  %v1384_v17 = vadd.f32 %v1376_v36, %v1336_v53  ;;  %v1828_v15 = vld [vmem:[%s5236_s10] sm:$0xff] }
 0x363   : > { %v1473_v50 = vmul.f32 %v1465_v58, %v1459_v9  ;;  %v1474_v46 = vmul.f32 %v1466_v20, %v1455_v55  ;;  %v1612_v55 = vld [vmem:[#allocation7 + $0x190] sm:$0xff]  ;;  %v1613_v9 = vld [vmem:[#allocation7 + $0x198] sm:$0xff] }
 0x364   : > { %1753 = vperm.xlu0 %3023, %v1735_v34   ;;  %v1661_v20 = vld [vmem:[#allocation7 + $0x1d0] sm:$0xff] }
 0x366   : > { %v1392_v51 = vpop.permute.xlu0 %1391 }
 0x367   : > { %1693 = vrot.lane.b32.xlu1 %v4399_v8, %s5317_s22  ;;  %1748 = vperm.xlu2 %3025, %v1734_v57   ;;  %v1406_v41 = vsel %vm768_vm2, %v1392_v51, %v4497_v31  ;;  %v1410_v40 = vsel %vm768_vm2, %v4497_v31, %v1392_v51  ;;  %v1733_v31 = vld [vmem:[%s5234_s8 + $0x8] sm:$0xff] }
 0x368   : > { %v1424_v14 = vmul.f32 %v1416_v13, %v1410_v40  ;;  %v1425_v43 = vmul.f32 %v1417_v5, %v1406_v41  ;;  %v1662_v41 = vld [vmem:[#allocation7 + $0x1d8] sm:$0xff] }
 0x369   : > { %v1490_v23 = vpop.permute.xlu1 %1489  ;;  %v4573_v38 = vpop.permute.xlu2 %1393 }
 0x36a   : > { %v1432_v1 = vadd.f32 %v1424_v14, %v1383_v33  ;;  %v1433_v3 = vadd.f32 %v1425_v43, %v1384_v17 }
 0x36c   : > { %1844 = vperm.xlu0 %3023, %v1830_v29   ;;  %v1481_v11 = vadd.f32 %v1473_v50, %v1432_v1  ;;  %v1482_v39 = vadd.f32 %v1474_v46, %v1433_v3  ;;  %v1329_v46 = vld [vmem:[#allocation7 + $0x120] sm:$0xff]  ;;  %v1330_v1 = vld [vmem:[#allocation7 + $0x128] sm:$0xff] }
 0x36d   : > { %v1369_v3 = vld [vmem:[#allocation7 + $0x20] sm:$0xff] }
 0x36e   : > { %v1498_v63 = vpop.permute.xlu0 %1497 }
 0x36f   : > { %1738 = vperm.xlu1 %3024, %v1732_v0   ;;  %1743 = vperm.xlu2 %3025, %v1733_v31   ;;  %v1504_v6 = vsel %vm868_vm4, %v1490_v23, %v1498_v63  ;;  %v1508_v35 = vsel %vm868_vm4, %v1498_v63, %v1490_v23  ;;  %v1370_v0 = vld [vmem:[#allocation7 + $0x28] sm:$0xff]  ;;  %v1337_v63 = vmul.f32 %v1329_v46, %v4431_v21 }
 0x370   : > { %v1522_v7 = vmul.f32 %v1514_v22, %v1508_v35  ;;  %v1523_v30 = vmul.f32 %v1515_v45, %v1504_v6  ;;  %v1418_v22 = vld [vmem:[#allocation7 + $0x60] sm:$0xff]  ;;  %v1419_v45 = vld [vmem:[#allocation7 + $0x68] sm:$0xff]  ;;  %v1338_v6 = vmul.f32 %v1330_v1, %v4437_v25 }
 0x371   : > { %v1596_v27 = vpop.permute.xlu1 %1595  ;;  %v4588_v16 = vpop.permute.xlu2 %1499 }
 0x372   : > { %v1602_v28 = vsel %vm968_vm6, %v4535_v47, %v1596_v27  ;;  %v1606_v10 = vsel %vm968_vm6, %v1596_v27, %v4535_v47  ;;  %v1530_v24 = vadd.f32 %v1522_v7, %v1481_v11  ;;  %v1531_v49 = vadd.f32 %v1523_v30, %v1482_v39 }
 0x373   : > { %v1620_v13 = vmul.f32 %v1612_v55, %v1602_v28  ;;  %v1621_v5 = vmul.f32 %v1613_v9, %v1606_v10  ;;  %v1467_v9 = vld [vmem:[#allocation7 + $0xa0] sm:$0xff] }
 0x374   : > { %1839 = vperm.xlu0 %3023, %v1829_v42  }
 0x376   : > { %v1539_v34 = vpop.permute.xlu0 %1538 }
 0x377   : > { %1849 = vperm.xlu1 %3024, %v1831_v44   ;;  %1834 = vperm.xlu2 %3025, %v1828_v15   ;;  %v1553_v47 = vsel %vm918_vm5, %v1539_v34, %v4523_v12  ;;  %v1557_v56 = vsel %vm918_vm5, %v4523_v12, %v1539_v34 }
 0x378   : > { %v1571_v52 = vmul.f32 %v1563_v48, %v1553_v47  ;;  %v1572_v4 = vmul.f32 %v1564_v59, %v1557_v56  ;;  %v1468_v47 = vld [vmem:[#allocation7 + $0xa8] sm:$0xff] }
 0x379   : > { %v1637_v36 = vpop.permute.xlu1 %1636  ;;  %v4611_v57 = vpop.permute.xlu2 %1540 }
 0x37a   : > { %v1579_v26 = vadd.f32 %v1571_v52, %v1530_v24  ;;  %v1580_v53 = vadd.f32 %v1572_v4, %v1531_v49 }
 0x37c   : > { %v1628_v51 = vadd.f32 %v1620_v13, %v1579_v26  ;;  %v1629_v58 = vadd.f32 %v1621_v5, %v1580_v53  ;;  %v1517_v13 = vld [vmem:[#allocation7 + $0xe8] sm:$0xff] }
 0x37e   : > { %v1645_v40 = vpop.permute.xlu0 %1644 }
 0x37f   : > { %v1651_v33 = vsel %vm1018_vm7, %v1637_v36, %v1645_v40  ;;  %v1655_v12 = vsel %vm1018_vm7, %v1645_v40, %v1637_v36 }
 0x380   : > { %v1669_v17 = vmul.f32 %v1661_v20, %v1651_v33  ;;  %v1670_v14 = vmul.f32 %v1662_v41, %v1655_v12 }
 0x381   : > { %v1346_v43 = vpop.permute.xlu1 %1345  ;;  %v4617_v23 = vpop.permute.xlu2 %1646 }
 0x382   : > { %v4619_v29 = vadd.f32 %v1669_v17, %v1628_v51  ;;  %v4621_v50 = vadd.f32 %v1670_v14, %v1629_v58 }
 0x386   : > { %v1354_v31 = vpop.permute.xlu0 %1353 }
 0x387   : > { %v1359_v11 = vsel %vm719_vm1, %v1346_v43, %v1354_v31  ;;  %v1363_v39 = vsel %vm719_vm1, %v1354_v31, %v1346_v43 }
 0x388   : > { %v1377_v35 = vmul.f32 %v1369_v3, %v1363_v39  ;;  %v1378_v7 = vmul.f32 %v1370_v0, %v1359_v11 }
 0x389   : > { %v1402_v30 = vpop.permute.xlu1 %1401  ;;  %v4629_v27 = vpop.permute.xlu2 %1687 }
 0x38a   : > { %v1407_v42 = vsel %vm768_vm2, %v4573_v38, %v1402_v30  ;;  %v1411_v28 = vsel %vm768_vm2, %v1402_v30, %v4573_v38  ;;  %v1385_v10 = vadd.f32 %v1377_v35, %v1337_v63  ;;  %v1386_v24 = vadd.f32 %v1378_v7, %v1338_v6  ;;  %v1516_v38 = vld [vmem:[#allocation7 + $0xe0] sm:$0xff]  ;;  %v1615_v30 = vld [vmem:[#allocation7 + $0x1a8] sm:$0xff] }
 0x38b   : > { %v1426_v49 = vmul.f32 %v1418_v22, %v1411_v28  ;;  %v1427_v44 = vmul.f32 %v1419_v45, %v1407_v42  ;;  %v1565_v22 = vld [vmem:[#allocation7 + $0x160] sm:$0xff]  ;;  %v1566_v45 = vld [vmem:[#allocation7 + $0x168] sm:$0xff] }
 0x38c   : > { %v1614_v7 = vld [vmem:[#allocation7 + $0x1a0] sm:$0xff] }
 0x38d   : > { %v1434_v15 = vadd.f32 %v1426_v49, %v1385_v10  ;;  %v1435_v48 = vadd.f32 %v1427_v44, %v1386_v24  ;;  %v1663_v49 = vld [vmem:[#allocation7 + $0x1e0] sm:$0xff]  ;;  %v1664_v44 = vld [vmem:[#allocation7 + $0x1e8] sm:$0xff] }
 0x38e   : > { %v1451_v59 = vpop.permute.xlu0 %1450 }
 0x391   : > { %v1443_v34 = vpop.permute.xlu1 %1442  ;;  %v1348_v55 = vpop.permute.xlu2 %1347 }
 0x392   : > { %v1456_v56 = vsel %vm818_vm3, %v1443_v34, %v1451_v59  ;;  %v1460_v52 = vsel %vm818_vm3, %v1451_v59, %v1443_v34 }
 0x393   : > { %v1475_v4 = vmul.f32 %v1467_v9, %v1460_v52  ;;  %v1476_v36 = vmul.f32 %v1468_v47, %v1456_v56  ;;  %v1371_v9 = vld [vmem:[#allocation7 + $0x30] sm:$0xff]  ;;  %v1372_v47 = vld [vmem:[#allocation7 + $0x38] sm:$0xff] }
 0x395   : > { %v1483_v51 = vadd.f32 %v1475_v4, %v1434_v15  ;;  %v1484_v58 = vadd.f32 %v1476_v36, %v1435_v48 }
 0x396   : > { %v1492_v5 = vpop.permute.xlu0 %1491 }
 0x397   : > { %v1505_v26 = vsel %vm868_vm4, %v1492_v5, %v4588_v16  ;;  %v1509_v53 = vsel %vm868_vm4, %v4588_v16, %v1492_v5 }
 0x398   : > { %v1524_v20 = vmul.f32 %v1516_v38, %v1509_v53  ;;  %v1525_v41 = vmul.f32 %v1517_v13, %v1505_v26  ;;  %v1331_v26 = vld [vmem:[#allocation7 + $0x130] sm:$0xff]  ;;  %v1332_v53 = vld [vmem:[#allocation7 + $0x138] sm:$0xff] }
 0x399   : > { %v1549_v40 = vpop.permute.xlu1 %1548  ;;  %v1404_v33 = vpop.permute.xlu2 %1403 }
 0x39a   : > { %v1532_v12 = vadd.f32 %v1524_v20, %v1483_v51  ;;  %v1533_v17 = vadd.f32 %v1525_v41, %v1484_v58  ;;  %v1554_v63 = vsel %vm918_vm5, %v4611_v57, %v1549_v40  ;;  %v1558_v6 = vsel %vm918_vm5, %v1549_v40, %v4611_v57  ;;  %v1712_v40 = vld [vmem:[#allocation7 + $0x220] sm:$0xff] }
 0x39b   : > { %v1573_v10 = vmul.f32 %v1565_v22, %v1554_v63  ;;  %v1574_v24 = vmul.f32 %v1566_v45, %v1558_v6  ;;  %v1420_v22 = vld [vmem:[#allocation7 + $0x70] sm:$0xff]  ;;  %v1421_v45 = vld [vmem:[#allocation7 + $0x78] sm:$0xff] }
 0x39d   : > { %v1581_v36 = vadd.f32 %v1573_v10, %v1532_v12  ;;  %v1582_v38 = vadd.f32 %v1574_v24, %v1533_v17  ;;  %v1339_v12 = vmul.f32 %v1331_v26, %v4475_v60  ;;  %v1340_v17 = vmul.f32 %v1332_v53, %v4487_v2 }
 0x39e   : > { %v1598_v14 = vpop.permute.xlu0 %1597 }
 0x3a1   : > { %v1590_v43 = vpop.permute.xlu1 %1589  ;;  %v1445_v46 = vpop.permute.xlu2 %1444 }
 0x3a2   : > { %v1603_v42 = vsel %vm968_vm6, %v1590_v43, %v1598_v14  ;;  %v1607_v28 = vsel %vm968_vm6, %v1598_v14, %v1590_v43  ;;  %v1713_v14 = vld [vmem:[#allocation7 + $0x228] sm:$0xff] }
 0x3a3   : > { %v1622_v59 = vmul.f32 %v1614_v7, %v1603_v42  ;;  %v1623_v34 = vmul.f32 %v1615_v30, %v1607_v28  ;;  %v1469_v42 = vld [vmem:[#allocation7 + $0xb0] sm:$0xff]  ;;  %v1470_v28 = vld [vmem:[#allocation7 + $0xb8] sm:$0xff] }
 0x3a5   : > { %v1630_v58 = vadd.f32 %v1622_v59, %v1581_v36  ;;  %v1631_v20 = vadd.f32 %v1623_v34, %v1582_v38 }
 0x3a6   : > { %v1639_v1 = vpop.permute.xlu0 %1638 }
 0x3a7   : > { %v1652_v15 = vsel %vm1018_vm7, %v1639_v1, %v4617_v23  ;;  %v1656_v57 = vsel %vm1018_vm7, %v4617_v23, %v1639_v1 }
 0x3a8   : > { %v1671_v13 = vmul.f32 %v1663_v49, %v1652_v15  ;;  %v1672_v5 = vmul.f32 %v1664_v44, %v1656_v57  ;;  %v1518_v15 = vld [vmem:[#allocation7 + $0xf0] sm:$0xff]  ;;  %v1519_v57 = vld [vmem:[#allocation7 + $0xf8] sm:$0xff] }
 0x3a9   : > { %v1696_v3 = vpop.permute.xlu1 %1695  ;;  %v4647_v0 = vpop.permute.xlu2 %1550 }
 0x3aa   : > { %v1701_v43 = vsel %vm1068_vm8, %v4629_v27, %v1696_v3  ;;  %v1679_v1 = vadd.f32 %v1671_v13, %v1630_v58  ;;  %v1568_v58 = vld [vmem:[#allocation7 + $0x178] sm:$0xff] }
 0x3ab   : > { %v1720_v10 = vmul.f32 %v1712_v40, %v1701_v43  ;;  %v1617_v40 = vld [vmem:[#allocation7 + $0x1b8] sm:$0xff] }
 0x3ae   : > { %v1396_v31 = vpop.permute.xlu0 %1395 }
 0x3af   : > { %v1408_v63 = vsel %vm768_vm2, %v1396_v31, %v1404_v33  ;;  %v1412_v6 = vsel %vm768_vm2, %v1404_v33, %v1396_v31 }
 0x3b0   : > { %v1428_v49 = vmul.f32 %v1420_v22, %v1412_v6  ;;  %v1429_v44 = vmul.f32 %v1421_v45, %v1408_v63  ;;  %v1665_v63 = vld [vmem:[#allocation7 + $0x1f0] sm:$0xff]  ;;  %v1666_v6 = vld [vmem:[#allocation7 + $0x1f8] sm:$0xff] }
 0x3b1   : > { %v1356_v11 = vpop.permute.xlu1 %1355  ;;  %v4649_v39 = vpop.permute.xlu2 %1591 }
 0x3b2   : > { %v1360_v56 = vsel %vm719_vm1, %v1348_v55, %v1356_v11  ;;  %v1364_v52 = vsel %vm719_vm1, %v1356_v11, %v1348_v55  ;;  %v1705_v55 = vsel %vm1068_vm8, %v1696_v3, %v4629_v27  ;;  %v1680_v11 = vadd.f32 %v1672_v5, %v1631_v20 }
 0x3b3   : > { %v1379_v23 = vmul.f32 %v1371_v9, %v1364_v52  ;;  %v1380_v51 = vmul.f32 %v1372_v47, %v1360_v56  ;;  %v1721_v24 = vmul.f32 %v1713_v14, %v1705_v55  ;;  %v1728_v56 = vadd.f32 %v1720_v10, %v1679_v1  ;;  %v1714_v10 = vld [vmem:[#allocation7 + $0x230] sm:$0xff] }
 0x3b5   : > { %v1387_v7 = vadd.f32 %v1379_v23, %v1339_v12  ;;  %v1388_v30 = vadd.f32 %v1380_v51, %v1340_v17  ;;  %v1729_v52 = vadd.f32 %v1721_v24, %v1680_v11  ;;  %v1567_v51 = vld [vmem:[#allocation7 + $0x170] sm:$0xff]  ;;  %v1715_v24 = vld [vmem:[#allocation7 + $0x238] sm:$0xff] }
 0x3b6   : > { %v1502_v16 = vpop.permute.xlu0 %1501 }
 0x3b7   : > { %v1436_v36 = vadd.f32 %v1428_v49, %v1387_v7 }
 0x3b9   : > { %v1453_v35 = vpop.permute.xlu1 %1452  ;;  %v4667_v48 = vpop.permute.xlu2 %1697 }
 0x3ba   : > { %v1457_v27 = vsel %vm818_vm3, %v1445_v46, %v1453_v35  ;;  %v1461_v3 = vsel %vm818_vm3, %v1453_v35, %v1445_v46  ;;  %v1437_v46 = vadd.f32 %v1429_v44, %v1388_v30 }
 0x3bb   : > { %v1477_v9 = vmul.f32 %v1469_v42, %v1461_v3  ;;  %v1478_v47 = vmul.f32 %v1470_v28, %v1457_v27 }
 0x3bd   : > { %v1485_v53 = vadd.f32 %v1477_v9, %v1436_v36  ;;  %v1486_v23 = vadd.f32 %v1478_v47, %v1437_v46  ;;  %v1710_v46 = vld [vmem:[#allocation7 + $0x210] sm:$0xff] }
 0x3be   : > { %v1543_v4 = vpop.permute.xlu0 %1542 }
 0x3bf   : > { %v1559_v20 = vsel %vm918_vm5, %v4647_v0, %v1543_v4 }
 0x3c0   : > { %v1576_v45 = vmul.f32 %v1568_v58, %v1559_v20 }
 0x3c1   : > { %v1494_v41 = vpop.permute.xlu1 %1493  ;;  %v1749_v31 = vpop.permute.xlu2 %1748 }
 0x3c2   : > { %v1506_v59 = vsel %vm868_vm4, %v1494_v41, %v1502_v16  ;;  %v1510_v33 = vsel %vm868_vm4, %v1502_v16, %v1494_v41  ;;  %v4693_v13 = vadd.f32 %v1749_v31, %v1728_v56  ;;  %v4695_v5 = vadd.f32 %v1749_v31, %v1729_v52  ;;  %v1616_v41 = vld [vmem:[#allocation7 + $0x1b0] sm:$0xff] }
 0x3c3   : > { %v1526_v35 = vmul.f32 %v1518_v15, %v1510_v33  ;;  %v1527_v38 = vmul.f32 %v1519_v57, %v1506_v59  ;;  %v1555_v16 = vsel %vm918_vm5, %v1543_v4, %v4647_v0 }
 0x3c4   : > { %v1768_v17 = vsub.f32 0.0, %v4693_v13  ;;  %v1769_v1 = vsub.f32 0.0, %v4695_v5  ;;  %v1575_v22 = vmul.f32 %v1567_v51, %v1555_v16 }
 0x3c5   : > { %v1534_v55 = vadd.f32 %v1526_v35, %v1485_v53  ;;  %v1535_v12 = vadd.f32 %v1527_v38, %v1486_v23  ;;  %v1711_v35 = vld [vmem:[#allocation7 + $0x218] sm:$0xff] }
 0x3c6   : > { %v1649_v34 = vpop.permute.xlu0 %1648  ;;  %v1780_v7 = vmul.f32 1.442695, %v1768_v17  ;;  %v1782_v30 = vmul.f32 1.442695, %v1769_v1 }
 0x3c7   : > { %v1583_v42 = vadd.f32 %v1575_v22, %v1534_v55  ;;  %v1584_v28 = vadd.f32 %v1576_v45, %v1535_v12 }
 0x3c8   : > { %3122 = vpow2.f32 %v1780_v7 }
 0x3c9   : > { %v1600_v26 = vpop.permute.xlu1 %1599  ;;  %3124 = vpow2.f32 %v1782_v30  ;;  %v1744_v17 = vpop.permute.xlu2 %1743 }
 0x3ca   : > { %v1604_v14 = vsel %vm968_vm6, %v4649_v39, %v1600_v26  ;;  %v1608_v43 = vsel %vm968_vm6, %v1600_v26, %v4649_v39 }
 0x3cb   : > { %v1624_v0 = vmul.f32 %v1616_v41, %v1604_v14  ;;  %v1625_v4 = vmul.f32 %v1617_v40, %v1608_v43 }
 0x3cd   : > { %v1632_v15 = vadd.f32 %v1624_v0, %v1583_v42  ;;  %v1633_v57 = vadd.f32 %v1625_v4, %v1584_v28 }
 0x3ce   : > { %v1690_v11 = vpop.permute.xlu0 %1689  ;;  %v3123_v41 = vpop.eup %3122 }
 0x3cf   : > { %v1702_v49 = vsel %vm1068_vm8, %v1690_v11, %v4667_v48  ;;  %v1706_v44 = vsel %vm1068_vm8, %v4667_v48, %v1690_v11  ;;  %v3125_v40 = vpop.eup %3124  ;;  %v1792_v1 = vadd.f32 1.0, %v3123_v41 }
 0x3d0   : > { %v1722_v47 = vmul.f32 %v1714_v10, %v1702_v49  ;;  %v1723_v56 = vmul.f32 %v1715_v24, %v1706_v44  ;;  %v1793_v45 = vadd.f32 1.0, %v3125_v40 }
 0x3d1   : > { %v1641_v27 = vpop.permute.xlu1 %1640 }
 0x3d2   : > { %v1653_v39 = vsel %vm1018_vm7, %v1641_v27, %v1649_v34  ;;  %v1657_v3 = vsel %vm1018_vm7, %v1649_v34, %v1641_v27 }
 0x3d3   : > { %v1673_v59 = vmul.f32 %v1665_v63, %v1653_v39  ;;  %v1674_v33 = vmul.f32 %v1666_v6, %v1657_v3 }
 0x3d5   : > { %v1681_v31 = vadd.f32 %v1673_v59, %v1632_v15  ;;  %v1682_v9 = vadd.f32 %v1674_v33, %v1633_v57 }
 0x3d6   : > { %v1754_v34 = vpop.permute.xlu0 %1753 }
 0x3d7   : > { %v1730_v52 = vadd.f32 %v1722_v47, %v1681_v31  ;;  %v1731_v36 = vadd.f32 %v1723_v56, %v1682_v9 }
 0x3d9   : > { %v1694_v38 = vpop.permute.xlu1 %1693  ;;  %v1762_v26 = vadd.f32 %v1754_v34, %v1730_v52  ;;  %v1763_v53 = vadd.f32 %v1754_v34, %v1731_v36 }
 0x3da   : > { %v1700_v48 = vsel %vm1068_vm8, %v4551_v19, %v1694_v38  ;;  %v1704_v23 = vsel %vm1068_vm8, %v1694_v38, %v4551_v19 }
 0x3db   : > { %v1718_v51 = vmul.f32 %v1710_v46, %v1700_v48  ;;  %v1719_v58 = vmul.f32 %v1711_v35, %v1704_v23  ;;  %v1770_v16 = vsub.f32 0.0, %v1762_v26  ;;  %v1771_v20 = vsub.f32 0.0, %v1763_v53 }
 0x3dd   : > { %v1726_v14 = vadd.f32 %v1718_v51, %v4619_v29  ;;  %v1727_v43 = vadd.f32 %v1719_v58, %v4621_v50  ;;  %v1784_v55 = vmul.f32 1.442695, %v1770_v16  ;;  %v1786_v12 = vmul.f32 1.442695, %v1771_v20 }
 0x3df   : > { %v1758_v11 = vadd.f32 %v1744_v17, %v1726_v14  ;;  %v1759_v22 = vadd.f32 %v1744_v17, %v1727_v43  ;;  %3126 = vpow2.f32 %v1784_v55  ;;  %v2927_v43 = vld [vmem:[%s5235_s9] sm:$0xff] }
 0x3e0   : > { %3128 = vpow2.f32 %v1786_v12 }
 0x3e1   : > { %v1766_v19 = vsub.f32 0.0, %v1758_v11  ;;  %v1767_v0 = vsub.f32 0.0, %v1759_v22  ;;  %v1739_v4 = vpop.permute.xlu1 %1738  ;;  %3130 = vrcp.f32 %v1792_v1 }
 0x3e2   : > { %v1756_v63 = vadd.f32 %v1739_v4, %v4537_v32  ;;  %v1757_v6 = vadd.f32 %v1739_v4, %v4539_v62  ;;  %3132 = vrcp.f32 %v1793_v45 }
 0x3e3   : > { %v1776_v29 = vmul.f32 1.442695, %v1766_v19  ;;  %v1778_v7 = vmul.f32 1.442695, %v1767_v0 }
 0x3e4   : > { %v1764_v50 = vsub.f32 0.0, %v1756_v63  ;;  %v1765_v30 = vsub.f32 0.0, %v1757_v6 }
 0x3e5   : > { %v3127_v42 = vpop.eup %3126  ;;  %3134 = vpow2.f32 %v1776_v29 }
 0x3e6   : > { %v3129_v28 = vpop.eup %3128  ;;  %3136 = vpow2.f32 %v1778_v7  ;;  %v1794_v27 = vadd.f32 1.0, %v3127_v42  ;;  %v1772_v39 = vmul.f32 1.442695, %v1764_v50  ;;  %v1774_v10 = vmul.f32 1.442695, %v1765_v30 }
 0x3e7   : > { %v1795_v3 = vadd.f32 1.0, %v3129_v28  ;;  %v3131_v24 = vpop.eup %3130 }
 0x3e8   : > { %3138 = vrcp.f32 %v1794_v27  ;;  %v3133_v32 = vpop.eup %3132  ;;  %v1808_v15 = vmul.f32 %v3131_v24, %v4693_v13 }
 0x3e9   : > { %3140 = vrcp.f32 %v1795_v3  ;;  %v1809_v33 = vmul.f32 %v3133_v32, %v4695_v5 }
 0x3ea   : > { %3142 = vpow2.f32 %v1772_v39  ;;  %v1816_v36 = vadd.f32 %v1808_v15, %v4431_v21 }
 0x3eb   : > { %v3135_v62 = vpop.eup %3134  ;;  %3144 = vpow2.f32 %v1774_v10  ;;  %v1817_v38 = vadd.f32 %v1809_v33, %v4437_v25 }
 0x3ec   : > { %v3137_v49 = vpop.eup %3136  ;;  %v1790_v44 = vadd.f32 1.0, %v3135_v62 }
 0x3ed   : > { %v1791_v57 = vadd.f32 1.0, %v3137_v49 }
 0x3ee   : > { %v3139_v59 = vpop.eup %3138  ;;  %3146 = vrcp.f32 %v1790_v44 }
 0x3ef   : > { %v3141_v31 = vpop.eup %3140  ;;  %v1810_v9 = vmul.f32 %v3139_v59, %v1762_v26  ;;  %3148 = vrcp.f32 %v1791_v57 }
 0x3f0   : > { %v3143_v47 = vpop.eup %3142  ;;  %v1811_v56 = vmul.f32 %v3141_v31, %v1763_v53 }
 0x3f1   : > { %v3145_v34 = vpop.eup %3144  ;;  %v1788_v52 = vadd.f32 1.0, %v3143_v47  ;;  %v1818_v46 = vadd.f32 %v1810_v9, %v4475_v60 }
 0x3f2   : > { %v1789_v35 = vadd.f32 1.0, %v3145_v34  ;;  %v1819_v13 = vadd.f32 %v1811_v56, %v4487_v2 }
 0x3f3   : > { %3150 = vrcp.f32 %v1788_v52  ;;  %v1826_v48 = vpack.c.bf16 %v1818_v46, %v1816_v36 }
 0x3f4   : > { %3152 = vrcp.f32 %v1789_v35  ;;  %v1827_v5 = vpack.c.bf16 %v1819_v13, %v1817_v38  ;;  %v3147_v23 = vpop.eup %3146 }
 0x3f5   : > { %1874 = vmatpush.bf16.msrb.mxu0 %v1826_v48  ;;  %v3149_v26 = vpop.eup %3148  ;;  %v1806_v53 = vmul.f32 %v3147_v23, %v1758_v11 }
 0x3f6   : > { %1893 = vmatpush.bf16.msrb.mxu1 %v1827_v5  ;;  %v1807_v58 = vmul.f32 %v3149_v26, %v1759_v22 }
 0x3f7   : > { %v1814_v25 = vadd.f32 %v1806_v53, %v4397_v61 }
 0x3f8   : > { %v1815_v41 = vadd.f32 %v1807_v58, %v4399_v8  ;;  %v1850_v58 = vpop.permute.xlu1 %1849 }
 0x3f9   : > { %v3151_v51 = vpop.eup %3150 }
 0x3fa   : > { %v3153_v16 = vpop.eup %3152  ;;  %v1804_v21 = vmul.f32 %v3151_v51, %v1756_v63  ;;  %v1845_v63 = vpop.permute.xlu0 %1844 }
 0x3fb   : > { %v1805_v20 = vmul.f32 %v3153_v16, %v1757_v6 }
 0x3fc   : > { %v1812_v60 = vadd.f32 %v1804_v21, %v4361_v37  ;;  %v2928_v37 = vld [vmem:[%s5235_s9 + $0x8] sm:$0xff] }
 0x3fd   : > { %v1813_v2 = vadd.f32 %v1805_v20, %v4365_v54  ;;  %v1835_v54 = vpop.permute.xlu2 %1834 }
 0x3fe   : > { %v1824_v40 = vpack.c.bf16 %v1814_v25, %v1812_v60 }
 0x3ff   : > { %v1825_v14 = vpack.c.bf16 %v1815_v41, %v1813_v2 }
 0x400   : > { %1875 = vmatpush.bf16.msrb.mxu0 %v1824_v40 }
 0x401   : > { %1894 = vmatpush.bf16.msrb.mxu1 %v1825_v14 }
 0x402   : > { %v1840_v28 = vpop.permute.xlu0 %1839 }
 0x403   : > { %2901 = vmatmul.msk.bf16.vlgmr.msrb.gmra.mxu0 %vm591_vm0, %v2927_v43 }
 0x404   : > { %2903 = vmatmul.msk.bf16.vlgmr.msrb.gmra.mxu1 %vm591_vm0, %v2927_v43 }
 0x413   : > { %2902 = vmatmul.msk.bf16.gmra.mxu0 %vm591_vm0, %v2928_v37 }
 0x414   : > { %2904 = vmatmul.msk.bf16.gmra.mxu1 %vm591_vm0, %v2928_v37 }
 0x480   : > { %v1877_v61 = vpop.f32.mrf.mxu0 }
 0x481   : > { %v1878_v8 = vadd.f32 %v1877_v61, %v1835_v54  ;;  %v1896_v55 = vpop.f32.mrf.mxu1 }
 0x482   : > { %v1897_v12 = vadd.f32 %v1896_v55, %v1835_v54  ;;  %v1955_v55 = vld [vmem:[#allocation8 + $0x100] sm:$0xff] }
 0x483   : > { %v1906_v17 = vsub.f32 0.0, %v1878_v8 }
 0x484   : > { %v1907_v1 = vsub.f32 0.0, %v1897_v12 }
 0x485   : > { %v1914_v11 = vmul.f32 1.442695, %v1906_v17 }
 0x486   : > { %v1916_v22 = vmul.f32 1.442695, %v1907_v1  ;;  %v1995_v1 = vld [vmem:[#allocation8] sm:$0xff] }
 0x487   : > { %3154 = vpow2.f32 %v1914_v11  ;;  %v1996_v11 = vld [vmem:[#allocation8 + $0x8] sm:$0xff] }
 0x488   : > { %3156 = vpow2.f32 %v1916_v22  ;;  %v1879_v30 = vpop.f32.mrf.mxu0 }
 0x489   : > { %v1898_v42 = vpop.f32.mrf.mxu1  ;;  %v1880_v27 = vadd.f32 %v1879_v30, %v1840_v28 }
 0x48a   : > { %v1899_v39 = vadd.f32 %v1898_v42, %v1840_v28 }
 0x48b   : > { %v1908_v3 = vsub.f32 0.0, %v1880_v27 }
 0x48c   : > { %v1909_v10 = vsub.f32 0.0, %v1899_v39 }
 0x48d   : > { %v3155_v45 = vpop.eup %3154  ;;  %v1918_v24 = vmul.f32 1.442695, %v1908_v3 }
 0x48e   : > { %v3157_v19 = vpop.eup %3156  ;;  %v1930_v0 = vadd.f32 1.0, %v3155_v45  ;;  %v1920_v32 = vmul.f32 1.442695, %v1909_v10  ;;  %v2044_v45 = vld [vmem:[#allocation8 + $0x40] sm:$0xff] }
 0x48f   : > { %v1931_v4 = vadd.f32 1.0, %v3157_v19  ;;  %v2045_v19 = vld [vmem:[#allocation8 + $0x48] sm:$0xff] }
 0x490   : > { %3158 = vrcp.f32 %v1930_v0  ;;  %v1882_v9 = vpop.f32.mrf.mxu0 }
 0x491   : > { %3160 = vrcp.f32 %v1931_v4  ;;  %v1883_v47 = vadd.f32 %v1882_v9, %v1845_v63  ;;  %v1901_v34 = vpop.f32.mrf.mxu1 }
 0x492   : > { %3162 = vpow2.f32 %v1918_v24  ;;  %v1902_v52 = vadd.f32 %v1901_v34, %v1845_v63 }
 0x493   : > { %3164 = vpow2.f32 %v1920_v32  ;;  %v1910_v56 = vsub.f32 0.0, %v1883_v47 }
 0x494   : > { %v1911_v46 = vsub.f32 0.0, %v1902_v52 }
 0x495   : > { %v1922_v36 = vmul.f32 1.442695, %v1910_v56 }
 0x496   : > { %v3159_v6 = vpop.eup %3158  ;;  %v1924_v35 = vmul.f32 1.442695, %v1911_v46 }
 0x497   : > { %v3161_v29 = vpop.eup %3160  ;;  %v4751_v7 = vmul.f32 %v3159_v6, %v1878_v8 }
 0x498   : > { %v4753_v50 = vmul.f32 %v3161_v29, %v1897_v12  ;;  %v3163_v62 = vpop.eup %3162  ;;  %v1884_v53 = vpop.f32.mrf.mxu0  ;;  %v1956_v12 = vld [vmem:[#allocation8 + $0x108] sm:$0xff] }
 0x499   : > { %1971 = vrot.lane.b32.xlu0 %v4751_v7, %s3493_s15  ;;  %v3165_v49 = vpop.eup %3164  ;;  %v1932_v44 = vadd.f32 1.0, %v3163_v62  ;;  %v1885_v16 = vadd.f32 %v1884_v53, %v1850_v58  ;;  %v1903_v60 = vpop.f32.mrf.mxu1  ;;  %v1963_v6 = vmul.f32 %v1955_v55, %v4751_v7 }
 0x49a   : > { %2027 = vrot.lane.b32.xlu1 %v4753_v50, %s3494_s16  ;;  %1979 = vrot.lane.b32.xlu2 %v4753_v50, %s3493_s15  ;;  %v1933_v15 = vadd.f32 1.0, %v3165_v49  ;;  %v1904_v2 = vadd.f32 %v1903_v60, %v1850_v58  ;;  %v1964_v63 = vmul.f32 %v1956_v12, %v4753_v50  ;;  %v2192_v58 = vld [vmem:[#allocation8 + $0x148] sm:$0xff] }
 0x49b   : > { %3166 = vrcp.f32 %v1932_v44  ;;  %v1912_v20 = vsub.f32 0.0, %v1885_v16 }
 0x49c   : > { %3168 = vrcp.f32 %v1933_v15  ;;  %v1913_v40 = vsub.f32 0.0, %v1904_v2 }
 0x49d   : > { %3170 = vpow2.f32 %v1922_v36  ;;  %v1926_v41 = vmul.f32 1.442695, %v1912_v20 }
 0x49e   : > { %3172 = vpow2.f32 %v1924_v35  ;;  %v1928_v43 = vmul.f32 1.442695, %v1913_v40 }
 0x4a1   : > { %2076 = vrot.lane.b32.xlu0 %v4753_v50, %s3495_s19  ;;  %v3167_v57 = vpop.eup %3166 }
 0x4a2   : > { %2068 = vrot.lane.b32.xlu1 %v4751_v7, %s3495_s19  ;;  %2019 = vrot.lane.b32.xlu2 %v4751_v7, %s3494_s16  ;;  %v3169_v59 = vpop.eup %3168  ;;  %v4785_v33 = vmul.f32 %v3167_v57, %v1880_v27  ;;  %v2093_v57 = vld [vmem:[#allocation8 + $0x80] sm:$0xff] }
 0x4a3   : > { %v4787_v31 = vmul.f32 %v3169_v59, %v1899_v39  ;;  %v3171_v38 = vpop.eup %3170  ;;  %v2094_v59 = vld [vmem:[#allocation8 + $0x88] sm:$0xff] }
 0x4a4   : > { %v1934_v13 = vadd.f32 1.0, %v3171_v38  ;;  %v3173_v48 = vpop.eup %3172 }
 0x4a5   : > { %v1935_v5 = vadd.f32 1.0, %v3173_v48 }
 0x4a6   : > { %3174 = vrcp.f32 %v1934_v13 }
 0x4a7   : > { %3176 = vrcp.f32 %v1935_v5  ;;  %v2142_v5 = vld [vmem:[#allocation8 + $0xc0] sm:$0xff] }
 0x4a8   : > { %3178 = vpow2.f32 %v1926_v41 }
 0x4a9   : > { %2117 = vrot.lane.b32.xlu0 %v4751_v7, %s3496_s24  ;;  %3180 = vpow2.f32 %v1928_v43 }
 0x4aa   : > { %2174 = vrot.lane.b32.xlu1 %v4753_v50, %s3497_s25  ;;  %2125 = vrot.lane.b32.xlu2 %v4753_v50, %s3496_s24 }
 0x4ac   : > { %v3175_v23 = vpop.eup %3174 }
 0x4ad   : > { %v4819_v26 = vmul.f32 %v3175_v23, %v1883_v47  ;;  %v3177_v51 = vpop.eup %3176  ;;  %v2143_v23 = vld [vmem:[#allocation8 + $0xc8] sm:$0xff] }
 0x4ae   : > { %v4827_v21 = vmul.f32 %v3177_v51, %v1902_v52  ;;  %v3179_v37 = vpop.eup %3178  ;;  %v2191_v51 = vld [vmem:[#allocation8 + $0x140] sm:$0xff] }
 0x4af   : > { %v1936_v54 = vadd.f32 1.0, %v3179_v37  ;;  %v3181_v8 = vpop.eup %3180 }
 0x4b0   : > { %v1937_v17 = vadd.f32 1.0, %v3181_v8 }
 0x4b1   : > { %2223 = vrot.lane.b32.xlu0 %v4753_v50, %s3498_s20  ;;  %3182 = vrcp.f32 %v1936_v54 }
 0x4b2   : > { %2215 = vrot.lane.b32.xlu1 %v4751_v7, %s3498_s20  ;;  %2166 = vrot.lane.b32.xlu2 %v4751_v7, %s3497_s25  ;;  %3184 = vrcp.f32 %v1937_v17  ;;  %v2241_v17 = vld [vmem:[#allocation8 + $0x188] sm:$0xff] }
 0x4b7   : > { %v3183_v42 = vpop.eup %3182 }
 0x4b8   : > { %v4863_v49 = vmul.f32 %v3183_v42, %v1885_v16  ;;  %v3185_v47 = vpop.eup %3184 }
 0x4b9   : > { %2264 = vrot.lane.b32.xlu0 %v4751_v7, %s3499_s3  ;;  %v4875_v38 = vmul.f32 %v3185_v47, %v1904_v2 }
 0x4ba   : > { %2313 = vrot.lane.b32.xlu1 %v4751_v7, %s5317_s22  ;;  %2272 = vrot.lane.b32.xlu2 %v4753_v50, %s3499_s3 }
 0x4c1   : > { %2321 = vrot.lane.b32.xlu0 %v4753_v50, %s5317_s22 }
 0x4c2   : > { %1973 = vrot.lane.b32.xlu1 %v4785_v33, %s3493_s15  ;;  %2029 = vrot.lane.b32.xlu2 %v4787_v31, %s3494_s16 }
 0x4c9   : > { %1981 = vrot.lane.b32.xlu0 %v4787_v31, %s3493_s15 }
 0x4ca   : > { %2078 = vrot.lane.b32.xlu1 %v4787_v31, %s3495_s19  ;;  %2070 = vrot.lane.b32.xlu2 %v4785_v33, %s3495_s19 }
 0x4d1   : > { %2021 = vrot.lane.b32.xlu0 %v4785_v33, %s3494_s16 }
 0x4d2   : > { %2119 = vrot.lane.b32.xlu1 %v4785_v33, %s3496_s24  ;;  %2176 = vrot.lane.b32.xlu2 %v4787_v31, %s3497_s25 }
 0x4d9   : > { %2127 = vrot.lane.b32.xlu0 %v4787_v31, %s3496_s24 }
 0x4da   : > { %2225 = vrot.lane.b32.xlu1 %v4787_v31, %s3498_s20  ;;  %2217 = vrot.lane.b32.xlu2 %v4785_v33, %s3498_s20 }
 0x4e1   : > { %2168 = vrot.lane.b32.xlu0 %v4785_v33, %s3497_s25 }
 0x4e2   : > { %2266 = vrot.lane.b32.xlu1 %v4785_v33, %s3499_s3  ;;  %2315 = vrot.lane.b32.xlu2 %v4785_v33, %s5317_s22 }
 0x4e9   : > { %2274 = vrot.lane.b32.xlu0 %v4787_v31, %s3499_s3 }
 0x4ea   : > { %1975 = vrot.lane.b32.xlu1 %v4819_v26, %s3493_s15  ;;  %2023 = vrot.lane.b32.xlu2 %v4819_v26, %s3494_s16 }
 0x4f1   : > { %1983 = vrot.lane.b32.xlu0 %v4827_v21, %s3493_s15 }
 0x4f2   : > { %2031 = vrot.lane.b32.xlu1 %v4827_v21, %s3494_s16  ;;  %2129 = vrot.lane.b32.xlu2 %v4827_v21, %s3496_s24 }
 0x4f4   : > { %v1980_v25 = vpop.permute.xlu2 %1979 }
 0x4f9   : > { %2080 = vrot.lane.b32.xlu0 %v4827_v21, %s3495_s19 }
 0x4fa   : > { %2072 = vrot.lane.b32.xlu1 %v4819_v26, %s3495_s19  ;;  %2170 = vrot.lane.b32.xlu2 %v4819_v26, %s3497_s25 }
 0x4fc   : > { %v2020_v14 = vpop.permute.xlu2 %2019 }
 0x501   : > { %2121 = vrot.lane.b32.xlu0 %v4819_v26, %s3496_s24 }
 0x502   : > { %2178 = vrot.lane.b32.xlu1 %v4827_v21, %s3497_s25  ;;  %2276 = vrot.lane.b32.xlu2 %v4827_v21, %s3499_s3 }
 0x504   : > { %v2126_v61 = vpop.permute.xlu2 %2125 }
 0x509   : > { %2227 = vrot.lane.b32.xlu0 %v4827_v21, %s3498_s20 }
 0x50a   : > { %2219 = vrot.lane.b32.xlu1 %v4819_v26, %s3498_s20  ;;  %2317 = vrot.lane.b32.xlu2 %v4819_v26, %s5317_s22 }
 0x50b   : > { %v1972_v22 = vpop.permute.xlu0 %1971 }
 0x50c   : > { %v2028_v0 = vpop.permute.xlu1 %2027  ;;  %v2167_v4 = vpop.permute.xlu2 %2166  ;;  %v1987_v29 = vsel %vm719_vm1, %v1972_v22, %v1980_v25  ;;  %v1991_v30 = vsel %vm719_vm1, %v1980_v25, %v1972_v22 }
 0x50d   : > { %v2035_v28 = vsel %vm768_vm2, %v2020_v14, %v2028_v0  ;;  %v2039_v27 = vsel %vm768_vm2, %v2028_v0, %v2020_v14  ;;  %v2003_v39 = vmul.f32 %v1995_v1, %v1991_v30  ;;  %v2004_v3 = vmul.f32 %v1996_v11, %v1987_v29  ;;  %v2289_v29 = vld [vmem:[#allocation8 + $0x1c0] sm:$0xff]  ;;  %v2290_v30 = vld [vmem:[#allocation8 + $0x1c8] sm:$0xff] }
 0x50e   : > { %v2052_v10 = vmul.f32 %v2044_v45, %v2039_v27  ;;  %v2053_v24 = vmul.f32 %v2045_v19, %v2035_v28 }
 0x50f   : > { %v2011_v32 = vadd.f32 %v2003_v39, %v1963_v6  ;;  %v2012_v62 = vadd.f32 %v2004_v3, %v1964_v63 }
 0x511   : > { %2268 = vrot.lane.b32.xlu0 %v4819_v26, %s3499_s3  ;;  %v2061_v44 = vadd.f32 %v2053_v24, %v2012_v62  ;;  %v2060_v15 = vadd.f32 %v2052_v10, %v2011_v32 }
 0x512   : > { %2325 = vrot.lane.b32.xlu1 %v4827_v21, %s5317_s22  ;;  %1977 = vrot.lane.b32.xlu2 %v4863_v49, %s3493_s15 }
 0x513   : > { %v2077_v9 = vpop.permute.xlu0 %2076 }
 0x514   : > { %v2069_v56 = vpop.permute.xlu1 %2068  ;;  %v2273_v34 = vpop.permute.xlu2 %2272 }
 0x515   : > { %v2084_v52 = vsel %vm818_vm3, %v2069_v56, %v2077_v9  ;;  %v2088_v36 = vsel %vm818_vm3, %v2077_v9, %v2069_v56 }
 0x516   : > { %v2101_v46 = vmul.f32 %v2093_v57, %v2088_v36  ;;  %v2102_v35 = vmul.f32 %v2094_v59, %v2084_v52 }
 0x518   : > { %v2109_v13 = vadd.f32 %v2101_v46, %v2060_v15  ;;  %v2110_v48 = vadd.f32 %v2102_v35, %v2061_v44  ;;  %v2338_v44 = vld [vmem:[#allocation8 + $0x200] sm:$0xff]  ;;  %v2339_v15 = vld [vmem:[#allocation8 + $0x208] sm:$0xff] }
 0x519   : > { %2025 = vrot.lane.b32.xlu0 %v4863_v49, %s3494_s16 }
 0x51a   : > { %1985 = vrot.lane.b32.xlu1 %v4875_v38, %s3493_s15  ;;  %2033 = vrot.lane.b32.xlu2 %v4875_v38, %s3494_s16  ;;  %s5163_s15 = scalar_lea.vmem [#allocation10], %s5320_s18 }
 0x51b   : > { %v2118_v53 = vpop.permute.xlu0 %2117 }
 0x51c   : > { %v2175_v16 = vpop.permute.xlu1 %2174  ;;  %v4883_v20 = vpop.permute.xlu2 %2029  ;;  %v2133_v60 = vsel %vm868_vm4, %v2118_v53, %v2126_v61  ;;  %v2137_v25 = vsel %vm868_vm4, %v2126_v61, %v2118_v53  ;;  %v2240_v61 = vld [vmem:[#allocation8 + $0x180] sm:$0xff] }
 0x51d   : > { %v2182_v2 = vsel %vm918_vm5, %v2167_v4, %v2175_v16  ;;  %v2186_v41 = vsel %vm918_vm5, %v2175_v16, %v2167_v4  ;;  %v2150_v40 = vmul.f32 %v2142_v5, %v2137_v25  ;;  %v2151_v14 = vmul.f32 %v2143_v23, %v2133_v60  ;;  %v1998_v16 = vld [vmem:[#allocation8 + $0x18] sm:$0xff]  ;;  %v2364_v25 = vld [vmem:[%s5238_s12 + $0x10] sm:$0xff] }
 0x51e   : > { %v2199_v43 = vmul.f32 %v2191_v51, %v2182_v2  ;;  %v2200_v37 = vmul.f32 %v2192_v58, %v2186_v41  ;;  %v1997_v58 = vld [vmem:[#allocation8 + $0x10] sm:$0xff]  ;;  %v2365_v60 = vld [vmem:[%s5238_s12 + $0x18] sm:$0xff] }
 0x51f   : > { %v2158_v54 = vadd.f32 %v2150_v40, %v2109_v13  ;;  %v2159_v8 = vadd.f32 %v2151_v14, %v2110_v48  ;;  %v1957_v2 = vld [vmem:[#allocation8 + $0x110] sm:$0xff]  ;;  %v1958_v41 = vld [vmem:[#allocation8 + $0x118] sm:$0xff] }
 0x521   : > { %2131 = vrot.lane.b32.xlu0 %v4875_v38, %s3496_s24  ;;  %v2208_v55 = vadd.f32 %v2200_v37, %v2159_v8  ;;  %v2207_v12 = vadd.f32 %v2199_v43, %v2158_v54  ;;  %v2046_v43 = vld [vmem:[#allocation8 + $0x50] sm:$0xff]  ;;  %v2047_v37 = vld [vmem:[#allocation8 + $0x58] sm:$0xff]  ;;  %v1965_v54 = vmul.f32 %v1957_v2, %v4785_v33  ;;  %v1966_v8 = vmul.f32 %v1958_v41, %v4787_v31 }
 0x522   : > { %2082 = vrot.lane.b32.xlu1 %v4875_v38, %s3495_s19  ;;  %2074 = vrot.lane.b32.xlu2 %v4863_v49, %s3495_s19  ;;  %s2931_s19 = sshll.u32 %s3599_s17, 4  ;;  %s2749_s17 = sshll.u32 %s5163_s15, 4  ;;  %s2750_s17 = int_to_ptr.vmem [resolvable:$true] %s2749_s17 }
 0x523   : > { %v2224_v1 = vpop.permute.xlu0 %2223 }
 0x524   : > { %v2216_v11 = vpop.permute.xlu1 %2215  ;;  %v2071_v22 = vpop.permute.xlu2 %2070 }
 0x525   : > { %v2231_v45 = vsel %vm968_vm6, %v2216_v11, %v2224_v1  ;;  %v2235_v19 = vsel %vm968_vm6, %v2224_v1, %v2216_v11 }
 0x526   : > { %v2248_v0 = vmul.f32 %v2240_v61, %v2231_v45  ;;  %v2249_v4 = vmul.f32 %v2241_v17, %v2235_v19  ;;  %v2096_v61 = vld [vmem:[#allocation8 + $0x98] sm:$0xff] }
 0x528   : > { %v2256_v63 = vadd.f32 %v2248_v0, %v2207_v12  ;;  %v2257_v6 = vadd.f32 %v2249_v4, %v2208_v55  ;;  %v2095_v12 = vld [vmem:[#allocation8 + $0x90] sm:$0xff] }
 0x529   : > { %2172 = vrot.lane.b32.xlu0 %v4863_v49, %s3497_s25 }
 0x52a   : > { %2123 = vrot.lane.b32.xlu1 %v4863_v49, %s3496_s24  ;;  %2180 = vrot.lane.b32.xlu2 %v4875_v38, %s3497_s25 }
 0x52b   : > { %v2265_v42 = vpop.permute.xlu0 %2264 }
 0x52c   : > { %v2314_v28 = vpop.permute.xlu1 %2313  ;;  %v4909_v27 = vpop.permute.xlu2 %2176  ;;  %v2280_v39 = vsel %vm1018_vm7, %v2265_v42, %v2273_v34  ;;  %v2284_v3 = vsel %vm1018_vm7, %v2273_v34, %v2265_v42  ;;  %v2362_v42 = vld [vmem:[%s5238_s12] sm:$0xff] }
 0x52d   : > { %v2297_v10 = vmul.f32 %v2289_v29, %v2280_v39  ;;  %v2298_v24 = vmul.f32 %v2290_v30, %v2284_v3 }
 0x52f   : > { %v2305_v32 = vadd.f32 %v2297_v10, %v2256_v63  ;;  %v2306_v62 = vadd.f32 %v2298_v24, %v2257_v6  ;;  %v2145_v10 = vld [vmem:[#allocation8 + $0xd8] sm:$0xff] }
 0x531   : > { %2278 = vrot.lane.b32.xlu0 %v4875_v38, %s3499_s3 }
 0x532   : > { %2229 = vrot.lane.b32.xlu1 %v4875_v38, %s3498_s20  ;;  %2221 = vrot.lane.b32.xlu2 %v4863_v49, %s3498_s20  ;;  %s2748_s20 = scalar_lea.hbm %s5240_s14, %s2931_s19 }
 0x533   : > { %v2322_v57 = vpop.permute.xlu0 %2321 }
 0x534   : > { %v1974_v59 = vpop.permute.xlu1 %1973  ;;  %v2218_v9 = vpop.permute.xlu2 %2217  ;;  %v2329_v47 = vsel %vm1068_vm8, %v2314_v28, %v2322_v57  ;;  %v2333_v56 = vsel %vm1068_vm8, %v2322_v57, %v2314_v28  ;;  %v2363_v28 = vld [vmem:[%s5238_s12 + $0x8] sm:$0xff] }
 0x535   : > { %v2346_v34 = vmul.f32 %v2338_v44, %v2329_v47  ;;  %v2347_v52 = vmul.f32 %v2339_v15, %v2333_v56 }
 0x537   : > { %v4925_v36 = vadd.f32 %v2346_v34, %v2305_v32  ;;  %v4927_v46 = vadd.f32 %v2347_v52, %v2306_v62 }
 0x539   : > { %2319 = vrot.lane.b32.xlu0 %v4863_v49, %s5317_s22 }
 0x53a   : > { %2270 = vrot.lane.b32.xlu1 %v4863_v49, %s3499_s3  ;;  %2327 = vrot.lane.b32.xlu2 %v4875_v38, %s5317_s22  ;;  %s2751_s3 = sshll.u32 %s2748_s20, 4  ;;  %s2752_s3 = int_to_ptr.hbm [resolvable:$true] %s2751_s3 }
 0x53b   : > { %v1982_v35 = vpop.permute.xlu0 %1981  ;;  %s3424_s29 = sshra.s32 %s2752_s3, 4  ;;  %s3425_s29 = int_to_ptr.hbm [resolvable:$true] %s3424_s29 }
 0x53c   : > { %v2079_v13 = vpop.permute.xlu1 %2078  ;;  %v4935_v48 = vpop.permute.xlu2 %2315  ;;  %v1988_v5 = vsel %vm719_vm1, %v1974_v59, %v1982_v35  ;;  %v1992_v23 = vsel %vm719_vm1, %v1982_v35, %v1974_v59  ;;  %v2193_v35 = vld [vmem:[#allocation8 + $0x150] sm:$0xff]  ;;  %s3426_s27 = scalar_lea.hbm %s3425_s29, 64  ;;  %p3431_p11 = scmp.lt.s32.totalorder %s3425_s29, %s5240_s14 }
 0x53d   : > { %v2085_v53 = vsel %vm818_vm3, %v2071_v22, %v2079_v13  ;;  %v2089_v51 = vsel %vm818_vm3, %v2079_v13, %v2071_v22  ;;  %v2005_v40 = vmul.f32 %v1997_v58, %v1992_v23  ;;  %v2006_v14 = vmul.f32 %v1998_v16, %v1988_v5  ;;  %v2194_v13 = vld [vmem:[#allocation8 + $0x158] sm:$0xff]  ;;  %v2242_v23 = vld [vmem:[#allocation8 + $0x190] sm:$0xff]  ;;  %p3427_p1 = scmp.ne.s32.totalorder %s3425_s29, %s3426_s27  ;;  %p3432_p9 = scmp.lt.s32.totalorder %s3430_s23, %s3426_s27 }
 0x53e   : > { %v2103_v63 = vmul.f32 %v2095_v12, %v2089_v51  ;;  %v2104_v6 = vmul.f32 %v2096_v61, %v2085_v53  ;;  %v2243_v53 = vld [vmem:[#allocation8 + $0x198] sm:$0xff] }
 0x53f   : > { %v2013_v45 = vadd.f32 %v2005_v40, %v1965_v54  ;;  %v2014_v19 = vadd.f32 %v2006_v14, %v1966_v8  ;;  %v2291_v54 = vld [vmem:[#allocation8 + $0x1d0] sm:$0xff]  ;;  %v2292_v8 = vld [vmem:[#allocation8 + $0x1d8] sm:$0xff]  ;;  %p3428_p4 = pnand %p3427_p1, %p3670_p7  ;;  %p3433_p2 = por %p3432_p9, %p3431_p11 }
 0x541   : > { %2383 = vperm.xlu0 %3023, %v2365_v60   ;;  %p3429_p8 = pneg %p3428_p4 }
 0x542   : > { %2323 = vrot.lane.b32.xlu1 %v4787_v31, %s5317_s22  ;;  %2378 = vperm.xlu2 %3025, %v2364_v25   ;;  %s2737_s22 = scalar_lea.sflag [#allocation4], %s3700_s11 }
 0x543   : > { %v2022_v55 = vpop.permute.xlu0 %2021  ;;  %p3434_p10 = pnand %p3433_p2, %p3429_p8 }
 0x544   : > { %v2120_v17 = vpop.permute.xlu1 %2119  ;;  %v4955_v1 = vpop.permute.xlu2 %2023  ;;  %v2036_v11 = vsel %vm768_vm2, %v2022_v55, %v4883_v20  ;;  %v2040_v22 = vsel %vm768_vm2, %v4883_v20, %v2022_v55  ;;  %v2144_v20 = vld [vmem:[#allocation8 + $0xd0] sm:$0xff] }
 0x545   : > { %v2054_v0 = vmul.f32 %v2046_v43, %v2040_v22  ;;  %v2055_v4 = vmul.f32 %v2047_v37, %v2036_v11 }
 0x547   : > { %v2062_v29 = vadd.f32 %v2054_v0, %v2013_v45  ;;  %v2063_v30 = vadd.f32 %v2055_v4, %v2014_v19  ;;  %v1959_v0 = vld [vmem:[#allocation8 + $0x120] sm:$0xff]  ;;  %v1960_v4 = vld [vmem:[#allocation8 + $0x128] sm:$0xff] }
 0x549   : > { %v2111_v39 = vadd.f32 %v2103_v63, %v2062_v29  ;;  %v2112_v3 = vadd.f32 %v2104_v6, %v2063_v30  ;;  %v1999_v63 = vld [vmem:[#allocation8 + $0x20] sm:$0xff]  ;;  %v2000_v6 = vld [vmem:[#allocation8 + $0x28] sm:$0xff] }
 0x54a   : > { %2368 = vperm.xlu1 %3024, %v2362_v42   ;;  %2373 = vperm.xlu2 %3025, %v2363_v28   ;;  %v2048_v30 = vld [vmem:[#allocation8 + $0x60] sm:$0xff]  ;;  %v2049_v42 = vld [vmem:[#allocation8 + $0x68] sm:$0xff] }
 0x54b   : > { %v2128_v24 = vpop.permute.xlu0 %2127 }
 0x54c   : > { %v2226_v32 = vpop.permute.xlu1 %2225  ;;  %v4969_v62 = vpop.permute.xlu2 %2129  ;;  %v2134_v44 = vsel %vm868_vm4, %v2120_v17, %v2128_v24  ;;  %v2138_v15 = vsel %vm868_vm4, %v2128_v24, %v2120_v17 }
 0x54d   : > { %v2232_v57 = vsel %vm968_vm6, %v2218_v9, %v2226_v32  ;;  %v2236_v59 = vsel %vm968_vm6, %v2226_v32, %v2218_v9  ;;  %v2152_v47 = vmul.f32 %v2144_v20, %v2138_v15  ;;  %v2153_v56 = vmul.f32 %v2145_v10, %v2134_v44 }
 0x54e   : > { %v2250_v2 = vmul.f32 %v2242_v23, %v2232_v57  ;;  %v2251_v41 = vmul.f32 %v2243_v53, %v2236_v59  ;;  %v1968_v20 = vmul.f32 %v1960_v4, %v4827_v21  ;;  %v2097_v53 = vld [vmem:[#allocation8 + $0xa0] sm:$0xff] }
 0x54f   : > { %v2160_v34 = vadd.f32 %v2152_v47, %v2111_v39  ;;  %v2161_v52 = vadd.f32 %v2153_v56, %v2112_v3  ;;  %v1967_v3 = vmul.f32 %v1959_v0, %v4819_v26 }
 0x553   : > { %v2169_v5 = vpop.permute.xlu0 %2168 }
 0x554   : > { %v2267_v51 = vpop.permute.xlu1 %2266  ;;  %v4979_v58 = vpop.permute.xlu2 %2170  ;;  %v2183_v16 = vsel %vm918_vm5, %v2169_v5, %v4909_v27  ;;  %v2187_v9 = vsel %vm918_vm5, %v4909_v27, %v2169_v5 }
 0x555   : > { %v2201_v60 = vmul.f32 %v2193_v35, %v2183_v16  ;;  %v2202_v25 = vmul.f32 %v2194_v13, %v2187_v9 }
 0x557   : > { %v2209_v40 = vadd.f32 %v2201_v60, %v2160_v34  ;;  %v2210_v14 = vadd.f32 %v2202_v25, %v2161_v52  ;;  %v2146_v25 = vld [vmem:[#allocation8 + $0xe0] sm:$0xff] }
 0x559   : > { %v2258_v43 = vadd.f32 %v2250_v2, %v2209_v40  ;;  %v2259_v37 = vadd.f32 %v2251_v41, %v2210_v14  ;;  %v2147_v2 = vld [vmem:[#allocation8 + $0xe8] sm:$0xff] }
 0x55b   : > { %v2275_v55 = vpop.permute.xlu0 %2274 }
 0x55c   : > { %v1976_v12 = vpop.permute.xlu1 %1975  ;;  %v4987_v61 = vpop.permute.xlu2 %2276  ;;  %v2281_v17 = vsel %vm1018_vm7, %v2267_v51, %v2275_v55  ;;  %v2285_v27 = vsel %vm1018_vm7, %v2275_v55, %v2267_v51  ;;  %v2098_v51 = vld [vmem:[#allocation8 + $0xa8] sm:$0xff] }
 0x55d   : > { %v2299_v11 = vmul.f32 %v2291_v54, %v2281_v17  ;;  %v2300_v22 = vmul.f32 %v2292_v8, %v2285_v27 }
 0x55f   : > { %v4993_v45 = vadd.f32 %v2299_v11, %v2258_v43  ;;  %v4995_v19 = vadd.f32 %v2300_v22, %v2259_v37 }
 0x563   : > { %v1984_v29 = vpop.permute.xlu0 %1983 }
 0x564   : > { %v2032_v28 = vpop.permute.xlu1 %2031  ;;  %v4997_v39 = vpop.permute.xlu2 %2317  ;;  %v1989_v10 = vsel %vm719_vm1, %v1976_v12, %v1984_v29  ;;  %v1993_v24 = vsel %vm719_vm1, %v1984_v29, %v1976_v12 }
 0x565   : > { %v2037_v32 = vsel %vm768_vm2, %v4955_v1, %v2032_v28  ;;  %v2041_v44 = vsel %vm768_vm2, %v2032_v28, %v4955_v1  ;;  %v2007_v15 = vmul.f32 %v1999_v63, %v1993_v24  ;;  %v2008_v57 = vmul.f32 %v2000_v6, %v1989_v10 }
 0x566   : > { %v2056_v59 = vmul.f32 %v2048_v30, %v2041_v44  ;;  %v2057_v47 = vmul.f32 %v2049_v42, %v2037_v32  ;;  %v2244_v32 = vld [vmem:[#allocation8 + $0x1a0] sm:$0xff]  ;;  %v2245_v44 = vld [vmem:[#allocation8 + $0x1a8] sm:$0xff] }
 0x567   : > { %v2015_v56 = vadd.f32 %v2007_v15, %v1967_v3  ;;  %v2016_v34 = vadd.f32 %v2008_v57, %v1968_v20  ;;  %v2195_v3 = vld [vmem:[#allocation8 + $0x160] sm:$0xff] }
 0x569   : > { %v2064_v52 = vadd.f32 %v2056_v59, %v2015_v56  ;;  %v2065_v35 = vadd.f32 %v2057_v47, %v2016_v34  ;;  %v2293_v56 = vld [vmem:[#allocation8 + $0x1e0] sm:$0xff]  ;;  %v2294_v34 = vld [vmem:[#allocation8 + $0x1e8] sm:$0xff] }
 0x56b   : > { %v2081_v13 = vpop.permute.xlu0 %2080 }
 0x56c   : > { %v2073_v5 = vpop.permute.xlu1 %2072  ;;  %v1978_v23 = vpop.permute.xlu2 %1977 }
 0x56d   : > { %v2086_v16 = vsel %vm818_vm3, %v2073_v5, %v2081_v13  ;;  %v2090_v9 = vsel %vm818_vm3, %v2081_v13, %v2073_v5 }
 0x56e   : > { %v2105_v1 = vmul.f32 %v2097_v53, %v2090_v9  ;;  %v2106_v60 = vmul.f32 %v2098_v51, %v2086_v16  ;;  %v2001_v53 = vld [vmem:[#allocation8 + $0x30] sm:$0xff]  ;;  %v2002_v51 = vld [vmem:[#allocation8 + $0x38] sm:$0xff] }
 0x570   : > { %v2113_v54 = vadd.f32 %v2105_v1, %v2064_v52  ;;  %v2114_v8 = vadd.f32 %v2106_v60, %v2065_v35 }
 0x573   : > { %v2122_v41 = vpop.permute.xlu0 %2121 }
 0x574   : > { %v2179_v40 = vpop.permute.xlu1 %2178  ;;  %v5015_v14 = vpop.permute.xlu2 %2033  ;;  %v2135_v43 = vsel %vm868_vm4, %v2122_v41, %v4969_v62  ;;  %v2139_v37 = vsel %vm868_vm4, %v4969_v62, %v2122_v41  ;;  %v2196_v62 = vld [vmem:[#allocation8 + $0x168] sm:$0xff]  ;;  %v1961_v41 = vld [vmem:[#allocation8 + $0x130] sm:$0xff] }
 0x575   : > { %v2154_v55 = vmul.f32 %v2146_v25, %v2139_v37  ;;  %v2155_v12 = vmul.f32 %v2147_v2, %v2135_v43  ;;  %v2184_v20 = vsel %vm918_vm5, %v4979_v58, %v2179_v40  ;;  %v2188_v10 = vsel %vm918_vm5, %v2179_v40, %v4979_v58  ;;  %v1962_v40 = vld [vmem:[#allocation8 + $0x138] sm:$0xff] }
 0x576   : > { %v2203_v59 = vmul.f32 %v2195_v3, %v2184_v20  ;;  %v2204_v47 = vmul.f32 %v2196_v62, %v2188_v10  ;;  %v2050_v3 = vld [vmem:[#allocation8 + $0x70] sm:$0xff]  ;;  %v2051_v62 = vld [vmem:[#allocation8 + $0x78] sm:$0xff] }
 0x577   : > { %v2162_v17 = vadd.f32 %v2154_v55, %v2113_v54  ;;  %v2163_v27 = vadd.f32 %v2155_v12, %v2114_v8  ;;  %v2342_v12 = vld [vmem:[#allocation8 + $0x220] sm:$0xff] }
 0x579   : > { %v2211_v1 = vadd.f32 %v2203_v59, %v2162_v17  ;;  %v2212_v60 = vadd.f32 %v2204_v47, %v2163_v27  ;;  %v1969_v17 = vmul.f32 %v1961_v41, %v4863_v49  ;;  %v1970_v27 = vmul.f32 %v1962_v40, %v4875_v38 }
 0x57b   : > { %v2228_v11 = vpop.permute.xlu0 %2227 }
 0x57c   : > { %v2220_v22 = vpop.permute.xlu1 %2219  ;;  %v2075_v0 = vpop.permute.xlu2 %2074 }
 0x57d   : > { %v2233_v15 = vsel %vm968_vm6, %v2220_v22, %v2228_v11  ;;  %v2237_v57 = vsel %vm968_vm6, %v2228_v11, %v2220_v22  ;;  %v2343_v11 = vld [vmem:[#allocation8 + $0x228] sm:$0xff] }
 0x57e   : > { %v2252_v13 = vmul.f32 %v2244_v32, %v2233_v15  ;;  %v2253_v5 = vmul.f32 %v2245_v44, %v2237_v57  ;;  %v2099_v15 = vld [vmem:[#allocation8 + $0xb0] sm:$0xff] }
 0x580   : > { %v2260_v54 = vadd.f32 %v2252_v13, %v2211_v1  ;;  %v2261_v8 = vadd.f32 %v2253_v5, %v2212_v60 }
 0x583   : > { %v2269_v4 = vpop.permute.xlu0 %2268 }
 0x584   : > { %v2326_v63 = vpop.permute.xlu1 %2325  ;;  %v5023_v6 = vpop.permute.xlu2 %2180  ;;  %v2282_v52 = vsel %vm1018_vm7, %v2269_v4, %v4987_v61  ;;  %v2286_v58 = vsel %vm1018_vm7, %v4987_v61, %v2269_v4 }
 0x585   : > { %v2301_v25 = vmul.f32 %v2293_v56, %v2282_v52  ;;  %v2302_v2 = vmul.f32 %v2294_v34, %v2286_v58  ;;  %v2331_v22 = vsel %vm1068_vm8, %v4997_v39, %v2326_v63  ;;  %v2148_v52 = vld [vmem:[#allocation8 + $0xf0] sm:$0xff]  ;;  %v2149_v58 = vld [vmem:[#allocation8 + $0xf8] sm:$0xff] }
 0x586   : > { %v2350_v59 = vmul.f32 %v2342_v12, %v2331_v22  ;;  %v2247_v12 = vld [vmem:[#allocation8 + $0x1b8] sm:$0xff] }
 0x587   : > { %v2309_v4 = vadd.f32 %v2301_v25, %v2260_v54  ;;  %v2198_v54 = vld [vmem:[#allocation8 + $0x178] sm:$0xff] }
 0x58b   : > { %v2026_v29 = vpop.permute.xlu0 %2025 }
 0x58c   : > { %v1986_v30 = vpop.permute.xlu1 %1985  ;;  %v5025_v42 = vpop.permute.xlu2 %2221  ;;  %v2038_v20 = vsel %vm768_vm2, %v2026_v29, %v5015_v14  ;;  %v2042_v10 = vsel %vm768_vm2, %v5015_v14, %v2026_v29 }
 0x58d   : > { %v1990_v16 = vsel %vm719_vm1, %v1978_v23, %v1986_v30  ;;  %v1994_v9 = vsel %vm719_vm1, %v1986_v30, %v1978_v23  ;;  %v2335_v23 = vsel %vm1068_vm8, %v2326_v63, %v4997_v39  ;;  %v2310_v30 = vadd.f32 %v2302_v2, %v2261_v8  ;;  %v2100_v39 = vld [vmem:[#allocation8 + $0xb8] sm:$0xff] }
 0x58e   : > { %v2009_v43 = vmul.f32 %v2001_v53, %v1994_v9  ;;  %v2010_v61 = vmul.f32 %v2002_v51, %v1990_v16  ;;  %v2351_v47 = vmul.f32 %v2343_v11, %v2335_v23  ;;  %v2058_v56 = vmul.f32 %v2050_v3, %v2042_v10 }
 0x58f   : > { %v2059_v34 = vmul.f32 %v2051_v62, %v2038_v20  ;;  %v2358_v51 = vadd.f32 %v2350_v59, %v2309_v4  ;;  %v2296_v20 = vld [vmem:[#allocation8 + $0x1f8] sm:$0xff]  ;;  %v2344_v59 = vld [vmem:[#allocation8 + $0x230] sm:$0xff] }
 0x590   : > { %v2017_v32 = vadd.f32 %v2009_v43, %v1969_v17  ;;  %v2018_v44 = vadd.f32 %v2010_v61, %v1970_v27  ;;  %v2359_v16 = vadd.f32 %v2351_v47, %v2310_v30  ;;  %v2197_v61 = vld [vmem:[#allocation8 + $0x170] sm:$0xff]  ;;  %v2345_v47 = vld [vmem:[#allocation8 + $0x238] sm:$0xff] }
 0x592   : > { %v2066_v9 = vadd.f32 %v2058_v56, %v2017_v32  ;;  %v2067_v1 = vadd.f32 %v2059_v34, %v2018_v44 }
 0x593   : > { %v2132_v28 = vpop.permute.xlu0 %2131 }
 0x594   : > { %v2083_v24 = vpop.permute.xlu1 %2082  ;;  %v5043_v35 = vpop.permute.xlu2 %2327 }
 0x595   : > { %v2087_v63 = vsel %vm818_vm3, %v2075_v0, %v2083_v24  ;;  %v2091_v57 = vsel %vm818_vm3, %v2083_v24, %v2075_v0 }
 0x596   : > { %v2107_v5 = vmul.f32 %v2099_v15, %v2091_v57  ;;  %v2108_v53 = vmul.f32 %v2100_v39, %v2087_v63 }
 0x598   : > { %v2115_v40 = vadd.f32 %v2107_v5, %v2066_v9  ;;  %v2116_v43 = vadd.f32 %v2108_v53, %v2067_v1  ;;  %v2340_v1 = vld [vmem:[#allocation8 + $0x210] sm:$0xff] }
 0x59b   : > { %v2173_v37 = vpop.permute.xlu0 %2172 }
 0x59c   : > { %v2124_v55 = vpop.permute.xlu1 %2123  ;;  %v2379_v29 = vpop.permute.xlu2 %2378  ;;  %v2189_v8 = vsel %vm918_vm5, %v5023_v6, %v2173_v37 }
 0x59d   : > { %v2136_v13 = vsel %vm868_vm4, %v2124_v55, %v2132_v28  ;;  %v2140_v14 = vsel %vm868_vm4, %v2132_v28, %v2124_v55  ;;  %v5071_v25 = vadd.f32 %v2379_v29, %v2358_v51  ;;  %v5073_v2 = vadd.f32 %v2379_v29, %v2359_v16  ;;  %v2246_v55 = vld [vmem:[#allocation8 + $0x1b0] sm:$0xff] }
 0x59e   : > { %v2156_v24 = vmul.f32 %v2148_v52, %v2140_v14  ;;  %v2157_v60 = vmul.f32 %v2149_v58, %v2136_v13  ;;  %v2185_v28 = vsel %vm918_vm5, %v2173_v37, %v5023_v6  ;;  %v2206_v3 = vmul.f32 %v2198_v54, %v2189_v8  ;;  %v2295_v37 = vld [vmem:[#allocation8 + $0x1f0] sm:$0xff] }
 0x59f   : > { %v2398_v27 = vsub.f32 0.0, %v5071_v25  ;;  %v2399_v4 = vsub.f32 0.0, %v5073_v2  ;;  %v2205_v30 = vmul.f32 %v2197_v61, %v2185_v28 }
 0x5a0   : > { %v2164_v23 = vadd.f32 %v2156_v24, %v2115_v40  ;;  %v2165_v17 = vadd.f32 %v2157_v60, %v2116_v43 }
 0x5a1   : > { %v2410_v32 = vmul.f32 1.442695, %v2398_v27  ;;  %v2412_v44 = vmul.f32 1.442695, %v2399_v4 }
 0x5a2   : > { %v2213_v15 = vadd.f32 %v2205_v30, %v2164_v23  ;;  %v2214_v39 = vadd.f32 %v2206_v3, %v2165_v17 }
 0x5a3   : > { %v2279_v0 = vpop.permute.xlu0 %2278  ;;  %3186 = vpow2.f32 %v2410_v32 }
 0x5a4   : > { %v2230_v41 = vpop.permute.xlu1 %2229  ;;  %3188 = vpow2.f32 %v2412_v44  ;;  %v2374_v27 = vpop.permute.xlu2 %2373 }
 0x5a5   : > { %v2234_v11 = vsel %vm968_vm6, %v5025_v42, %v2230_v41  ;;  %v2238_v22 = vsel %vm968_vm6, %v2230_v41, %v5025_v42 }
 0x5a6   : > { %v2254_v62 = vmul.f32 %v2246_v55, %v2234_v11  ;;  %v2255_v6 = vmul.f32 %v2247_v12, %v2238_v22 }
 0x5a8   : > { %v2262_v52 = vadd.f32 %v2254_v62, %v2213_v15  ;;  %v2263_v58 = vadd.f32 %v2255_v6, %v2214_v39 }
 0x5a9   : > { %v3187_v55 = vpop.eup %3186 }
 0x5aa   : > { %v3189_v12 = vpop.eup %3188  ;;  %v2422_v4 = vadd.f32 1.0, %v3187_v55 }
 0x5ab   : > { %v2320_v10 = vpop.permute.xlu0 %2319  ;;  %v2423_v62 = vadd.f32 1.0, %v3189_v12 }
 0x5ac   : > { %v2271_v63 = vpop.permute.xlu1 %2270  ;;  %v2332_v56 = vsel %vm1068_vm8, %v2320_v10, %v5043_v35  ;;  %v2336_v34 = vsel %vm1068_vm8, %v5043_v35, %v2320_v10 }
 0x5ad   : > { %v2283_v42 = vsel %vm1018_vm7, %v2271_v63, %v2279_v0  ;;  %v2287_v57 = vsel %vm1018_vm7, %v2279_v0, %v2271_v63  ;;  %v2352_v29 = vmul.f32 %v2344_v59, %v2332_v56  ;;  %v2353_v5 = vmul.f32 %v2345_v47, %v2336_v34  ;;  %v2341_v0 = vld [vmem:[#allocation8 + $0x218] sm:$0xff] }
 0x5ae   : > { %v2303_v13 = vmul.f32 %v2295_v37, %v2283_v42  ;;  %v2304_v14 = vmul.f32 %v2296_v20, %v2287_v57 }
 0x5b0   : > { %v2311_v53 = vadd.f32 %v2303_v13, %v2262_v52  ;;  %v2312_v51 = vadd.f32 %v2304_v14, %v2263_v58 }
 0x5b2   : > { %v2360_v16 = vadd.f32 %v2352_v29, %v2311_v53  ;;  %v2361_v9 = vadd.f32 %v2353_v5, %v2312_v51 }
 0x5b3   : > { %v2384_v24 = vpop.permute.xlu0 %2383 }
 0x5b4   : > { %v2324_v60 = vpop.permute.xlu1 %2323  ;;  %v2392_v41 = vadd.f32 %v2384_v24, %v2360_v16  ;;  %v2393_v40 = vadd.f32 %v2384_v24, %v2361_v9 }
 0x5b5   : > { %v2330_v35 = vsel %vm1068_vm8, %v4935_v48, %v2324_v60  ;;  %v2334_v43 = vsel %vm1068_vm8, %v2324_v60, %v4935_v48 }
 0x5b6   : > { %v2348_v61 = vmul.f32 %v2340_v1, %v2330_v35  ;;  %v2349_v54 = vmul.f32 %v2341_v0, %v2334_v43  ;;  %v2400_v28 = vsub.f32 0.0, %v2392_v41  ;;  %v2401_v8 = vsub.f32 0.0, %v2393_v40 }
 0x5b8   : > { %v2356_v11 = vadd.f32 %v2348_v61, %v4993_v45  ;;  %v2357_v22 = vadd.f32 %v2349_v54, %v4995_v19  ;;  %v2414_v23 = vmul.f32 1.442695, %v2400_v28  ;;  %v2416_v17 = vmul.f32 1.442695, %v2401_v8 }
 0x5ba   : > { %v2388_v30 = vadd.f32 %v2374_v27, %v2356_v11  ;;  %v2389_v3 = vadd.f32 %v2374_v27, %v2357_v22  ;;  %3190 = vpow2.f32 %v2414_v23  ;;  %v2929_v11 = vld [vmem:[%s5239_s13] sm:$0xff] }
 0x5bb   : > { %3192 = vpow2.f32 %v2416_v17 }
 0x5bc   : > { %v2396_v18 = vsub.f32 0.0, %v2388_v30  ;;  %v2397_v48 = vsub.f32 0.0, %v2389_v3  ;;  %v2369_v6 = vpop.permute.xlu1 %2368  ;;  %3194 = vrcp.f32 %v2422_v4 }
 0x5bd   : > { %v2386_v37 = vadd.f32 %v2369_v6, %v4925_v36  ;;  %v2387_v20 = vadd.f32 %v2369_v6, %v4927_v46  ;;  %3196 = vrcp.f32 %v2423_v62 }
 0x5be   : > { %v2406_v45 = vmul.f32 1.442695, %v2396_v18  ;;  %v2408_v10 = vmul.f32 1.442695, %v2397_v48 }
 0x5bf   : > { %v2394_v19 = vsub.f32 0.0, %v2386_v37  ;;  %v2395_v32 = vsub.f32 0.0, %v2387_v20 }
 0x5c0   : > { %v3191_v44 = vpop.eup %3190  ;;  %3198 = vpow2.f32 %v2406_v45 }
 0x5c1   : > { %v3193_v15 = vpop.eup %3192  ;;  %3200 = vpow2.f32 %v2408_v10  ;;  %v2424_v39 = vadd.f32 1.0, %v3191_v44  ;;  %v2402_v63 = vmul.f32 1.442695, %v2394_v19  ;;  %v2404_v57 = vmul.f32 1.442695, %v2395_v32 }
 0x5c2   : > { %v2425_v42 = vadd.f32 1.0, %v3193_v15  ;;  %v3195_v59 = vpop.eup %3194 }
 0x5c3   : > { %3202 = vrcp.f32 %v2424_v39  ;;  %v3197_v36 = vpop.eup %3196  ;;  %v2438_v34 = vmul.f32 %v3195_v59, %v5071_v25 }
 0x5c4   : > { %3204 = vrcp.f32 %v2425_v42  ;;  %v2439_v13 = vmul.f32 %v3197_v36, %v5073_v2 }
 0x5c5   : > { %3206 = vpow2.f32 %v2402_v63  ;;  %v2446_v9 = vadd.f32 %v2438_v34, %v4819_v26 }
 0x5c6   : > { %v3199_v46 = vpop.eup %3198  ;;  %3208 = vpow2.f32 %v2404_v57  ;;  %v2447_v24 = vadd.f32 %v2439_v13, %v4827_v21 }
 0x5c7   : > { %v3201_v47 = vpop.eup %3200  ;;  %v2420_v56 = vadd.f32 1.0, %v3199_v46 }
 0x5c8   : > { %v2421_v52 = vadd.f32 1.0, %v3201_v47 }
 0x5c9   : > { %v3203_v58 = vpop.eup %3202  ;;  %3210 = vrcp.f32 %v2420_v56 }
 0x5ca   : > { %v3205_v14 = vpop.eup %3204  ;;  %v2440_v29 = vmul.f32 %v3203_v58, %v2392_v41  ;;  %3212 = vrcp.f32 %v2421_v52 }
 0x5cb   : > { %v3207_v5 = vpop.eup %3206  ;;  %v2441_v53 = vmul.f32 %v3205_v14, %v2393_v40 }
 0x5cc   : > { %v3209_v51 = vpop.eup %3208  ;;  %v2418_v16 = vadd.f32 1.0, %v3207_v5  ;;  %v2448_v1 = vadd.f32 %v2440_v29, %v4863_v49 }
 0x5cd   : > { %v2419_v0 = vadd.f32 1.0, %v3209_v51  ;;  %v2449_v25 = vadd.f32 %v2441_v53, %v4875_v38 }
 0x5ce   : > { %3214 = vrcp.f32 %v2418_v16  ;;  %v2456_v60 = vpack.c.bf16 %v2448_v1, %v2446_v9 }
 0x5cf   : > { %3216 = vrcp.f32 %v2419_v0  ;;  %v2457_v2 = vpack.c.bf16 %v2449_v25, %v2447_v24  ;;  %v3211_v35 = vpop.eup %3210 }
 0x5d0   : > { %2480 = vmatpush.bf16.msrb.mxu2 %v2456_v60  ;;  %v3213_v41 = vpop.eup %3212  ;;  %v2436_v40 = vmul.f32 %v3211_v35, %v2388_v30 }
 0x5d1   : > { %2499 = vmatpush.bf16.msrb.mxu3 %v2457_v2  ;;  %v2437_v61 = vmul.f32 %v3213_v41, %v2389_v3 }
 0x5d2   : > { %v2444_v21 = vadd.f32 %v2436_v40, %v4785_v33 }
 0x5d3   : > { %v2445_v8 = vadd.f32 %v2437_v61, %v4787_v31 }
 0x5d4   : > { %v3215_v43 = vpop.eup %3214 }
 0x5d5   : > { %v3217_v54 = vpop.eup %3216  ;;  %v2434_v26 = vmul.f32 %v3215_v43, %v2386_v37 }
 0x5d6   : > { %v2435_v28 = vmul.f32 %v3217_v54, %v2387_v20 }
 0x5d7   : > { %v2442_v49 = vadd.f32 %v2434_v26, %v4751_v7  ;;  %v2930_v7 = vld [vmem:[%s5239_s13 + $0x8] sm:$0xff] }
 0x5d8   : > { %v2443_v38 = vadd.f32 %v2435_v28, %v4753_v50 }
 0x5d9   : > { %v2454_v55 = vpack.c.bf16 %v2444_v21, %v2442_v49 }
 0x5da   : > { %v2455_v12 = vpack.c.bf16 %v2445_v8, %v2443_v38 }
 0x5db   : > { %2481 = vmatpush.bf16.msrb.mxu2 %v2454_v55 }
 0x5dc   : > { %2500 = vmatpush.bf16.msrb.mxu3 %v2455_v12 }
 0x5de   : > { %2913 = vmatmul.msk.bf16.vlgmr.msrb.gmra.mxu2 %vm591_vm0, %v2929_v11 }
 0x5df   : > { %2915 = vmatmul.msk.bf16.vlgmr.msrb.gmra.mxu3 %vm591_vm0, %v2929_v11 }
 0x5ee   : > { %2914 = vmatmul.msk.bf16.gmra.mxu2 %vm591_vm0, %v2930_v7 }
 0x5ef   : > { %2916 = vmatmul.msk.bf16.gmra.mxu3 %vm591_vm0, %v2930_v7 }
 0x661   : > { %v2483_v50 = vpop.f32.mrf.mxu2 }
 0x662   : > { %v2512_v33 = vsub.f32 0.0, %v2483_v50  ;;  %v2502_v31 = vpop.f32.mrf.mxu3 }
 0x663   : > { %v2513_v22 = vsub.f32 0.0, %v2502_v31 }
 0x664   : > { %v2520_v23 = vmul.f32 1.442695, %v2512_v33 }
 0x665   : > { %v2522_v17 = vmul.f32 1.442695, %v2513_v22 }
 0x666   : > { %3218 = vpow2.f32 %v2520_v23 }
 0x667   : > { %3220 = vpow2.f32 %v2522_v17 }
 0x669   : > { %v2485_v27 = vpop.f32.mrf.mxu2 }
 0x66a   : > { %v2514_v4 = vsub.f32 0.0, %v2485_v27  ;;  %v2504_v30 = vpop.f32.mrf.mxu3 }
 0x66b   : > { %v2515_v3 = vsub.f32 0.0, %v2504_v30 }
 0x66c   : > { %v3219_v62 = vpop.eup %3218  ;;  %v2524_v18 = vmul.f32 1.442695, %v2514_v4 }
 0x66d   : > { %v3221_v48 = vpop.eup %3220  ;;  %v2536_v6 = vadd.f32 1.0, %v3219_v62  ;;  %v2526_v37 = vmul.f32 1.442695, %v2515_v3 }
 0x66e   : > { %v2537_v20 = vadd.f32 1.0, %v3221_v48  ;;  %3222 = vpow2.f32 %v2524_v18 }
 0x66f   : > { %3224 = vrcp.f32 %v2536_v6 }
 0x670   : > { %3226 = vrcp.f32 %v2537_v20 }
 0x671   : > { %3228 = vpow2.f32 %v2526_v37  ;;  %v2488_v45 = vpop.f32.mrf.mxu2 }
 0x672   : > { %v2516_v10 = vsub.f32 0.0, %v2488_v45  ;;  %v2507_v19 = vpop.f32.mrf.mxu3 }
 0x673   : > { %v2517_v32 = vsub.f32 0.0, %v2507_v19 }
 0x674   : > { %v3223_v44 = vpop.eup %3222  ;;  %v2528_v15 = vmul.f32 1.442695, %v2516_v10 }
 0x675   : > { %v3225_v39 = vpop.eup %3224  ;;  %v2538_v63 = vadd.f32 1.0, %v3223_v44  ;;  %v2530_v42 = vmul.f32 1.442695, %v2517_v32 }
 0x676   : > { %v3227_v57 = vpop.eup %3226  ;;  %v2552_v59 = vmul.f32 %v3225_v39, %v2483_v50  ;;  %3230 = vpow2.f32 %v2528_v15 }
 0x677   : > { %v3229_v36 = vpop.eup %3228  ;;  %v2553_v46 = vmul.f32 %v3227_v57, %v2502_v31  ;;  %3232 = vrcp.f32 %v2538_v63 }
 0x678   : > { %v2560_v47 = vsub.f32 0.0, %v2552_v59  ;;  %v2539_v56 = vadd.f32 1.0, %v3229_v36  ;;  %3234 = vpow2.f32 %v2530_v42 }
 0x679   : > { %v2561_v34 = vsub.f32 0.0, %v2553_v46  ;;  %v5129_v52 = vpop.f32.mrf.mxu2 }
 0x67a   : > { %v2568_v58 = vmul.f32 1.442695, %v2560_v47  ;;  %3236 = vrcp.f32 %v2539_v56  ;;  %v2518_v13 = vsub.f32 0.0, %v5129_v52  ;;  %v5132_v14 = vpop.f32.mrf.mxu3 }
 0x67b   : > { %v2570_v29 = vmul.f32 1.442695, %v2561_v34  ;;  %v2519_v5 = vsub.f32 0.0, %v5132_v14 }
 0x67c   : > { %v3231_v53 = vpop.eup %3230  ;;  %3238 = vpow2.f32 %v2568_v58  ;;  %v2532_v51 = vmul.f32 1.442695, %v2518_v13 }
 0x67d   : > { %v3233_v16 = vpop.eup %3232  ;;  %3240 = vpow2.f32 %v2570_v29  ;;  %v2540_v9 = vadd.f32 1.0, %v3231_v53  ;;  %v2534_v1 = vmul.f32 1.442695, %v2519_v5 }
 0x67e   : > { %v3235_v0 = vpop.eup %3234  ;;  %v2554_v24 = vmul.f32 %v3233_v16, %v2485_v27  ;;  %3242 = vpow2.f32 %v2532_v51 }
 0x67f   : > { %3244 = vrcp.f32 %v2540_v9  ;;  %v2541_v25 = vadd.f32 1.0, %v3235_v0 }
 0x680   : > { %v3237_v60 = vpop.eup %3236  ;;  %v2562_v2 = vsub.f32 0.0, %v2554_v24  ;;  %3246 = vpow2.f32 %v2534_v1 }
 0x681   : > { %v2555_v35 = vmul.f32 %v3237_v60, %v2504_v30  ;;  %3248 = vrcp.f32 %v2541_v25 }
 0x682   : > { %v3239_v41 = vpop.eup %3238  ;;  %v2572_v40 = vmul.f32 1.442695, %v2562_v2  ;;  %v3282_v2 = vld [vmem:[%s3706_s28] sm:$0xff] }
 0x683   : > { %v3241_v43 = vpop.eup %3240  ;;  %v2584_v61 = vadd.f32 1.0, %v3239_v41  ;;  %v2563_v54 = vsub.f32 0.0, %v2555_v35 }
 0x684   : > { %v3243_v26 = vpop.eup %3242  ;;  %v2585_v28 = vadd.f32 1.0, %v3241_v43  ;;  %3250 = vpow2.f32 %v2572_v40  ;;  %v3283_v40 = vld [vmem:[%s3706_s28 + $0x8] sm:$0xff] }
 0x685   : > { %v3245_v49 = vpop.eup %3244  ;;  %3252 = vrcp.f32 %v2584_v61  ;;  %v2574_v8 = vmul.f32 1.442695, %v2563_v54  ;;  %v2542_v11 = vadd.f32 1.0, %v3243_v26  ;;  %v2601_v18 = vand.u32 2147483647, %v2584_v61 }
 0x686   : > { %v3247_v21 = vpop.eup %3246  ;;  %3254 = vrcp.f32 %v2585_v28  ;;  %v2556_v55 = vmul.f32 %v3245_v49, %v2488_v45  ;;  %v2603_v6 = vand.u32 2147483648, %v2584_v61  ;;  %v2616_v20 = vand.u32 2147483647, %v2585_v28 }
 0x687   : > { %v3249_v38 = vpop.eup %3248  ;;  %3256 = vpow2.f32 %v2574_v8  ;;  %v2543_v50 = vadd.f32 1.0, %v3247_v21  ;;  %vm2597_vm10 = vweird.f32 %v2584_v61  ;;  %vm5140_vm12 = vcmp.eq.f32.partialorder %v2601_v18, 8.507059e+37 }
 0x688   : > { %v2557_v12 = vmul.f32 %v3249_v38, %v2507_v19  ;;  %v2564_v7 = vsub.f32 0.0, %v2556_v55  ;;  %3258 = vrcp.f32 %v2542_v11  ;;  %v2618_v19 = vand.u32 2147483648, %v2585_v28 }
 0x689   : > { %3260 = vrcp.f32 %v2543_v50  ;;  %vm2612_vm13 = vweird.f32 %v2585_v28  ;;  %v2604_v57 = vor.u32 1.1754944e-38, %v2603_v6  ;;  %vm2617_vm15 = vcmp.eq.f32.partialorder %v2616_v20, 8.507059e+37 }
 0x68a   : > { %v3251_v33 = vpop.eup %3250  ;;  %v2565_v31 = vsub.f32 0.0, %v2557_v12  ;;  %v2576_v17 = vmul.f32 1.442695, %v2564_v7  ;;  %v2619_v56 = vor.u32 1.1754944e-38, %v2618_v19 }
 0x68b   : > { %v3253_v22 = vpop.eup %3252  ;;  %v5135_v23 = vadd.f32 1.0, %v3251_v33 }
 0x68c   : > { %v3255_v27 = vpop.eup %3254  ;;  %v2593_v4 = vmul.f32 %v3253_v22, %v2584_v61  ;;  %v2578_v30 = vmul.f32 1.442695, %v2565_v31  ;;  %vm2598_vm9 = vweird.f32 %v3253_v22 }
 0x68d   : > { %v2608_v3 = vmul.f32 %v3255_v27, %v2585_v28  ;;  %3262 = vrcp.f32 %v5135_v23  ;;  %v3257_v48 = vpop.eup %3256  ;;  %vm2613_vm11 = vweird.f32 %v3255_v27  ;;  %vm2599_vm14 = vmor %vm2597_vm10, %vm2598_vm9  ;;  %v2631_v58 = vand.u32 2147483647, %v5135_v23 }
 0x68e   : > { %v2594_v62 = vsub.f32 1.0, %v2593_v4  ;;  %3264 = vpow2.f32 %v2576_v17  ;;  %v3259_v45 = vpop.eup %3258  ;;  %v5138_v32 = vadd.f32 1.0, %v3257_v48  ;;  %vm2614_vm0 = vmor %vm2612_vm13, %vm2613_vm11  ;;  %v2633_v53 = vand.u32 2147483648, %v5135_v23  ;;  %v3284_v17 = vld [vmem:[%s3706_s28 + $0x10] sm:$0xff] }
 0x68f   : > { %v2609_v37 = vsub.f32 1.0, %v2608_v3  ;;  %3266 = vpow2.f32 %v2578_v30  ;;  %v3261_v15 = vpop.eup %3260  ;;  %v2558_v36 = vmul.f32 %v3259_v45, %v5129_v52  ;;  %vm2627_vm2 = vweird.f32 %v5135_v23 }
 0x690   : > { %v2595_v10 = vmul.f32 %v3253_v22, %v2594_v62  ;;  %3268 = vrcp.f32 %v5138_v32  ;;  %v2559_v25 = vmul.f32 %v3261_v15, %v5132_v14  ;;  %v2646_v14 = vand.u32 2147483647, %v5138_v32 }
 0x691   : > { %v2610_v44 = vmul.f32 %v3255_v27, %v2609_v37  ;;  %v2566_v24 = vsub.f32 0.0, %v2558_v36  ;;  %v2634_v26 = vor.u32 1.1754944e-38, %v2633_v53  ;;  %vm2632_vm4 = vcmp.eq.f32.partialorder %v2631_v58, 8.507059e+37 }
 0x692   : > { %v2596_v39 = vadd.f32 %v3253_v22, %v2595_v10  ;;  %v2567_v21 = vsub.f32 0.0, %v2559_v25  ;;  %v2648_v8 = vand.u32 2147483648, %v5138_v32  ;;  %vm2642_vm6 = vweird.f32 %v5138_v32 }
 0x693   : > { %v3263_v42 = vpop.eup %3262  ;;  %v2611_v59 = vadd.f32 %v3255_v27, %v2610_v44  ;;  %v2580_v49 = vmul.f32 1.442695, %v2566_v24  ;;  %vm2647_vm7 = vcmp.eq.f32.partialorder %v2646_v14, 8.507059e+37 }
 0x694   : > { %v3265_v46 = vpop.eup %3264  ;;  %v2600_v47 = vsel %vm2599_vm14, %v3253_v22, %v2596_v39  ;;  %v2623_v34 = vmul.f32 %v3263_v42, %v5135_v23  ;;  %vm2628_vm1 = vweird.f32 %v3263_v42  ;;  %v2582_v31 = vmul.f32 1.442695, %v2567_v21  ;;  %v3285_v39 = vld [vmem:[%s3706_s28 + $0x18] sm:$0xff] }
 0x695   : > { %v3267_v13 = vpop.eup %3266  ;;  %v2605_v29 = vsel %vm5140_vm12, %v2604_v57, %v2600_v47  ;;  %v2615_v5 = vsel %vm2614_vm0, %v3255_v27, %v2611_v59  ;;  %v5151_v51 = vadd.f32 1.0, %v3265_v46  ;;  %vm2629_vm3 = vmor %vm2627_vm2, %vm2628_vm1  ;;  %v2649_v4 = vor.u32 1.1754944e-38, %v2648_v8  ;;  %v3288_v8 = vld [vmem:[%s3706_s28 + $0x30] sm:$0xff] }
 0x696   : > { %v2712_v52 = vadd.f32 1.0, %v2605_v29  ;;  %v2620_v16 = vsel %vm2617_vm15, %v2619_v56, %v2615_v5  ;;  %v2624_v9 = vsub.f32 1.0, %v2623_v34  ;;  %v5153_v1 = vadd.f32 1.0, %v3267_v13  ;;  %v3269_v60 = vpop.eup %3268  ;;  %v3286_v5 = vld [vmem:[%s3706_s28 + $0x20] sm:$0xff] }
 0x697   : > { %v2713_v0 = vadd.f32 1.0, %v2620_v16  ;;  %3270 = vrcp.f32 %v5151_v51  ;;  %v2638_v61 = vmul.f32 %v3269_v60, %v5138_v32  ;;  %vm2643_vm5 = vweird.f32 %v3269_v60 }
 0x698   : > { %v2720_v35 = vmul.f32 %v3282_v2, %v2712_v52  ;;  %v2625_v41 = vmul.f32 %v3263_v42, %v2624_v9  ;;  %3272 = vrcp.f32 %v5153_v1  ;;  %vm2644_vm8 = vmor %vm2642_vm6, %vm2643_vm5  ;;  %v2661_v62 = vand.u32 2147483647, %v5151_v51 }
 0x699   : > { %v2721_v43 = vmul.f32 %v3283_v40, %v2713_v0  ;;  %v2639_v28 = vsub.f32 1.0, %v2638_v61  ;;  %3274 = vpow2.f32 %v2580_v49  ;;  %v2663_v18 = vand.u32 2147483648, %v5151_v51 }
 0x69a   : > { %2728 = vst [vmem:[%s5163_s15] sm:$0xff] %v2720_v35  ;;  %v2626_v54 = vadd.f32 %v3263_v42, %v2625_v41  ;;  %3276 = vpow2.f32 %v2582_v31  ;;  %v2678_v20 = vand.u32 2147483648, %v5153_v1  ;;  %v2676_v32 = vand.u32 2147483647, %v5153_v1 }
 0x69b   : > { %2729 = vst [vmem:[%s5163_s15 + $0x8] sm:$0xff] %v2721_v43  ;;  %v2640_v11 = vmul.f32 %v3269_v60, %v2639_v28  ;;  %vm2657_vm11 = vweird.f32 %v5151_v51  ;;  %vm2672_vm13 = vweird.f32 %v5153_v1  ;;  %vm2662_vm14 = vcmp.eq.f32.partialorder %v2661_v62, 8.507059e+37 }
 0x69c   : > { %v2630_v38 = vsel %vm2629_vm3, %v3263_v42, %v2626_v54  ;;  %v2664_v42 = vor.u32 1.1754944e-38, %v2663_v18  ;;  %v2679_v46 = vor.u32 1.1754944e-38, %v2678_v20  ;;  %vm2677_vm0 = vcmp.eq.f32.partialorder %v2676_v32, 8.507059e+37 }
 0x69d   : > { %v3271_v55 = vpop.eup %3270  ;;  %v2635_v12 = vsel %vm2632_vm4, %v2634_v26, %v2630_v38  ;;  %v2641_v22 = vadd.f32 %v3269_v60, %v2640_v11 }
 0x69e   : > { %v3273_v7 = vpop.eup %3272  ;;  %v2714_v50 = vadd.f32 1.0, %v2635_v12  ;;  %v2653_v33 = vmul.f32 %v3271_v55, %v5151_v51  ;;  %vm2658_vm9 = vweird.f32 %v3271_v55  ;;  %v3287_v51 = vld [vmem:[%s3706_s28 + $0x28] sm:$0xff] }
 0x69f   : > { %v2668_v23 = vmul.f32 %v3273_v7, %v5153_v1  ;;  %v2645_v3 = vsel %vm2644_vm8, %v3269_v60, %v2641_v22  ;;  %v3275_v45 = vpop.eup %3274  ;;  %vm2673_vm10 = vweird.f32 %v3273_v7  ;;  %vm2659_vm12 = vmor %vm2657_vm11, %vm2658_vm9 }
 0x6a0   : > { %v2722_v27 = vmul.f32 %v3284_v17, %v2714_v50  ;;  %v2654_v30 = vsub.f32 1.0, %v2653_v33  ;;  %v2650_v6 = vsel %vm2647_vm7, %v2649_v4, %v2645_v3  ;;  %v2590_v15 = vadd.f32 1.0, %v3275_v45  ;;  %v3277_v59 = vpop.eup %3276  ;;  %vm2674_vm15 = vmor %vm2672_vm13, %vm2673_vm10 }
 0x6a1   : > { %v2669_v48 = vsub.f32 1.0, %v2668_v23  ;;  %v2715_v10 = vadd.f32 1.0, %v2650_v6  ;;  %v2591_v34 = vadd.f32 1.0, %v3277_v59 }
 0x6a2   : > { %2730 = vst [vmem:[%s5163_s15 + $0x10] sm:$0xff] %v2722_v27  ;;  %v2655_v37 = vmul.f32 %v3271_v55, %v2654_v30  ;;  %3278 = vrcp.f32 %v2590_v15  ;;  %v2693_v24 = vand.u32 2147483648, %v2590_v15  ;;  %v2691_v2 = vand.u32 2147483647, %v2590_v15 }
 0x6a3   : > { %v2670_v19 = vmul.f32 %v3273_v7, %v2669_v48  ;;  %v2723_v63 = vmul.f32 %v3285_v39, %v2715_v10  ;;  %3280 = vrcp.f32 %v2591_v34  ;;  %vm2687_vm2 = vweird.f32 %v2590_v15 }
 0x6a4   : > { %v2656_v44 = vadd.f32 %v3271_v55, %v2655_v37  ;;  %v2708_v40 = vand.u32 2147483648, %v2591_v34  ;;  %v2694_v43 = vor.u32 1.1754944e-38, %v2693_v24  ;;  %v2706_v54 = vand.u32 2147483647, %v2591_v34 }
 0x6a5   : > { %v2671_v57 = vadd.f32 %v3273_v7, %v2670_v19  ;;  %2731 = vst [vmem:[%s5163_s15 + $0x18] sm:$0xff] %v2723_v63  ;;  %vm2692_vm5 = vcmp.eq.f32.partialorder %v2691_v2, 8.507059e+37  ;;  %vm2702_vm6 = vweird.f32 %v2591_v34 }
 0x6a6   : > { %v2660_v36 = vsel %vm2659_vm12, %v3271_v55, %v2656_v44  ;;  %v2709_v21 = vor.u32 1.1754944e-38, %v2708_v40  ;;  %vm2707_vm8 = vcmp.eq.f32.partialorder %v2706_v54, 8.507059e+37 }
 0x6a7   : > { %v2665_v47 = vsel %vm2662_vm14, %v2664_v42, %v2660_v36  ;;  %v2675_v56 = vsel %vm2674_vm15, %v3273_v7, %v2671_v57  ;;  %v3289_v7 = vld [vmem:[%s3706_s28 + $0x38] sm:$0xff] }
 0x6a8   : > { %v2716_v58 = vadd.f32 1.0, %v2665_v47  ;;  %v2680_v13 = vsel %vm2677_vm0, %v2679_v46, %v2675_v56  ;;  %v3279_v16 = vpop.eup %3278 }
 0x6a9   : > { %v2717_v29 = vadd.f32 1.0, %v2680_v13  ;;  %v2683_v9 = vmul.f32 %v3279_v16, %v2590_v15  ;;  %v3281_v1 = vpop.eup %3280  ;;  %vm2688_vm1 = vweird.f32 %v3279_v16 }
 0x6aa   : > { %v2724_v53 = vmul.f32 %v3286_v5, %v2716_v58  ;;  %v2698_v25 = vmul.f32 %v3281_v1, %v2591_v34  ;;  %vm2689_vm3 = vmor %vm2687_vm2, %vm2688_vm1  ;;  %vm2703_vm4 = vweird.f32 %v3281_v1 }
 0x6ab   : > { %v2725_v52 = vmul.f32 %v3287_v51, %v2717_v29  ;;  %v2684_v0 = vsub.f32 1.0, %v2683_v9  ;;  %vm2704_vm7 = vmor %vm2702_vm6, %vm2703_vm4 }
 0x6ac   : > { %2732 = vst [vmem:[%s5163_s15 + $0x20] sm:$0xff] %v2724_v53  ;;  %v2699_v35 = vsub.f32 1.0, %v2698_v25 }
 0x6ad   : > { %2733 = vst [vmem:[%s5163_s15 + $0x28] sm:$0xff] %v2725_v52  ;;  %v2685_v60 = vmul.f32 %v3279_v16, %v2684_v0 }
 0x6ae   : > { %v2700_v61 = vmul.f32 %v3281_v1, %v2699_v35 }
 0x6af   : > { %v2686_v41 = vadd.f32 %v3279_v16, %v2685_v60 }
 0x6b0   : > { %v2701_v28 = vadd.f32 %v3281_v1, %v2700_v61 }
 0x6b1   : > { %v2690_v14 = vsel %vm2689_vm3, %v3279_v16, %v2686_v41 }
 0x6b2   : > { %v2695_v26 = vsel %vm2692_vm5, %v2694_v43, %v2690_v14  ;;  %v2705_v38 = vsel %vm2704_vm7, %v3281_v1, %v2701_v28 }
 0x6b3   : > { %v2718_v49 = vadd.f32 1.0, %v2695_v26  ;;  %v2710_v12 = vsel %vm2707_vm8, %v2709_v21, %v2705_v38 }
 0x6b4   : > { %v2719_v11 = vadd.f32 1.0, %v2710_v12 }
 0x6b5   : > { %v2726_v55 = vmul.f32 %v3288_v8, %v2718_v49 }
 0x6b6   : > { %v2727_v50 = vmul.f32 %v3289_v7, %v2719_v11 }
 0x6b7   : > { %2734 = vst [vmem:[%s5163_s15 + $0x30] sm:$0xff] %v2726_v55 }
 0x6b8   : > { %2735 = vst [vmem:[%s5163_s15 + $0x38] sm:$0xff] %v2727_v50 }
 0x6b9   : > { %3437 = shalt.err (!%p3434_p10)
}
 0x6ba   : > { %s3501_s11 = smov 256   ;;  %s3502_s28 = smov 512  }
 0x6bb   : > { %2946 = dma.vmem_to_hbm [thread:$0]  (%p3670_p7), %s2750_s17, 1024, %s2752_s3, %s2737_s22, %s3501_s11, %s3502_s28, %s3494_s16  }
 0x6bc PF: > { %s5321_s15 = sld [smem:[#allocation15_spill]] }
 0x6bd   : > { %s5323_s25 = sld [smem:[#allocation17_spill]] }
 0x6c2   : > { %s2766_s20 = sand.u32 1, %s5321_s15  }
 0x6c3   : > { %p5324_p12 = scmp.ge.s32.totalorder %s5323_s25, 2  ;;  %s2767_s29 = scalar_lea.sflag [#allocation4], %s2766_s20 }
 0x6c5   : > { %p2963_p13 = pnand %p5324_p12, %p3613_p6 }
 0x6c7   : > { %p2964_p0 = pneg %p2963_p13 }
 0x6c9   : > { %3467 = dma.done.wait (%p2964_p0), %s2767_s29, 1024  }
 0x6ca   : > { %3469 = vsyncadd (%p2964_p0), %s2767_s29, 4294966272  ;;  %s5325_s16 = sld [smem:[#allocation19_spill]]  ;;  %s5328_s29 = smov %s3476_s30 }
 0x6cb   : > { %s5326_s27 = sld [smem:[#allocation16_spill]] }
 0x6cc   : > { %s5327_s15 = sld [smem:[#allocation20_spill]] }
 0x6d0   : > { %p29_p3 = scmp.ge.s32.totalorder %s5325_s16, 4  }
 0x6d1   : > { %s5329_s30 = smov %s5326_s27 }
 0x6d2   :  { %31 = sbr.rel (!%p29_p3) target bundleno = 11 (0xb), region = 157 }
 0x6d7   :  { %2773 = vsyncpa [#allocation3], 1 }
 0x6d8   :  { %2775 = vsyncpa [#allocation3 + $0x1], 1 }
 0x6d9   :  { %2776 = vsyncpa [#allocation6], 1 }
 0x6da   :  { %2777 = vsyncpa [#allocation9], 1 }
 0x6db   :  { %2778 = vsyncpa [#allocation4], 1 }
 0x6dc   :  { %2780 = vsyncpa [#allocation4 + $0x1], 1 }

</bundles_post_ra>
